<compile_context>
chip_gen: v7x
topology: tpu7x:2x2x1
jax: 0.10.0
libtpu: 0.0.40
codegen_flags: <defaults>
</compile_context>

<pallas_src>
import functools

import jax
import jax.numpy as jnp
from jax.experimental import pallas as pl
from jax.experimental.pallas import tpu as pltpu

_SQRT_2_OVER_PI = 0.7978845608028654


def _gelu_tanh(x):
    # tanh-approximate GELU. tanh lowers to the EUP slot (free vs. the binding
    # VALU slot); max abs deviation from exact erf-GELU is ~3e-4.
    inner = _SQRT_2_OVER_PI * (x + 0.044715 * (x * x * x))
    return 0.5 * x * (1.0 + jnp.tanh(inner))


def conv_branch_kernel(x_ref, dw_w_ref, dw_b_ref, pw_w_ref, pw_b_ref,
                       out_ref, *, h, w):
    """One block of `bb` images per grid step.

    x_ref    : (bb, h, w, C)   NHWC tile (no halo; zero padding handled here)
    dw_w_ref : (9, C)          depthwise 3x3 taps, row = ky*3 + kx
    dw_b_ref : (1, C)          depthwise bias
    pw_w_ref : (C, C)          pointwise weight (Cin, Cout), bf16
    pw_b_ref : (1, C)          pointwise bias
    out_ref  : (bb, h*w, C)    output tokens
    """
    x = x_ref[...].astype(jnp.float32)
    bb, _, _, c = x.shape

    # Width (sublane-axis) shifts: XLU roll + iota mask instead of
    # non-8-aligned sublane slices (which would force relayout copies).
    col = jax.lax.broadcasted_iota(jnp.int32, (w, c), 0)
    x_l = jnp.where(col >= 1, pltpu.roll(x, shift=1, axis=2), 0.0)          # x[.., j-1, :]
    x_r = jnp.where(col < w - 1, pltpu.roll(x, shift=w - 1, axis=2), 0.0)   # x[.., j+1, :]

    taps = dw_w_ref[...].astype(jnp.float32)      # (9, C)

    def row_mix(ky):
        # Combine the three horizontal taps of kernel row `ky` in one pass.
        return (x_l * taps[3 * ky + 0:3 * ky + 1, :] +
                x   * taps[3 * ky + 1:3 * ky + 2, :] +
                x_r * taps[3 * ky + 2:3 * ky + 3, :])

    bias = dw_b_ref[...].astype(jnp.float32)      # (1, C)

    # Combine the three kernel rows as pure values (no VMEM scratch
    # read-modify-write). Vertical shifts are a zero-row concat along the
    # untiled h axis, so the scheduler can interleave roll/mul/add freely.
    acc = row_mix(1) + bias                                     # dy = 0
    if h > 1:
        zrow = jnp.zeros((bb, 1, w, c), jnp.float32)
        acc = acc + jnp.concatenate([zrow, row_mix(0)[:, :h - 1]], axis=1)   # dy = -1
        acc = acc + jnp.concatenate([row_mix(2)[:, 1:], zrow], axis=1)       # dy = +1

    act = _gelu_tanh(acc)

    # Pointwise 1x1 conv == matmul over channels: bf16 operands, f32 accumulate.
    act2 = act.reshape(bb * h * w, c).astype(jnp.bfloat16)
    out = jnp.dot(act2, pw_w_ref[...], preferred_element_type=jnp.float32)
    out = out + pw_b_ref[...].astype(jnp.float32)
    out_ref[...] = out.reshape(bb, h * w, c).astype(out_ref.dtype)


def _tpu_hw_params():
    """(vmem_capacity_bytes, tensorcores_per_chip) — best effort, safe fallbacks."""
    vmem_cap = 64 << 20          # conservative default (v7x per-TC capacity)
    n_cores = 1
    try:
        info = pltpu.get_tpu_info()
        vmem_cap = int(getattr(info, "vmem_capacity_bytes", vmem_cap))
        for name in ("num_cores", "core_count", "num_tensorcores",
                     "tensorcores_per_chip", "num_cores_per_chip"):
            v = getattr(info, name, None)
            if v:
                n_cores = int(v)
                break
    except Exception:
        pass
    return vmem_cap, n_cores


def _pick_block_batch(B, hw, C, itemsize, vmem_cap, n_cores):
    """Images per grid step.

    Targets ~512 rows per 1x1-conv matmul (fills the MXU, amortizes ~0.35us
    per-step overhead), keeps the double-buffered in+out block under a budget
    derived from the chip's VMEM capacity (smaller on v7x's 64 MiB), and only
    on multi-TensorCore chips trades block size for >=4 steps per core while
    rows-per-matmul stays >= 256. Single-TC chips (v5e/v6e) get the largest
    block that fits — no forced extra grid steps.
    """
    budget = min(max(vmem_cap // 4, 8 << 20), 24 << 20)
    per_img = hw * C * itemsize * 2 * 2          # in + out, double-buffered
    bb = max(1, min(B, budget // per_img, pl.cdiv(512, hw)))
    if n_cores > 1:
        min_steps = 4 * n_cores
        while bb > 1 and pl.cdiv(B, bb) < min_steps and (bb // 2) * hw >= 256:
            bb //= 2
    return bb


def conv_branch(x, h, w, dw_w, dw_b, pw_w, pw_b, block_batch=None):
    """x: (B, L, C) with L == h*w. Weights are the PyTorch parameters, squeezed:
       dw_w (3, 3, C) <- Conv2d(C, C, 3, groups=C).weight[:, 0].permute(1, 2, 0)
       dw_b (C,)
       pw_w (C, C)    <- Conv2d(C, C, 1).weight[:, :, 0, 0]   (Cout, Cin)
       pw_b (C,)
    """
    B, L, C = x.shape
    assert L == h * w and h >= 1 and w >= 1

    x_img = x.reshape(B, h, w, C)              # metadata-only; no HBM pad/copy

    dw_w_flat = dw_w.reshape(9, C).astype(jnp.float32)     # row = ky*3 + kx
    dw_b2 = dw_b.reshape(1, C).astype(jnp.float32)
    pw_w_t = pw_w.T.astype(jnp.bfloat16)       # (Cin, Cout), MXU-native dtype
    pw_b2 = pw_b.reshape(1, C).astype(jnp.float32)

    vmem_cap, n_cores = _tpu_hw_params()
    bb = block_batch if block_batch is not None else _pick_block_batch(
        B, L, C, x.dtype.itemsize, vmem_cap, n_cores)
    bb = max(1, min(int(bb), B))

    # Pad the batch to a multiple of bb (keeps the tuned block for prime/odd B
    # or user-supplied block_batch). Padded images never mix into real ones.
    n_steps = pl.cdiv(B, bb)
    Bp = n_steps * bb
    if Bp != B:
        x_img = jnp.pad(x_img, ((0, Bp - B), (0, 0), (0, 0), (0, 0)))

    grid_spec = pltpu.PrefetchScalarGridSpec(
        num_scalar_prefetch=0,
        grid=(n_steps,),
        in_specs=[
            pl.BlockSpec((bb, h, w, C), lambda b: (b, 0, 0, 0)),
            pl.BlockSpec((9, C), lambda b: (0, 0)),
            pl.BlockSpec((1, C), lambda b: (0, 0)),
            pl.BlockSpec((C, C), lambda b: (0, 0)),
            pl.BlockSpec((1, C), lambda b: (0, 0)),
        ],
        out_specs=pl.BlockSpec((bb, L, C), lambda b: (b, 0, 0)),
    )

    itemsize = x.dtype.itemsize
    io_bytes = 2 * 2 * bb * L * C * itemsize                 # in+out, double-buffered
    wt_bytes = 2 * ((9 + 1 + 1) * C * 4 + C * C * 2)
    tmp_bytes = 6 * bb * L * C * 4                           # f32 temporaries headroom
    vmem_limit = max(32 << 20, io_bytes + wt_bytes + tmp_bytes + (2 << 20))
    vmem_limit = int(min(vmem_limit, vmem_cap * 3 // 4))

    cost = pl.CostEstimate(
        flops=2 * Bp * L * C * C + 30 * Bp * L * C,
        transcendentals=Bp * L * C,
        bytes_accessed=2 * Bp * L * C * itemsize + 11 * C * 4 + C * C * 2,
    )

    out = pl.pallas_call(
        functools.partial(conv_branch_kernel, h=h, w=w),
        grid_spec=grid_spec,
        out_shape=jax.ShapeDtypeStruct((Bp, L, C), x.dtype),
        compiler_params=pltpu.CompilerParams(
            dimension_semantics=("parallel",),
            vmem_limit_bytes=vmem_limit),
        cost_estimate=cost,
    )(x_img, dw_w_flat, dw_b2, pw_w_t, pw_b2)

    return out[:B] if Bp != B else out


def conv_branch_reference(x, h, w, dw_w, dw_b, pw_w, pw_b):
    """Plain-JAX f32 reference (mirrors the PyTorch module exactly)."""
    B, L, C = x.shape
    x_img = x.reshape(B, h, w, C)
    dw_hwio = dw_w.reshape(3, 3, 1, C)
    y = jax.lax.conv_general_dilated(
        x_img, dw_hwio, window_strides=(1, 1), padding="SAME",
        dimension_numbers=("NHWC", "HWIO", "NHWC"), feature_group_count=C)
    y = y + dw_b[None, None, None, :]
    y = jax.nn.gelu(y, approximate=False)
    z = jnp.einsum("bhwc,oc->bhwo", y, pw_w) + pw_b[None, None, None, :]
    return z.reshape(B, L, C)


if __name__ == "__main__":
    B, dim, h, w = 8, 128, 8, 8
    L = h * w

    key = jax.random.PRNGKey(0)
    kx, k1, k2, k3, k4 = jax.random.split(key, 5)

    x = jax.random.normal(kx, (B, L, dim), dtype=jnp.float32)
    # Deterministic synthetic parameters (PyTorch shapes: dw (dim,1,3,3),
    # pw (dim,dim,1,1)); stored squeezed.
    dw_w = 0.1 * jax.random.normal(k1, (3, 3, dim), dtype=jnp.float32)
    dw_b = 0.05 * jax.random.normal(k2, (dim,), dtype=jnp.float32)
    pw_w = (0.5 / jnp.sqrt(dim)) * jax.random.normal(k3, (dim, dim),
                                                     dtype=jnp.float32)
    pw_b = 0.05 * jax.random.normal(k4, (dim,), dtype=jnp.float32)

    out = conv_branch(x, h, w, dw_w, dw_b, pw_w, pw_b)
    out = jax.block_until_ready(out)

    ref = conv_branch_reference(x, h, w, dw_w, dw_b, pw_w, pw_b)
    assert out.shape == (B, L, dim), out.shape
    # Tolerance covers the bf16 MXU matmul + tanh-approximate GELU.
    max_err = float(jnp.max(jnp.abs(out - ref)))
    assert max_err < 5e-3, max_err

    print("KERNEL_OK")
</pallas_src>

<mosaic_0001>
module attributes {stable_mosaic.version = 11 : i64} {
  func.func @conv_branch_kernel(%arg0: i32, %arg1: memref<8x8x8x128xf32, #tpu.memory_space<vmem>>, %arg2: memref<9x128xf32, #tpu.memory_space<vmem>>, %arg3: memref<1x128xf32, #tpu.memory_space<vmem>>, %arg4: memref<128x128xbf16, #tpu.memory_space<vmem>>, %arg5: memref<1x128xf32, #tpu.memory_space<vmem>>, %arg6: memref<8x64x128xf32, #tpu.memory_space<vmem>>) attributes {dimension_semantics = [#tpu.dimension_semantics<parallel>], iteration_bounds = array<i64: 1>, scalar_prefetch = 0 : i64, scratch_operands = 0 : i64, tpu.core_type = #tpu.core_type<tc>, window_params = [{transform_indices = @transform_0, window_bounds = array<i64: 8, 8, 8, 128>}, {pipeline_mode = #tpu.pipeline_mode<synchronous>, transform_indices = @transform_1, window_bounds = array<i64: 9, 128>}, {pipeline_mode = #tpu.pipeline_mode<synchronous>, transform_indices = @transform_2, window_bounds = array<i64: 1, 128>}, {pipeline_mode = #tpu.pipeline_mode<synchronous>, transform_indices = @transform_3, window_bounds = array<i64: 128, 128>}, {pipeline_mode = #tpu.pipeline_mode<synchronous>, transform_indices = @transform_4, window_bounds = array<i64: 1, 128>}, {transform_indices = @transform_5, window_bounds = array<i64: 8, 64, 128>}]} {
    %c0 = arith.constant 0 : index
    %c0_0 = arith.constant 0 : index
    %c0_1 = arith.constant 0 : index
    %c0_2 = arith.constant 0 : index
    %0 = vector.load %arg1[%c0, %c0_0, %c0_1, %c0_2] : memref<8x8x8x128xf32, #tpu.memory_space<vmem>>, vector<8x8x8x128xf32>
    %1 = tpu.iota {dimensions = array<i32: 0>} : vector<8x128xi32>
    %c1_i32 = arith.constant 1 : i32
    %2 = vector.broadcast %c1_i32 : i32 to vector<8x128xi32>
    %3 = arith.cmpi sge, %1, %2 : vector<8x128xi32>
    %c1_i32_3 = arith.constant 1 : i32
    %4 = tpu.dynamic_rotate %0 by %c1_i32_3 dim 2 : vector<8x8x8x128xf32>, i32 -> vector<8x8x8x128xf32>
    %cst = arith.constant 0.000000e+00 : f32
    %5 = vector.shape_cast %3 : vector<8x128xi1> to vector<1x1x8x128xi1>
    %6 = vector.broadcast %5 : vector<1x1x8x128xi1> to vector<8x8x8x128xi1>
    %7 = vector.broadcast %cst : f32 to vector<8x8x8x128xf32>
    %8 = arith.select %6, %4, %7 : vector<8x8x8x128xi1>, vector<8x8x8x128xf32>
    %c7_i32 = arith.constant 7 : i32
    %9 = vector.broadcast %c7_i32 : i32 to vector<8x128xi32>
    %10 = arith.cmpi slt, %1, %9 : vector<8x128xi32>
    %c7_i32_4 = arith.constant 7 : i32
    %11 = tpu.dynamic_rotate %0 by %c7_i32_4 dim 2 : vector<8x8x8x128xf32>, i32 -> vector<8x8x8x128xf32>
    %cst_5 = arith.constant 0.000000e+00 : f32
    %12 = vector.shape_cast %10 : vector<8x128xi1> to vector<1x1x8x128xi1>
    %13 = vector.broadcast %12 : vector<1x1x8x128xi1> to vector<8x8x8x128xi1>
    %14 = vector.broadcast %cst_5 : f32 to vector<8x8x8x128xf32>
    %15 = arith.select %13, %11, %14 : vector<8x8x8x128xi1>, vector<8x8x8x128xf32>
    %c0_6 = arith.constant 0 : index
    %c0_7 = arith.constant 0 : index
    %16 = vector.load %arg2[%c0_6, %c0_7] : memref<9x128xf32, #tpu.memory_space<vmem>>, vector<9x128xf32>
    %c0_8 = arith.constant 0 : index
    %c0_9 = arith.constant 0 : index
    %17 = vector.load %arg3[%c0_8, %c0_9] : memref<1x128xf32, #tpu.memory_space<vmem>>, vector<1x128xf32>
    %18 = vector.extract_strided_slice %16 {offsets = [3, 0], sizes = [1, 128], strides = [1, 1]} : vector<9x128xf32> to vector<1x128xf32>
    %19 = vector.shape_cast %18 : vector<1x128xf32> to vector<1x1x1x128xf32>
    %20 = vector.broadcast %19 : vector<1x1x1x128xf32> to vector<8x8x8x128xf32>
    %21 = arith.mulf %8, %20 : vector<8x8x8x128xf32>
    %22 = vector.extract_strided_slice %16 {offsets = [4, 0], sizes = [1, 128], strides = [1, 1]} : vector<9x128xf32> to vector<1x128xf32>
    %23 = vector.shape_cast %22 : vector<1x128xf32> to vector<1x1x1x128xf32>
    %24 = vector.broadcast %23 : vector<1x1x1x128xf32> to vector<8x8x8x128xf32>
    %25 = arith.mulf %0, %24 : vector<8x8x8x128xf32>
    %26 = arith.addf %21, %25 : vector<8x8x8x128xf32>
    %27 = vector.extract_strided_slice %16 {offsets = [5, 0], sizes = [1, 128], strides = [1, 1]} : vector<9x128xf32> to vector<1x128xf32>
    %28 = vector.shape_cast %27 : vector<1x128xf32> to vector<1x1x1x128xf32>
    %29 = vector.broadcast %28 : vector<1x1x1x128xf32> to vector<8x8x8x128xf32>
    %30 = arith.mulf %15, %29 : vector<8x8x8x128xf32>
    %31 = arith.addf %26, %30 : vector<8x8x8x128xf32>
    %32 = vector.shape_cast %17 : vector<1x128xf32> to vector<1x1x1x128xf32>
    %33 = vector.broadcast %32 : vector<1x1x1x128xf32> to vector<8x8x8x128xf32>
    %34 = arith.addf %31, %33 : vector<8x8x8x128xf32>
    %cst_10 = arith.constant 0.000000e+00 : f32
    %35 = vector.broadcast %cst_10 : f32 to vector<8x1x8x128xf32>
    %36 = vector.extract_strided_slice %16 {offsets = [0, 0], sizes = [1, 128], strides = [1, 1]} : vector<9x128xf32> to vector<1x128xf32>
    %37 = vector.shape_cast %36 : vector<1x128xf32> to vector<1x1x1x128xf32>
    %38 = vector.broadcast %37 : vector<1x1x1x128xf32> to vector<8x8x8x128xf32>
    %39 = arith.mulf %8, %38 : vector<8x8x8x128xf32>
    %40 = vector.extract_strided_slice %16 {offsets = [1, 0], sizes = [1, 128], strides = [1, 1]} : vector<9x128xf32> to vector<1x128xf32>
    %41 = vector.shape_cast %40 : vector<1x128xf32> to vector<1x1x1x128xf32>
    %42 = vector.broadcast %41 : vector<1x1x1x128xf32> to vector<8x8x8x128xf32>
    %43 = arith.mulf %0, %42 : vector<8x8x8x128xf32>
    %44 = arith.addf %39, %43 : vector<8x8x8x128xf32>
    %45 = vector.extract_strided_slice %16 {offsets = [2, 0], sizes = [1, 128], strides = [1, 1]} : vector<9x128xf32> to vector<1x128xf32>
    %46 = vector.shape_cast %45 : vector<1x128xf32> to vector<1x1x1x128xf32>
    %47 = vector.broadcast %46 : vector<1x1x1x128xf32> to vector<8x8x8x128xf32>
    %48 = arith.mulf %15, %47 : vector<8x8x8x128xf32>
    %49 = arith.addf %44, %48 : vector<8x8x8x128xf32>
    %50 = vector.extract_strided_slice %49 {offsets = [0, 0, 0, 0], sizes = [8, 7, 8, 128], strides = [1, 1, 1, 1]} : vector<8x8x8x128xf32> to vector<8x7x8x128xf32>
    %51 = tpu.concatenate %35, %50 in 1 : vector<8x1x8x128xf32>, vector<8x7x8x128xf32> -> vector<8x8x8x128xf32>
    %52 = arith.addf %34, %51 : vector<8x8x8x128xf32>
    %53 = vector.extract_strided_slice %16 {offsets = [6, 0], sizes = [1, 128], strides = [1, 1]} : vector<9x128xf32> to vector<1x128xf32>
    %54 = vector.shape_cast %53 : vector<1x128xf32> to vector<1x1x1x128xf32>
    %55 = vector.broadcast %54 : vector<1x1x1x128xf32> to vector<8x8x8x128xf32>
    %56 = arith.mulf %8, %55 : vector<8x8x8x128xf32>
    %57 = vector.extract_strided_slice %16 {offsets = [7, 0], sizes = [1, 128], strides = [1, 1]} : vector<9x128xf32> to vector<1x128xf32>
    %58 = vector.shape_cast %57 : vector<1x128xf32> to vector<1x1x1x128xf32>
    %59 = vector.broadcast %58 : vector<1x1x1x128xf32> to vector<8x8x8x128xf32>
    %60 = arith.mulf %0, %59 : vector<8x8x8x128xf32>
    %61 = arith.addf %56, %60 : vector<8x8x8x128xf32>
    %62 = vector.extract_strided_slice %16 {offsets = [8, 0], sizes = [1, 128], strides = [1, 1]} : vector<9x128xf32> to vector<1x128xf32>
    %63 = vector.shape_cast %62 : vector<1x128xf32> to vector<1x1x1x128xf32>
    %64 = vector.broadcast %63 : vector<1x1x1x128xf32> to vector<8x8x8x128xf32>
    %65 = arith.mulf %15, %64 : vector<8x8x8x128xf32>
    %66 = arith.addf %61, %65 : vector<8x8x8x128xf32>
    %67 = vector.extract_strided_slice %66 {offsets = [0, 1, 0, 0], sizes = [8, 7, 8, 128], strides = [1, 1, 1, 1]} : vector<8x8x8x128xf32> to vector<8x7x8x128xf32>
    %68 = tpu.concatenate %67, %35 in 1 : vector<8x7x8x128xf32>, vector<8x1x8x128xf32> -> vector<8x8x8x128xf32>
    %69 = arith.addf %52, %68 : vector<8x8x8x128xf32>
    %70 = arith.mulf %69, %69 : vector<8x8x8x128xf32>
    %71 = arith.mulf %70, %69 : vector<8x8x8x128xf32>
    %cst_11 = arith.constant 4.471500e-02 : f32
    %72 = vector.broadcast %cst_11 : f32 to vector<8x8x8x128xf32>
    %73 = arith.mulf %72, %71 : vector<8x8x8x128xf32>
    %74 = arith.addf %69, %73 : vector<8x8x8x128xf32>
    %cst_12 = arith.constant 0.797884583 : f32
    %75 = vector.broadcast %cst_12 : f32 to vector<8x8x8x128xf32>
    %76 = arith.mulf %75, %74 : vector<8x8x8x128xf32>
    %cst_13 = arith.constant 5.000000e-01 : f32
    %77 = vector.broadcast %cst_13 : f32 to vector<8x8x8x128xf32>
    %78 = arith.mulf %77, %69 : vector<8x8x8x128xf32>
    %79 = math.tanh %76 : vector<8x8x8x128xf32>
    %cst_14 = arith.constant 1.000000e+00 : f32
    %80 = vector.broadcast %cst_14 : f32 to vector<8x8x8x128xf32>
    %81 = arith.addf %80, %79 : vector<8x8x8x128xf32>
    %82 = arith.mulf %78, %81 : vector<8x8x8x128xf32>
    %83 = vector.shape_cast %82 : vector<8x8x8x128xf32> to vector<512x128xf32>
    %84 = arith.truncf %83 : vector<512x128xf32> to vector<512x128xbf16>
    %c0_15 = arith.constant 0 : index
    %c0_16 = arith.constant 0 : index
    %85 = vector.load %arg4[%c0_15, %c0_16] : memref<128x128xbf16, #tpu.memory_space<vmem>>, vector<128x128xbf16>
    %cst_17 = arith.constant dense<0.000000e+00> : vector<512x128xf32>
    %86 = tpu.matmul %84, %85, %cst_17 {dimension_numbers = #tpu.dot_dimension_numbers<[1], [0], [0], [1], [0, 0, 1, 1], [], []>} : vector<512x128xbf16>, vector<128x128xbf16>, vector<512x128xf32> -> vector<512x128xf32>
    %c0_18 = arith.constant 0 : index
    %c0_19 = arith.constant 0 : index
    %87 = vector.load %arg5[%c0_18, %c0_19] : memref<1x128xf32, #tpu.memory_space<vmem>>, vector<1x128xf32>
    %88 = vector.broadcast %87 : vector<1x128xf32> to vector<512x128xf32>
    %89 = arith.addf %86, %88 : vector<512x128xf32>
    %90 = vector.shape_cast %89 : vector<512x128xf32> to vector<8x64x128xf32>
    %c0_20 = arith.constant 0 : index
    %c0_21 = arith.constant 0 : index
    %c0_22 = arith.constant 0 : index
    %91 = vector.load %arg6[%c0_20, %c0_21, %c0_22] : memref<8x64x128xf32, #tpu.memory_space<vmem>>, vector<8x64x128xf32>
    tpu.vector_store %arg6[%c0_20, %c0_21, %c0_22], %90 {strides = array<i32>} : memref<8x64x128xf32, #tpu.memory_space<vmem>>, vector<8x64x128xf32>,
    return
  }
  func.func @transform_0(%arg0: i32) -> (i32, i32, i32, i32) {
    %c0_i32 = arith.constant 0 : i32
    %c0_i32_0 = arith.constant 0 : i32
    %c0_i32_1 = arith.constant 0 : i32
    %c0_i32_2 = arith.constant 0 : i32
    return %arg0, %c0_i32, %c0_i32_0, %c0_i32_1 : i32, i32, i32, i32
  }
  func.func @transform_1(%arg0: i32) -> (i32, i32) {
    %c0_i32 = arith.constant 0 : i32
    %c0_i32_0 = arith.constant 0 : i32
    %c0_i32_1 = arith.constant 0 : i32
    return %c0_i32, %c0_i32_0 : i32, i32
  }
  func.func @transform_2(%arg0: i32) -> (i32, i32) {
    %c0_i32 = arith.constant 0 : i32
    %c0_i32_0 = arith.constant 0 : i32
    %c0_i32_1 = arith.constant 0 : i32
    return %c0_i32, %c0_i32_0 : i32, i32
  }
  func.func @transform_3(%arg0: i32) -> (i32, i32) {
    %c0_i32 = arith.constant 0 : i32
    %c0_i32_0 = arith.constant 0 : i32
    %c0_i32_1 = arith.constant 0 : i32
    return %c0_i32, %c0_i32_0 : i32, i32
  }
  func.func @transform_4(%arg0: i32) -> (i32, i32) {
    %c0_i32 = arith.constant 0 : i32
    %c0_i32_0 = arith.constant 0 : i32
    %c0_i32_1 = arith.constant 0 : i32
    return %c0_i32, %c0_i32_0 : i32, i32
  }
  func.func @transform_5(%arg0: i32) -> (i32, i32, i32) {
    %c0_i32 = arith.constant 0 : i32
    %c0_i32_0 = arith.constant 0 : i32
    %c0_i32_1 = arith.constant 0 : i32
    return %arg0, %c0_i32, %c0_i32_0 : i32, i32, i32
  }
}

</mosaic_0001>

<bundles_post_ra>
// kernel: tpu_custom_call.1
= control target key start
LH: loop header
LB: loop body
LE: loop exit
PB: predicated region body
PF: predicated region fallthrough
CT: control target
= control target key end

     0   :  { %10 = vsyncpa [#allocation3], 0  ;;  %s5213_s0 = inlined_call_operand.hbm [shape: f32[8,8,8,128], index: 0, kind: input, shape index: {}]   ;;  %s5214_s1 = inlined_call_operand.hbm [shape: f32[9,128], index: 1, kind: input, shape index: {}]   ;;  %s5215_s2 = inlined_call_operand.vmem [shape: f32[1,128], index: 2, kind: input, shape index: {}]   ;;  %s5216_s3 = inlined_call_operand.hbm [shape: bf16[128,128], index: 3, kind: input, shape index: {}]   ;;  %s5217_s4 = inlined_call_operand.vmem [shape: f32[1,128], index: 4, kind: input, shape index: {}]   ;;  %s5218_s5 = inlined_call_operand.hbm [shape: f32[8,64,128], index: 5, kind: output, shape index: {}]  }
   0x1   :  { %11 = vsyncpa [#allocation6], 0 }
   0x2   :  { %12 = vsyncpa [#allocation4], 0  ;;  %s2949_s18 = smov [#allocation5]   ;;  %s2950_s20 = smov [#allocation2]  }
   0x3   :  { %s30_s19 = sshll.u32 %s2949_s18, 4  ;;  %s18_s21 = sshll.u32 %s2950_s20, 4  ;;  %s31_s19 = int_to_ptr.vmem [resolvable:$true] %s30_s19  ;;  %s2987_s21 = int_to_ptr.vmem [resolvable:$true] %s18_s21 }
   0x4   :  { %s2855_s24 = scalar_lea.hbm %s5214_s1, 256 }
   0x5   :  { %p2856_p0 = scmp.ne.s32.totalorder %s5214_s1, %s2855_s24  ;;  %p2859_p1 = scmp.lt.u32.totalorder %s2855_s24, %s5214_s1 }
   0x7   :  { %p2861_p2 = pnand %p2859_p1, %p2856_p0 }
   0x9   :  { %2864 = shalt.err (!%p2861_p2)
}
   0xa   :  { %s2865_s29 = scalar_lea.vmem %s31_s19, 256  ;;  %p2870_p4 = scmp.lt.s32.totalorder %s31_s19, %s31_s19 }
   0xb   :  { %p2866_p3 = scmp.ne.s32.totalorder %s31_s19, %s2865_s29  ;;  %p2871_p5 = scmp.lt.s32.totalorder %s2865_s29, %s2865_s29 }
   0xd   :  { %p2872_p6 = por %p2871_p5, %p2870_p4 }
   0xf   :  { %p2873_p7 = pnand %p2872_p6, %p2866_p3 }
  0x11   :  { %2876 = shalt.err (!%p2873_p7)
}
  0x12   :  { %s2951_s30 = smov 128   ;;  %s2952_s6 = smov 8  }
  0x13   :  { %36 = dma.hbm_to_vmem [thread:$0]  %s5214_s1, 256, %s31_s19, [#allocation6], %s2951_s30, %s2951_s30, %s2952_s6  }
  0x14   :  { %s2877_s11 = scalar_lea.hbm %s5213_s0, 8192 }
  0x15   :  { %p2878_p8 = scmp.ne.s32.totalorder %s5213_s0, %s2877_s11  ;;  %p2881_p9 = scmp.lt.u32.totalorder %s2877_s11, %s5213_s0 }
  0x17   :  { %p2883_p10 = pnand %p2881_p9, %p2878_p8 }
  0x19   :  { %2886 = shalt.err (!%p2883_p10)
}
  0x1a   :  { %s2887_s16 = scalar_lea.vmem %s2987_s21, 8192  ;;  %p2892_p12 = scmp.lt.s32.totalorder %s2987_s21, %s2987_s21 }
  0x1b   :  { %p2888_p11 = scmp.ne.s32.totalorder %s2987_s21, %s2887_s16  ;;  %p2893_p13 = scmp.lt.s32.totalorder %s2887_s16, %s2887_s16 }
  0x1d   :  { %p2894_p0 = por %p2893_p13, %p2892_p12 }
  0x1f   :  { %p2895_p1 = pnand %p2894_p0, %p2888_p11 }
  0x21   :  { %2898 = shalt.err (!%p2895_p1)
}
  0x22   :  { %24 = dma.hbm_to_vmem [thread:$0]  %s5213_s0, 8192, %s2987_s21, [#allocation3], %s2951_s30, %s2951_s30, %s2952_s6  }
  0x23   :  { %s2953_s18 = smov [#allocation7]   ;;  %s2899_s23 = scalar_lea.hbm %s5216_s3, 1024 }
  0x24   :  { %s44_s19 = sshll.u32 %s2953_s18, 4  ;;  %p2900_p2 = scmp.ne.s32.totalorder %s5216_s3, %s2899_s23  ;;  %s45_s19 = int_to_ptr.vmem [resolvable:$true] %s44_s19 }
  0x25   :  { %p2903_p3 = scmp.lt.u32.totalorder %s2899_s23, %s5216_s3 }
  0x27   :  { %p2905_p4 = pnand %p2903_p3, %p2900_p2 }
  0x29   :  { %2908 = shalt.err (!%p2905_p4)
}
  0x2a   :  { %s2909_s28 = scalar_lea.vmem %s45_s19, 1024  ;;  %p2914_p6 = scmp.lt.s32.totalorder %s45_s19, %s45_s19 }
  0x2b   :  { %p2910_p5 = scmp.ne.s32.totalorder %s45_s19, %s2909_s28  ;;  %p2915_p7 = scmp.lt.s32.totalorder %s2909_s28, %s2909_s28 }
  0x2d   :  { %p2916_p8 = por %p2915_p7, %p2914_p6 }
  0x2f   :  { %p2917_p9 = pnand %p2916_p8, %p2910_p5 }
  0x31   :  { %2920 = shalt.err (!%p2917_p9)
}
  0x32   :  { %s2954_s0 = smov 64   ;;  %s2955_s21 = smov 4  }
  0x33   :  { %50 = dma.hbm_to_vmem [thread:$0]  %s5216_s3, 1024, %s45_s19, [#allocation6], %s2954_s0, %s2954_s0, %s2955_s21  }
  0x34   :  { %2943 = dma.done.wait [#allocation3], 8192  }
  0x35   :  { %2944 = vsyncadd [#allocation3], 4294959104 }
  0x36   :  { %2945 = dma.done.wait [#allocation6], 1280  }
  0x37   :  { %2946 = vsyncadd [#allocation6], 4294966016  ;;  %v127_v0 = vlaneseq  ;;  %v2713_v1 = vld [vmem:[#allocation7] sm:$0xff]   ;;  %v2714_v2 = vld [vmem:[#allocation7 + $0x8] sm:$0xff]  }
  0x38   :  { %2609 = vmatprep.subr.bf16.mxu0 %v2713_v1  ;;  %2689 = vmatprep.subr.bf16.mxu1 %v2713_v1  ;;  %v2715_v4 = vld [vmem:[#allocation7 + $0x10] sm:$0xff]   ;;  %v2716_v9 = vld [vmem:[#allocation7 + $0x18] sm:$0xff]   ;;  %v3047_v13 = vld [vmem:[#allocation2 + $0x10] sm:$0xff] }
  0x39   :  { %v3036_v3 = vshrl.u32 %v127_v0, 7  ;;  %2610 = vmatpush3.bf16.msra.mxu0 %v2713_v1  ;;  %2697 = vmatpush3.bf16.msra.mxu1 %v2713_v1  ;;  %v63_v11 = vld [vmem:[#allocation2] sm:$0xff]  ;;  %v3045_v12 = vld [vmem:[#allocation2 + $0x8] sm:$0xff]  ;;  %v132_v19 = vrot.slane %v3047_v13, 7  ;;  %v263_v23 = vrot.slane %v3047_v13, 1  ;;  %v2717_v30 = vld [vmem:[#allocation7 + $0x20] sm:$0xff]  }
  0x3a   :  { %2611 = vmatprep.subr.bf16.mxu0 %v2714_v2  ;;  %2690 = vmatprep.subr.bf16.mxu1 %v2714_v2  ;;  %v130_v17 = vrot.slane %v63_v11, 7  ;;  %v131_v18 = vrot.slane %v3045_v12, 7  ;;  %v261_v20 = vrot.slane %v63_v11, 1  ;;  %v3054_v21 = vld [vmem:[#allocation5] sm:$0xff]  ;;  %v262_v22 = vrot.slane %v3045_v12, 1  ;;  %v3089_v40 = vld [vmem:[#allocation2 + $0x108] sm:$0xff] }
  0x3b   :  { %vm129_vm0 = vcmp.ge.s32.totalorder %v3036_v3, 1  ;;  %vm260_vm1 = vcmp.lt.s32.totalorder %v3036_v3, 7  ;;  %v396_v5 = vsub.s32 3, %v3036_v3  ;;  %v464_v6 = vsub.s32 4, %v3036_v3  ;;  %v3078_v35 = vld [vmem:[#allocation2 + $0x100] sm:$0xff]  ;;  %v2718_v49 = vld [vmem:[#allocation7 + $0x28] sm:$0xff]  }
  0x3c   :  { %v596_v7 = vsub.s32 5, %v3036_v3  ;;  %v798_v8 = vsub.s32 0, %v3036_v3  ;;  %v858_v10 = vsub.s32 1, %v3036_v3  ;;  %v974_v14 = vsub.s32 2, %v3036_v3  ;;  %v3110_v53 = vld [vmem:[#allocation2 + $0x110] sm:$0xff] }
  0x3d   :  { %2612 = vmatpush3.bf16.msra.mxu0 %v2714_v2  ;;  %2698 = vmatpush3.bf16.msra.mxu1 %v2714_v2  ;;  %v1154_v15 = vsub.s32 6, %v3036_v3  ;;  %v1214_v16 = vsub.s32 7, %v3036_v3  ;;  %v3059_v24 = vrot.slane %v3054_v21, %v396_v5  ;;  %v3062_v25 = vrot.slane %v3054_v21, %v464_v6  ;;  %v3116_v55 = vld [vmem:[%s5215_s2] ss:$0 sm:$0xff]  ;;  %v3125_v60 = vld [vmem:[#allocation5 + $0x8] ss:$0 sm:$0xff] }
  0x3e   :  { %2613 = vmatprep.subr.bf16.mxu0 %v2715_v4  ;;  %2691 = vmatprep.subr.bf16.mxu1 %v2715_v4  ;;  %v196_v26 = vsel %vm129_vm0, %v130_v17, 0.0  ;;  %v197_v27 = vsel %vm129_vm0, %v131_v18, 0.0  ;;  %v198_v28 = vsel %vm129_vm0, %v132_v19, 0.0  ;;  %v327_v29 = vsel %vm260_vm1, %v261_v20, 0.0  ;;  %v2719_v6 = vld [vmem:[#allocation7 + $0x30] sm:$0xff]  }
  0x3f   :  { %v328_v31 = vsel %vm260_vm1, %v262_v22, 0.0  ;;  %v329_v32 = vsel %vm260_vm1, %v263_v23, 0.0  ;;  %v398_v33 = vmul.f32 %v3059_v24, %v196_v26  ;;  %v399_v34 = vmul.f32 %v3059_v24, %v197_v27 }
  0x40   :  { %v3081_v36 = vmul.f32 %v3059_v24, %v198_v28  ;;  %v466_v37 = vmul.f32 %v3062_v25, %v63_v11  ;;  %v467_v38 = vmul.f32 %v3062_v25, %v3045_v12  ;;  %v3087_v39 = vrot.slane %v3054_v21, %v596_v7 }
  0x41   :  { %2614 = vmatpush3.bf16.msra.mxu0 %v2715_v4  ;;  %2699 = vmatpush3.bf16.msra.mxu1 %v2715_v4  ;;  %v3092_v41 = vrot.slane %v3054_v21, %v798_v8  ;;  %v3095_v42 = vrot.slane %v3054_v21, %v858_v10  ;;  %v3098_v43 = vrot.slane %v3054_v21, %v974_v14  ;;  %v162_v48 = vrot.slane %v3078_v35, 7 }
  0x42   :  { %2615 = vmatprep.subr.bf16.mxu0 %v2716_v9  ;;  %2692 = vmatprep.subr.bf16.mxu1 %v2716_v9  ;;  %v3101_v44 = vrot.slane %v3054_v21, %v1154_v15  ;;  %v530_v45 = vadd.f32 %v466_v37, %v398_v33  ;;  %v531_v46 = vadd.f32 %v467_v38, %v399_v34  ;;  %v163_v54 = vrot.slane %v3089_v40, 7 }
  0x43   :  { %v598_v47 = vmul.f32 %v3087_v39, %v327_v29  ;;  %v599_v50 = vmul.f32 %v3087_v39, %v328_v31  ;;  %v3107_v51 = vmul.f32 %v3087_v39, %v329_v32  ;;  %v800_v52 = vmul.f32 %v3092_v41, %v196_v26 }
  0x44   :  { %v3119_v57 = vmul.f32 %v3092_v41, %v197_v27  ;;  %v3122_v58 = vmul.f32 %v3092_v41, %v198_v28  ;;  %v860_v59 = vmul.f32 %v3095_v42, %v63_v11  ;;  %v976_v62 = vmul.f32 %v3098_v43, %v327_v29 }
  0x45   :  { %2616 = vmatpush3.bf16.msra.mxu0 %v2716_v9  ;;  %2700 = vmatpush3.bf16.msra.mxu1 %v2716_v9  ;;  %v662_v56 = vadd.f32 %v598_v47, %v530_v45  ;;  %v663_v61 = vadd.f32 %v599_v50, %v531_v46  ;;  %v3129_v63 = vmul.f32 %v3098_v43, %v328_v31  ;;  %v164_v5 = vrot.slane %v3110_v53, 7 }
  0x46   :  { %2617 = vmatprep.subr.bf16.mxu0 %v2717_v30  ;;  %2693 = vmatprep.subr.bf16.mxu1 %v2717_v30  ;;  %v3132_v0 = vmul.f32 %v3098_v43, %v329_v32  ;;  %v916_v2 = vadd.f32 %v860_v59, %v800_v52  ;;  %v1156_v4 = vmul.f32 %v3101_v44, %v197_v27  ;;  %v228_v10 = vsel %vm129_vm0, %v162_v48, 0.0  ;;  %v2720_v27 = vld [vmem:[#allocation7 + $0x38] sm:$0xff]   ;;  %v3175_v48 = vld [vmem:[#allocation2 + $0x18] sm:$0xff] }
  0x47   :  { %v732_v1 = vadd.f32 %v3116_v55, %v662_v56  ;;  %v733_v7 = vadd.f32 %v3116_v55, %v663_v61  ;;  %v1157_v8 = vmul.f32 %v3101_v44, %v198_v28  ;;  %v3142_v9 = vrot.slane %v3054_v21, %v1214_v16 }
  0x48   :  { %v1032_v11 = vadd.f32 %v976_v62, %v916_v2  ;;  %v1332_v14 = vmul.f32 %v3125_v60, %v328_v31  ;;  %v1333_v15 = vmul.f32 %v3125_v60, %v329_v32  ;;  %v229_v17 = vsel %vm129_vm0, %v163_v54, 0.0 }
  0x49   :  { %2618 = vmatpush3.bf16.msra.mxu0 %v2717_v30  ;;  %2701 = vmatpush3.bf16.msra.mxu1 %v2717_v30  ;;  %v1216_v18 = vmul.f32 %v3142_v9, %v3045_v12  ;;  %v1217_v19 = vmul.f32 %v3142_v9, %v3047_v13  ;;  %v230_v16 = vsel %vm129_vm0, %v164_v5, 0.0  ;;  %v293_v20 = vrot.slane %v3078_v35, 1 }
  0x4a   :  { %2619 = vmatprep.subr.bf16.mxu0 %v2718_v49  ;;  %2694 = vmatprep.subr.bf16.mxu1 %v2718_v49  ;;  %v1089_v21 = vadd.f32 %v1032_v11, %v733_v7  ;;  %v294_v22 = vrot.slane %v3089_v40, 1  ;;  %v295_v23 = vrot.slane %v3110_v53, 1  ;;  %v430_v26 = vmul.f32 %v3059_v24, %v228_v10 }
  0x4b   :  { %v1272_v28 = vadd.f32 %v1216_v18, %v1156_v4  ;;  %v1273_v29 = vadd.f32 %v1217_v19, %v1157_v8  ;;  %v359_v30 = vsel %vm260_vm1, %v293_v20, 0.0  ;;  %v431_v31 = vmul.f32 %v3059_v24, %v229_v17 }
  0x4c   :  { %v360_v32 = vsel %vm260_vm1, %v294_v22, 0.0  ;;  %v361_v33 = vsel %vm260_vm1, %v295_v23, 0.0  ;;  %v3168_v34 = vmul.f32 %v3059_v24, %v230_v16  ;;  %v498_v37 = vmul.f32 %v3062_v25, %v3078_v35 }
  0x4d   :  { %2620 = vmatpush3.bf16.msra.mxu0 %v2718_v49  ;;  %2702 = vmatpush3.bf16.msra.mxu1 %v2718_v49  ;;  %v1388_v38 = vadd.f32 %v1332_v14, %v1272_v28  ;;  %v1389_v45 = vadd.f32 %v1333_v15, %v1273_v29  ;;  %v499_v46 = vmul.f32 %v3062_v25, %v3089_v40  ;;  %v3177_v49 = vld [vmem:[#allocation2 + $0x20] sm:$0xff]  ;;  %v133_v4 = vrot.slane %v3175_v48, 7 }
  0x4e   :  { %2621 = vmatprep.subr.bf16.mxu0 %v2719_v6  ;;  %2695 = vmatprep.subr.bf16.mxu1 %v2719_v6  ;;  %v630_v47 = vmul.f32 %v3087_v39, %v359_v30  ;;  %v562_v50 = vadd.f32 %v498_v37, %v430_v26  ;;  %v631_v52 = vmul.f32 %v3087_v39, %v360_v32  ;;  %v134_v5 = vrot.slane %v3177_v49, 7 }
  0x4f   :  { %v3181_v54 = vmul.f32 %v3087_v39, %v361_v33  ;;  %v1444_v56 = vadd.f32 %v1388_v38, %v732_v1  ;;  %v1445_v59 = vadd.f32 %v1389_v45, %v1089_v21  ;;  %v563_v61 = vadd.f32 %v499_v46, %v431_v31 }
  0x50   :  { %v694_v62 = vadd.f32 %v630_v47, %v562_v50  ;;  %v828_v2 = vmul.f32 %v3092_v41, %v228_v10  ;;  %v3187_v8 = vmul.f32 %v3092_v41, %v229_v17  ;;  %v3190_v11 = vmul.f32 %v3092_v41, %v230_v16 }
  0x51   :  { %2622 = vmatpush3.bf16.msra.mxu0 %v2719_v6  ;;  %2703 = vmatpush3.bf16.msra.mxu1 %v2719_v6  ;;  %v1508_v7 = vmul.f32 %v1444_v56, %v1444_v56  ;;  %v1509_v6 = vmul.f32 %v1445_v59, %v1445_v59  ;;  %v3192_v1 = vmul.f32 0.5, %v1444_v56  ;;  %v3194_v14 = vmul.f32 0.5, %v1445_v59 }
  0x52   :  { %2623 = vmatprep.subr.bf16.mxu0 %v2720_v27  ;;  %2696 = vmatprep.subr.bf16.mxu1 %v2720_v27  ;;  %v695_v15 = vadd.f32 %v631_v52, %v563_v61  ;;  %v888_v10 = vmul.f32 %v3095_v42, %v3078_v35  ;;  %v764_v20 = vadd.f32 %v3116_v55, %v694_v62  ;;  %v264_v62 = vrot.slane %v3175_v48, 1 }
  0x53   :  { %v1572_v18 = vmul.f32 %v1508_v7, %v1444_v56  ;;  %v1573_v19 = vmul.f32 %v1509_v6, %v1445_v59  ;;  %v1004_v21 = vmul.f32 %v3098_v43, %v359_v30  ;;  %v1184_v26 = vmul.f32 %v3101_v44, %v229_v17 }
  0x54   :  { %v765_v22 = vadd.f32 %v3116_v55, %v695_v15  ;;  %v944_v23 = vadd.f32 %v888_v10, %v828_v2  ;;  %v1185_v31 = vmul.f32 %v3101_v44, %v230_v16  ;;  %v1244_v35 = vmul.f32 %v3142_v9, %v3089_v40 }
  0x55   :  { %2624 = vmatpush3.bf16.msra.mxu0 %v2720_v27  ;;  %2704 = vmatpush3.bf16.msra.mxu1 %v2720_v27  ;;  %v3204_v27 = vsel %vm129_vm0, %v133_v4, 0.0  ;;  %v1636_v28 = vmul.f32 0.044715, %v1572_v18  ;;  %v1637_v29 = vmul.f32 0.044715, %v1573_v19  ;;  %v1245_v30 = vmul.f32 %v3142_v9, %v3110_v53 }
  0x56   :  { %v1060_v37 = vadd.f32 %v1004_v21, %v944_v23  ;;  %v1360_v38 = vmul.f32 %v3125_v60, %v360_v32  ;;  %v1361_v45 = vmul.f32 %v3125_v60, %v361_v33  ;;  %v3214_v47 = vmul.f32 %v3098_v43, %v360_v32 }
  0x57   :  { %v1700_v17 = vadd.f32 %v1636_v28, %v1444_v56  ;;  %v1701_v46 = vadd.f32 %v1637_v29, %v1445_v59  ;;  %v1300_v50 = vadd.f32 %v1244_v35, %v1184_v26  ;;  %v3217_v52 = vmul.f32 %v3098_v43, %v361_v33 }
  0x58   :  { %v1121_v16 = vadd.f32 %v1060_v37, %v765_v22  ;;  %v1301_v61 = vadd.f32 %v1245_v30, %v1185_v31  ;;  %v401_v6 = vmul.f32 %v3059_v24, %v3204_v27  ;;  %v265_v56 = vrot.slane %v3177_v49, 1 }
  0x59   :  { %v1764_v2 = vmul.f32 0.7978846, %v1700_v17  ;;  %v1765_v4 = vmul.f32 0.7978846, %v1701_v46  ;;  %v1416_v7 = vadd.f32 %v1360_v38, %v1300_v50  ;;  %v3225_v32 = vsel %vm260_vm1, %v264_v62, 0.0 }
  0x5a   :  { %v1417_v15 = vadd.f32 %v1361_v45, %v1301_v61  ;;  %v468_v33 = vmul.f32 %v3062_v25, %v3047_v13  ;;  %v469_v10 = vmul.f32 %v3062_v25, %v3175_v48  ;;  %v601_v18 = vmul.f32 %v3087_v39, %v3225_v32 }
  0x5b   :  { %2721 = vtanh.f32 %v1764_v2  ;;  %v1476_v59 = vadd.f32 %v1416_v7, %v764_v20  ;;  %v861_v22 = vmul.f32 %v3095_v42, %v3045_v12  ;;  %v3238_v26 = vsel %vm129_vm0, %v134_v5, 0.0  ;;  %v3267_v2 = vld [vmem:[#allocation2 + $0x120] sm:$0xff] }
  0x5c   :  { %2723 = vtanh.f32 %v1765_v4  ;;  %v1477_v19 = vadd.f32 %v1417_v15, %v1121_v16  ;;  %v532_v21 = vadd.f32 %v468_v33, %v3081_v36  ;;  %v533_v28 = vadd.f32 %v469_v10, %v401_v6 }
  0x5d   :  { %v1540_v23 = vmul.f32 %v1476_v59, %v1476_v59  ;;  %v862_v20 = vmul.f32 %v3095_v42, %v3047_v13  ;;  %v3244_v31 = vsel %vm260_vm1, %v265_v56, 0.0  ;;  %v917_v36 = vadd.f32 %v861_v22, %v3119_v57 }
  0x5e   :  { %v1541_v29 = vmul.f32 %v1477_v19, %v1477_v19  ;;  %v664_v35 = vadd.f32 %v3107_v51, %v532_v21  ;;  %v665_v12 = vadd.f32 %v601_v18, %v533_v28  ;;  %v1158_v5 = vmul.f32 %v3101_v44, %v3204_v27 }
  0x5f   :  { %v1604_v37 = vmul.f32 %v1540_v23, %v1476_v59  ;;  %v918_v30 = vadd.f32 %v862_v20, %v3122_v58  ;;  %v1033_v13 = vadd.f32 %v3129_v63, %v917_v36  ;;  %v1159_v17 = vmul.f32 %v3101_v44, %v3238_v26  ;;  %v3259_v58 = vld [vmem:[#allocation2 + $0x118] sm:$0xff] }
  0x60   :  { %v1605_v38 = vmul.f32 %v1541_v29, %v1477_v19  ;;  %v734_v45 = vadd.f32 %v3116_v55, %v664_v35  ;;  %v735_v51 = vadd.f32 %v3116_v55, %v665_v12  ;;  %v1218_v50 = vmul.f32 %v3142_v9, %v3175_v48 }
  0x61   :  { %v1668_v46 = vmul.f32 0.044715, %v1604_v37  ;;  %v1034_v57 = vadd.f32 %v3132_v0, %v918_v30  ;;  %v3261_v61 = vmul.f32 0.5, %v1476_v59  ;;  %v1219_v62 = vmul.f32 %v3142_v9, %v3177_v49 }
  0x62   :  { %v1669_v16 = vmul.f32 0.044715, %v1605_v38  ;;  %v1334_v63 = vmul.f32 %v3125_v60, %v3225_v32  ;;  %v1090_v7 = vadd.f32 %v1033_v13, %v734_v45  ;;  %v1274_v6 = vadd.f32 %v1218_v50, %v1158_v5 }
  0x63   :  { %v1732_v4 = vadd.f32 %v1668_v46, %v1476_v59  ;;  %v1335_v0 = vmul.f32 %v3125_v60, %v3244_v31  ;;  %v1091_v56 = vadd.f32 %v1034_v57, %v735_v51  ;;  %v1275_v33 = vadd.f32 %v1219_v62, %v1159_v17 }
  0x64   :  { %v1733_v15 = vadd.f32 %v1669_v16, %v1477_v19  ;;  %v165_v10 = vrot.slane %v3259_v58, 7  ;;  %v1390_v22 = vadd.f32 %v1334_v63, %v1274_v6  ;;  %v166_v23 = vrot.slane %v3267_v2, 7 }
  0x65   :  { %v2722_v18 = vpop.eup %2721  ;;  %v1796_v21 = vmul.f32 0.7978846, %v1732_v4  ;;  %v296_v28 = vrot.slane %v3259_v58, 1  ;;  %v1391_v35 = vadd.f32 %v1335_v0, %v1275_v33  ;;  %v297_v36 = vrot.slane %v3267_v2, 1 }
  0x66   :  { %v2724_v20 = vpop.eup %2723  ;;  %v1956_v29 = vadd.f32 1.0, %v2722_v18  ;;  %v1797_v59 = vmul.f32 0.7978846, %v1733_v15  ;;  %v1446_v12 = vadd.f32 %v1390_v22, %v1090_v7  ;;  %v3277_v30 = vsel %vm129_vm0, %v165_v10, 0.0 }
  0x67   :  { %v1957_v37 = vadd.f32 1.0, %v2724_v20  ;;  %2725 = vtanh.f32 %v1796_v21  ;;  %v1447_v38 = vadd.f32 %v1391_v35, %v1091_v56  ;;  %v3282_v45 = vsel %vm260_vm1, %v296_v28, 0.0 }
  0x68   :  { %v2020_v5 = vmul.f32 %v1956_v29, %v3192_v1  ;;  %2727 = vtanh.f32 %v1797_v59  ;;  %v1861_v17 = vmul.f32 0.5, %v1477_v19  ;;  %v1510_v46 = vmul.f32 %v1446_v12, %v1446_v12 }
  0x69   :  { %v2021_v13 = vmul.f32 %v1957_v37, %v3194_v14  ;;  %v3287_v51 = vsel %vm129_vm0, %v166_v23, 0.0  ;;  %v1511_v57 = vmul.f32 %v1447_v38, %v1447_v38  ;;  %v3291_v50 = vsel %vm260_vm1, %v297_v36, 0.0 }
  0x6a   :  { %v433_v1 = vmul.f32 %v3059_v24, %v3277_v30  ;;  %v500_v16 = vmul.f32 %v3062_v25, %v3110_v53  ;;  %v1574_v63 = vmul.f32 %v1510_v46, %v1446_v12  ;;  %v501_v14 = vmul.f32 %v3062_v25, %v3259_v58 }
  0x6b   :  { %v2084_v62 = vpack.c.bf16 %v2021_v13, %v2020_v5  ;;  %v633_v19 = vmul.f32 %v3087_v39, %v3282_v45  ;;  %v1575_v4 = vmul.f32 %v1511_v57, %v1447_v38  ;;  %v889_v6 = vmul.f32 %v3095_v42, %v3089_v40  ;;  %v3321_v5 = vld [vmem:[#allocation2 + $0x28] sm:$0xff] }
  0x6c   :  { %v564_v7 = vadd.f32 %v500_v16, %v3168_v34  ;;  %v890_v0 = vmul.f32 %v3095_v42, %v3110_v53  ;;  %v1638_v15 = vmul.f32 0.044715, %v1574_v63  ;;  %v565_v56 = vadd.f32 %v501_v14, %v433_v1 }
  0x6d   :  { %2625 = vmatprep.mubr.bf16.mxu0 %v2084_v62  ;;  %v1186_v33 = vmul.f32 %v3101_v44, %v3277_v30  ;;  %v1187_v10 = vmul.f32 %v3101_v44, %v3287_v51  ;;  %v1639_v18 = vmul.f32 0.044715, %v1575_v4  ;;  %v945_v34 = vadd.f32 %v889_v6, %v3187_v8  ;;  %v3325_v62 = vld [vmem:[#allocation2 + $0x30] sm:$0xff] }
  0x6e   :  { %v696_v21 = vadd.f32 %v3181_v54, %v564_v7  ;;  %v946_v22 = vadd.f32 %v890_v0, %v3190_v11  ;;  %v1702_v40 = vadd.f32 %v1638_v15, %v1446_v12  ;;  %v697_v23 = vadd.f32 %v633_v19, %v565_v56 }
  0x6f   :  { %v1246_v53 = vmul.f32 %v3142_v9, %v3259_v58  ;;  %v1247_v28 = vmul.f32 %v3142_v9, %v3267_v2  ;;  %v1703_v20 = vadd.f32 %v1639_v18, %v1447_v38  ;;  %v1061_v59 = vadd.f32 %v3214_v47, %v945_v34 }
  0x70   :  { %v766_v29 = vadd.f32 %v3116_v55, %v696_v21  ;;  %v1062_v35 = vadd.f32 %v3217_v52, %v946_v22  ;;  %v1766_v36 = vmul.f32 0.7978846, %v1702_v40  ;;  %v767_v8 = vadd.f32 %v3116_v55, %v697_v23 }
  0x71   :  { %v2726_v54 = vpop.eup %2725  ;;  %v1302_v11 = vadd.f32 %v1246_v53, %v1186_v33  ;;  %v1303_v37 = vadd.f32 %v1247_v28, %v1187_v10  ;;  %v1767_v57 = vmul.f32 0.7978846, %v1703_v20  ;;  %v1362_v16 = vmul.f32 %v3125_v60, %v3282_v45 }
  0x72   :  { %v2728_v13 = vpop.eup %2727  ;;  %v1988_v46 = vadd.f32 1.0, %v2726_v54  ;;  %v1122_v1 = vadd.f32 %v1061_v59, %v766_v29  ;;  %2729 = vtanh.f32 %v1766_v36  ;;  %v1123_v52 = vadd.f32 %v1062_v35, %v767_v8 }
  0x73   :  { %v1989_v47 = vadd.f32 1.0, %v2728_v13  ;;  %v1363_v63 = vmul.f32 %v3125_v60, %v3291_v50  ;;  %2731 = vtanh.f32 %v1767_v57  ;;  %v1418_v19 = vadd.f32 %v1362_v16, %v1302_v11 }
  0x74   :  { %v2052_v14 = vmul.f32 %v1988_v46, %v3261_v61  ;;  %v135_v4 = vrot.slane %v3321_v5, 7  ;;  %v136_v0 = vrot.slane %v3325_v62, 7  ;;  %v266_v15 = vrot.slane %v3321_v5, 1 }
  0x75   :  { %v2053_v7 = vmul.f32 %v1989_v47, %v1861_v17  ;;  %v1419_v6 = vadd.f32 %v1363_v63, %v1303_v37  ;;  %v1830_v56 = vmul.f32 0.5, %v1446_v12  ;;  %v1831_v33 = vmul.f32 0.5, %v1447_v38 }
  0x76   :  { %v1478_v10 = vadd.f32 %v1418_v19, %v1122_v1  ;;  %v3335_v18 = vsel %vm129_vm0, %v135_v4, 0.0  ;;  %v3339_v61 = vsel %vm260_vm1, %v266_v15, 0.0  ;;  %v402_v17 = vmul.f32 %v3059_v24, %v3238_v26 }
  0x77   :  { %v2100_v21 = vpack.c.bf16 %v2053_v7, %v2052_v14  ;;  %v1479_v34 = vadd.f32 %v1419_v6, %v1123_v52  ;;  %v3345_v40 = vsel %vm129_vm0, %v136_v0, 0.0  ;;  %v267_v12 = vrot.slane %v3325_v62, 1 }
  0x78   :  { %v1542_v22 = vmul.f32 %v1478_v10, %v1478_v10  ;;  %v403_v38 = vmul.f32 %v3059_v24, %v3335_v18  ;;  %v3350_v53 = vmul.f32 0.5, %v1478_v10  ;;  %v470_v28 = vmul.f32 %v3062_v25, %v3177_v49 }
  0x79   :  { %2657 = vmatprep.mubr.bf16.mxu1 %v2100_v21  ;;  %v1543_v23 = vmul.f32 %v1479_v34, %v1479_v34  ;;  %v471_v20 = vmul.f32 %v3062_v25, %v3321_v5  ;;  %v602_v59 = vmul.f32 %v3087_v39, %v3244_v31  ;;  %v603_v35 = vmul.f32 %v3087_v39, %v3339_v61 }
  0x7a   :  { %v1606_v29 = vmul.f32 %v1542_v22, %v1478_v10  ;;  %v803_v54 = vmul.f32 %v3092_v41, %v3204_v27  ;;  %v534_v8 = vadd.f32 %v470_v28, %v402_v17  ;;  %v804_v37 = vmul.f32 %v3092_v41, %v3238_v26 }
  0x7b   :  { %v1607_v36 = vmul.f32 %v1543_v23, %v1479_v34  ;;  %v535_v11 = vadd.f32 %v471_v20, %v403_v38  ;;  %v863_v46 = vmul.f32 %v3095_v42, %v3175_v48  ;;  %v864_v57 = vmul.f32 %v3095_v42, %v3177_v49  ;;  %v3378_v23 = vld [vmem:[#allocation2 + $0x128] sm:$0xff] }
  0x7c   :  { %v1670_v13 = vmul.f32 0.044715, %v1606_v29  ;;  %v979_v1 = vmul.f32 %v3098_v43, %v3225_v32  ;;  %v2730_v16 = vpop.eup %2729  ;;  %v666_v52 = vadd.f32 %v602_v59, %v534_v8  ;;  %v980_v63 = vmul.f32 %v3098_v43, %v3244_v31 }
  0x7d   :  { %v1671_v47 = vmul.f32 0.044715, %v1607_v36  ;;  %v667_v27 = vadd.f32 %v603_v35, %v535_v11  ;;  %v2732_v14 = vpop.eup %2731  ;;  %v1958_v19 = vadd.f32 1.0, %v2730_v16  ;;  %v919_v4 = vadd.f32 %v863_v46, %v803_v54  ;;  %v3390_v35 = vld [vmem:[#allocation2 + $0x130] sm:$0xff] }
  0x7e   :  { %v1734_v26 = vadd.f32 %v1670_v13, %v1478_v10  ;;  %v920_v7 = vadd.f32 %v864_v57, %v804_v37  ;;  %v1959_v6 = vadd.f32 1.0, %v2732_v14  ;;  %v736_v0 = vadd.f32 %v3116_v55, %v666_v52 }
  0x7f   :  { %v1735_v48 = vadd.f32 %v1671_v47, %v1479_v34  ;;  %v737_v49 = vadd.f32 %v3116_v55, %v667_v27  ;;  %v2022_v15 = vmul.f32 %v1958_v19, %v1830_v56  ;;  %v1035_v21 = vadd.f32 %v979_v1, %v919_v4 }
  0x80   :  { %v1798_v32 = vmul.f32 0.7978846, %v1734_v26  ;;  %v1036_v17 = vadd.f32 %v980_v63, %v920_v7  ;;  %v2023_v22 = vmul.f32 %v1959_v6, %v1831_v33  ;;  %v1160_v31 = vmul.f32 %v3101_v44, %v3335_v18 }
  0x81   :  { %v1799_v38 = vmul.f32 0.7978846, %v1735_v48  ;;  %v1161_v10 = vmul.f32 %v3101_v44, %v3345_v40  ;;  %v1863_v28 = vmul.f32 0.5, %v1479_v34  ;;  %v3382_v20 = vsel %vm260_vm1, %v267_v12, 0.0 }
  0x82   :  { %2733 = vtanh.f32 %v1798_v32  ;;  %v1220_v56 = vmul.f32 %v3142_v9, %v3321_v5  ;;  %v2085_v29 = vpack.c.bf16 %v2023_v22, %v2022_v15  ;;  %v1221_v33 = vmul.f32 %v3142_v9, %v3325_v62 }
  0x83   :  { %2735 = vtanh.f32 %v1799_v38  ;;  %v1336_v59 = vmul.f32 %v3125_v60, %v3339_v61  ;;  %v1092_v54 = vadd.f32 %v1035_v21, %v736_v0  ;;  %v1337_v36 = vmul.f32 %v3125_v60, %v3382_v20 }
  0x84   :  { %v1276_v34 = vadd.f32 %v1220_v56, %v1160_v31  ;;  %v167_v12 = vrot.slane %v3378_v23, 7  ;;  %2626 = vmatmul.mubr.bf16.vlgmr.msra.gmra.mrb[0].mxu0 %v2085_v29  ;;  %v1093_v8 = vadd.f32 %v1036_v17, %v737_v49  ;;  %v1277_v11 = vadd.f32 %v1221_v33, %v1161_v10 }
  0x85   :  { %v298_v37 = vrot.slane %v3378_v23, 1  ;;  %v434_v13 = vmul.f32 %v3059_v24, %v3287_v51  ;;  %v168_v57 = vrot.slane %v3390_v35, 7  ;;  %v502_v16 = vmul.f32 %v3062_v25, %v3267_v2 }
  0x86   :  { %v1392_v46 = vadd.f32 %v1336_v59, %v1276_v34  ;;  %v3401_v1 = vsel %vm129_vm0, %v167_v12, 0.0  ;;  %v1393_v47 = vadd.f32 %v1337_v36, %v1277_v11  ;;  %v299_v52 = vrot.slane %v3390_v35, 1 }
  0x87   :  { %v3408_v27 = vsel %vm260_vm1, %v298_v37, 0.0  ;;  %v435_v63 = vmul.f32 %v3059_v24, %v3401_v1  ;;  %v503_v19 = vmul.f32 %v3062_v25, %v3378_v23  ;;  %v566_v26 = vadd.f32 %v502_v16, %v434_v13 }
  0x88   :  { %v3412_v14 = vadd.f32 %v1392_v46, %v1092_v54  ;;  %v634_v4 = vmul.f32 %v3087_v39, %v3291_v50  ;;  %v3418_v7 = vadd.f32 %v1393_v47, %v1093_v8  ;;  %v635_v6 = vmul.f32 %v3087_v39, %v3408_v27 }
  0x89   :  { %v831_v48 = vmul.f32 %v3092_v41, %v3277_v30  ;;  %v832_v0 = vmul.f32 %v3092_v41, %v3287_v51  ;;  %v3430_v15 = vsel %vm129_vm0, %v168_v57, 0.0  ;;  %v567_v32 = vadd.f32 %v503_v19, %v435_v63  ;;  %v70_v19 = vld [vmem:[#allocation2 + $0x38] sm:$0xff] }
  0x8a   :  { %v1512_v49 = vmul.f32 %v3412_v14, %v3412_v14  ;;  %v698_v21 = vadd.f32 %v634_v4, %v566_v26  ;;  %v1513_v17 = vmul.f32 %v3418_v7, %v3418_v7  ;;  %v3436_v22 = vsel %vm260_vm1, %v299_v52, 0.0 }
  0x8b   :  { %v891_v30 = vmul.f32 %v3095_v42, %v3259_v58  ;;  %v892_v51 = vmul.f32 %v3095_v42, %v3267_v2  ;;  %v699_v10 = vadd.f32 %v635_v6, %v567_v32  ;;  %v1007_v29 = vmul.f32 %v3098_v43, %v3282_v45 }
  0x8c   :  { %v2734_v38 = vpop.eup %2733  ;;  %v1576_v31 = vmul.f32 %v1512_v49, %v3412_v14  ;;  %v768_v56 = vadd.f32 %v3116_v55, %v698_v21  ;;  %v1577_v54 = vmul.f32 %v1513_v17, %v3418_v7  ;;  %v1008_v2 = vmul.f32 %v3098_v43, %v3291_v50 }
  0x8d   :  { %v2736_v33 = vpop.eup %2735  ;;  %v1990_v59 = vadd.f32 1.0, %v2734_v38  ;;  %v947_v34 = vadd.f32 %v891_v30, %v831_v48  ;;  %v948_v36 = vadd.f32 %v892_v51, %v832_v0  ;;  %v769_v8 = vadd.f32 %v3116_v55, %v699_v10 }
  0x8e   :  { %v1991_v12 = vadd.f32 1.0, %v2736_v33  ;;  %v1640_v58 = vmul.f32 0.044715, %v1576_v31  ;;  %v1641_v37 = vmul.f32 0.044715, %v1577_v54  ;;  %v1188_v45 = vmul.f32 %v3101_v44, %v3401_v1 }
  0x8f   :  { %v2054_v11 = vmul.f32 %v1990_v59, %v3350_v53  ;;  %v1063_v13 = vadd.f32 %v1007_v29, %v947_v34  ;;  %v1064_v16 = vadd.f32 %v1008_v2, %v948_v36  ;;  %v1189_v47 = vmul.f32 %v3101_v44, %v3430_v15 }
  0x90   :  { %v2055_v46 = vmul.f32 %v1991_v12, %v1863_v28  ;;  %v1704_v57 = vadd.f32 %v1640_v58, %v3412_v14  ;;  %v1705_v52 = vadd.f32 %v1641_v37, %v3418_v7  ;;  %v1248_v50 = vmul.f32 %v3142_v9, %v3378_v23 }
  0x91   :  { %v1124_v63 = vadd.f32 %v1063_v13, %v768_v56  ;;  %v1249_v53 = vmul.f32 %v3142_v9, %v3390_v35  ;;  %v1125_v6 = vadd.f32 %v1064_v16, %v769_v8  ;;  %v1364_v28 = vmul.f32 %v3125_v60, %v3408_v27 }
  0x92   :  { %v2101_v26 = vpack.c.bf16 %v2055_v46, %v2054_v11  ;;  %v1768_v4 = vmul.f32 0.7978846, %v1704_v57  ;;  %v1769_v48 = vmul.f32 0.7978846, %v1705_v52  ;;  %v1304_v0 = vadd.f32 %v1248_v50, %v1188_v45 }
  0x93   :  { %v1305_v49 = vadd.f32 %v1249_v53, %v1189_v47  ;;  %v1365_v32 = vmul.f32 %v3125_v60, %v3436_v22  ;;  %v137_v21 = vrot.slane %v70_v19, 7  ;;  %v268_v17 = vrot.slane %v70_v19, 1 }
  0x94   :  { %2658 = vmatmul.mubr.bf16.vlgmr.msra.gmra.mrb[0].mxu1 %v2101_v26  ;;  %2737 = vtanh.f32 %v1768_v4  ;;  %v404_v30 = vmul.f32 %v3059_v24, %v3345_v40  ;;  %v1420_v51 = vadd.f32 %v1364_v28, %v1304_v0  ;;  %v472_v31 = vmul.f32 %v3062_v25, %v3325_v62 }
  0x95   :  { %2739 = vtanh.f32 %v1769_v48  ;;  %v1421_v38 = vadd.f32 %v1365_v32, %v1305_v49  ;;  %v203_v10 = vsel %vm129_vm0, %v137_v21, 0.0  ;;  %v334_v56 = vsel %vm260_vm1, %v268_v17, 0.0 }
  0x96   :  { %v473_v29 = vmul.f32 %v3062_v25, %v70_v19  ;;  %v604_v33 = vmul.f32 %v3087_v39, %v3382_v20  ;;  %v1480_v59 = vadd.f32 %v1420_v51, %v1124_v63  ;;  %v405_v34 = vmul.f32 %v3059_v24, %v203_v10  ;;  %v3492_v63 = vld [vmem:[#allocation2 + $0x138] sm:$0xff] }
  0x97   :  { %v1481_v54 = vadd.f32 %v1421_v38, %v1125_v6  ;;  %v536_v36 = vadd.f32 %v472_v31, %v404_v30  ;;  %v605_v12 = vmul.f32 %v3087_v39, %v334_v56  ;;  %v805_v58 = vmul.f32 %v3092_v41, %v3335_v18 }
  0x98   :  { %v806_v8 = vmul.f32 %v3092_v41, %v3345_v40  ;;  %v865_v2 = vmul.f32 %v3095_v42, %v3321_v5  ;;  %v1832_v11 = vmul.f32 0.5, %v3412_v14  ;;  %v1833_v37 = vmul.f32 0.5, %v3418_v7 }
  0x99   :  { %v1544_v13 = vmul.f32 %v1480_v59, %v1480_v59  ;;  %v1545_v45 = vmul.f32 %v1481_v54, %v1481_v54  ;;  %v537_v46 = vadd.f32 %v473_v29, %v405_v34  ;;  %v668_v57 = vadd.f32 %v604_v33, %v536_v36 }
  0x9a   :  { %v866_v16 = vmul.f32 %v3095_v42, %v3325_v62  ;;  %v921_v47 = vadd.f32 %v865_v2, %v805_v58  ;;  %v981_v40 = vmul.f32 %v3098_v43, %v3339_v61  ;;  %v982_v5 = vmul.f32 %v3098_v43, %v3382_v20 }
  0x9b   :  { %v1608_v52 = vmul.f32 %v1544_v13, %v1480_v59  ;;  %v1609_v18 = vmul.f32 %v1545_v45, %v1481_v54  ;;  %v669_v14 = vadd.f32 %v605_v12, %v537_v46  ;;  %v738_v7 = vadd.f32 %v3116_v55, %v668_v57 }
  0x9c   :  { %v922_v50 = vadd.f32 %v866_v16, %v806_v8  ;;  %v1162_v53 = vmul.f32 %v3101_v44, %v203_v10  ;;  %v1037_v62 = vadd.f32 %v981_v40, %v921_v47  ;;  %v1222_v6 = vmul.f32 %v3142_v9, %v70_v19 }
  0x9d   :  { %v1672_v26 = vmul.f32 0.044715, %v1608_v52  ;;  %v1673_v4 = vmul.f32 0.044715, %v1609_v18  ;;  %v739_v48 = vadd.f32 %v3116_v55, %v669_v14  ;;  %v1338_v0 = vmul.f32 %v3125_v60, %v334_v56 }
  0x9e   :  { %v2738_v28 = vpop.eup %2737  ;;  %v1038_v61 = vadd.f32 %v982_v5, %v922_v50  ;;  %v169_v20 = vrot.slane %v3492_v63, 7  ;;  %v1094_v30 = vadd.f32 %v1037_v62, %v738_v7  ;;  %v1278_v31 = vadd.f32 %v1222_v6, %v1162_v53 }
  0x9f   :  { %v2740_v49 = vpop.eup %2739  ;;  %v1960_v32 = vadd.f32 1.0, %v2738_v28  ;;  %v1736_v21 = vadd.f32 %v1672_v26, %v1480_v59  ;;  %v1737_v17 = vadd.f32 %v1673_v4, %v1481_v54  ;;  %v300_v34 = vrot.slane %v3492_v63, 1 }
  0xa0   :  { %v1961_v51 = vadd.f32 1.0, %v2740_v49  ;;  %v3500_v38 = vadd.f32 %v1038_v61, %v739_v48  ;;  %v235_v19 = vsel %vm129_vm0, %v169_v20, 0.0  ;;  %v1864_v36 = vmul.f32 0.5, %v1480_v59  ;;  %v3534_v20 = vld [vmem:[#allocation2 + $0x48] sm:$0xff] }
  0xa1   :  { %v2024_v10 = vmul.f32 %v1960_v32, %v1832_v11  ;;  %v1800_v29 = vmul.f32 0.7978846, %v1736_v21  ;;  %v1801_v33 = vmul.f32 0.7978846, %v1737_v17  ;;  %v1394_v12 = vadd.f32 %v1338_v0, %v1278_v31  ;;  %v71_v0 = vld [vmem:[#allocation2 + $0x40] sm:$0xff]  ;;  %v3540_v21 = vld [vmem:[#allocation2 + $0x50] sm:$0xff] }
  0xa2   :  { %v2025_v56 = vmul.f32 %v1961_v51, %v1833_v37  ;;  %v1515_v58 = vmul.f32 %v3500_v38, %v3500_v38  ;;  %v366_v8 = vsel %vm260_vm1, %v300_v34, 0.0  ;;  %v436_v2 = vmul.f32 %v3059_v24, %v3430_v15 }
  0xa3   :  { %2741 = vtanh.f32 %v1800_v29  ;;  %v437_v13 = vmul.f32 %v3059_v24, %v235_v19  ;;  %v1450_v45 = vadd.f32 %v1394_v12, %v1094_v30  ;;  %v504_v59 = vmul.f32 %v3062_v25, %v3390_v35 }
  0xa4   :  { %v2086_v11 = vpack.c.bf16 %v2025_v56, %v2024_v10  ;;  %2743 = vtanh.f32 %v1801_v33  ;;  %v1579_v46 = vmul.f32 %v1515_v58, %v3500_v38  ;;  %v505_v37 = vmul.f32 %v3062_v25, %v3492_v63 }
  0xa5   :  { %v636_v57 = vmul.f32 %v3087_v39, %v3436_v22  ;;  %v637_v16 = vmul.f32 %v3087_v39, %v366_v8  ;;  %v1865_v47 = vmul.f32 0.5, %v1481_v54  ;;  %v1514_v52 = vmul.f32 %v1450_v45, %v1450_v45 }
  0xa6   :  { %2629 = vmatprep.mubr.bf16.mxu0 %v2086_v11  ;;  %v1643_v18 = vmul.f32 0.044715, %v1579_v46  ;;  %v833_v40 = vmul.f32 %v3092_v41, %v3401_v1  ;;  %v568_v5 = vadd.f32 %v504_v59, %v436_v2  ;;  %v569_v14 = vadd.f32 %v505_v37, %v437_v13 }
  0xa7   :  { %v834_v7 = vmul.f32 %v3092_v41, %v3430_v15  ;;  %v893_v50 = vmul.f32 %v3095_v42, %v3378_v23  ;;  %v1578_v53 = vmul.f32 %v1514_v52, %v1450_v45  ;;  %v894_v4 = vmul.f32 %v3095_v42, %v3390_v35 }
  0xa8   :  { %v1707_v26 = vadd.f32 %v1643_v18, %v3500_v38  ;;  %v1009_v54 = vmul.f32 %v3098_v43, %v3408_v27  ;;  %v700_v62 = vadd.f32 %v636_v57, %v568_v5  ;;  %v701_v6 = vadd.f32 %v637_v16, %v569_v14 }
  0xa9   :  { %v949_v1 = vadd.f32 %v893_v50, %v833_v40  ;;  %v1010_v28 = vmul.f32 %v3098_v43, %v3436_v22  ;;  %v1642_v48 = vmul.f32 0.044715, %v1578_v53  ;;  %v950_v61 = vadd.f32 %v894_v4, %v834_v7 }
  0xaa   :  { %v1771_v15 = vmul.f32 0.7978846, %v1707_v26  ;;  %v1190_v23 = vmul.f32 %v3101_v44, %v235_v19  ;;  %v770_v49 = vadd.f32 %v3116_v55, %v700_v62  ;;  %v771_v35 = vadd.f32 %v3116_v55, %v701_v6 }
  0xab   :  { %v1065_v32 = vadd.f32 %v1009_v54, %v949_v1  ;;  %v1250_v27 = vmul.f32 %v3142_v9, %v3492_v63  ;;  %v1706_v17 = vadd.f32 %v1642_v48, %v1450_v45  ;;  %v1066_v22 = vadd.f32 %v1010_v28, %v950_v61 }
  0xac   :  { %2745 = vtanh.f32 %v1771_v15  ;;  %v1366_v30 = vmul.f32 %v3125_v60, %v366_v8  ;;  %v138_v10 = vrot.slane %v71_v0, 7  ;;  %v139_v29 = vrot.slane %v3534_v20, 7 }
  0xad   :  { %v2742_v51 = vpop.eup %2741  ;;  %v1126_v31 = vadd.f32 %v1065_v32, %v770_v49  ;;  %v1306_v19 = vadd.f32 %v1250_v27, %v1190_v23  ;;  %v1770_v55 = vmul.f32 0.7978846, %v1706_v17  ;;  %v3544_v56 = vadd.f32 %v1066_v22, %v771_v35 }
  0xae   :  { %v2744_v33 = vpop.eup %2743  ;;  %v1992_v34 = vadd.f32 1.0, %v2742_v51  ;;  %v140_v63 = vrot.slane %v3540_v21, 7  ;;  %v3547_v58 = vmul.f32 0.5, %v1450_v45  ;;  %v1835_v2 = vmul.f32 0.5, %v3500_v38 }
  0xaf   :  { %v1993_v12 = vadd.f32 1.0, %v2744_v33  ;;  %v1422_v13 = vadd.f32 %v1366_v30, %v1306_v19  ;;  %2747 = vtanh.f32 %v1770_v55  ;;  %v1547_v8 = vmul.f32 %v3544_v56, %v3544_v56  ;;  %v103_v33 = vld [vmem:[#allocation2 + $0x140] sm:$0xff] }
  0xb0   :  { %v2056_v60 = vmul.f32 %v1992_v34, %v1864_v36  ;;  %v204_v11 = vsel %vm129_vm0, %v138_v10, 0.0  ;;  %v3558_v37 = vsel %vm129_vm0, %v139_v29, 0.0  ;;  %v269_v45 = vrot.slane %v71_v0, 1 }
  0xb1   :  { %v2057_v46 = vmul.f32 %v1993_v12, %v1865_v47  ;;  %v3554_v59 = vadd.f32 %v1422_v13, %v1126_v31  ;;  %v1611_v57 = vmul.f32 %v1547_v8, %v3544_v56  ;;  %v3563_v38 = vsel %vm129_vm0, %v140_v63, 0.0  ;;  %v3603_v63 = vld [vmem:[%s5215_s2] ss:$0 sm:$0xff]  ;;  %v3607_v13 = vld [vmem:[#allocation2 + $0x148] sm:$0xff] }
  0xb2   :  { %v270_v36 = vrot.slane %v3534_v20, 1  ;;  %v271_v16 = vrot.slane %v3540_v21, 1  ;;  %v335_v18 = vsel %vm260_vm1, %v269_v45, 0.0  ;;  %v406_v40 = vmul.f32 %v3059_v24, %v204_v11 }
  0xb3   :  { %v2102_v52 = vpack.c.bf16 %v2057_v46, %v2056_v60  ;;  %v1546_v47 = vmul.f32 %v3554_v59, %v3554_v59  ;;  %v1675_v5 = vmul.f32 0.044715, %v1611_v57  ;;  %v407_v50 = vmul.f32 %v3059_v24, %v3558_v37  ;;  %v3609_v60 = vld [vmem:[#allocation2 + $0x150] sm:$0xff]  ;;  %v3613_v46 = vld [vmem:[#allocation5 + $0x8] ss:$0 sm:$0xff] }
  0xb4   :  { %v3574_v14 = vsel %vm260_vm1, %v270_v36, 0.0  ;;  %v3578_v7 = vsel %vm260_vm1, %v271_v16, 0.0  ;;  %v474_v26 = vmul.f32 %v3062_v25, %v71_v0  ;;  %v475_v4 = vmul.f32 %v3062_v25, %v3534_v20 }
  0xb5   :  { %2661 = vmatprep.mubr.bf16.mxu1 %v2102_v52  ;;  %v1610_v53 = vmul.f32 %v1546_v47, %v3554_v59  ;;  %v606_v54 = vmul.f32 %v3087_v39, %v335_v18  ;;  %v1739_v6 = vadd.f32 %v1675_v5, %v3544_v56  ;;  %v607_v1 = vmul.f32 %v3087_v39, %v3574_v14 }
  0xb6   :  { %v2746_v62 = vpop.eup %2745  ;;  %v807_v28 = vmul.f32 %v3092_v41, %v204_v11  ;;  %v867_v48 = vmul.f32 %v3095_v42, %v71_v0  ;;  %v538_v23 = vadd.f32 %v474_v26, %v406_v40  ;;  %v539_v49 = vadd.f32 %v475_v4, %v407_v50 }
  0xb7   :  { %v1963_v15 = vadd.f32 1.0, %v2746_v62  ;;  %v1674_v61 = vmul.f32 0.044715, %v1610_v53  ;;  %v1803_v35 = vmul.f32 0.7978846, %v1739_v6  ;;  %v983_v27 = vmul.f32 %v3098_v43, %v335_v18 }
  0xb8   :  { %v923_v32 = vadd.f32 %v867_v48, %v807_v28  ;;  %v1163_v17 = vmul.f32 %v3101_v44, %v3558_v37  ;;  %v670_v51 = vadd.f32 %v606_v54, %v538_v23  ;;  %v671_v31 = vadd.f32 %v607_v1, %v539_v49 }
  0xb9   :  { %v2027_v22 = vmul.f32 %v1963_v15, %v1835_v2  ;;  %v1738_v30 = vadd.f32 %v1674_v61, %v3554_v59  ;;  %v2748_v19 = vpop.eup %2747  ;;  %2749 = vtanh.f32 %v1803_v35  ;;  %v1164_v0 = vmul.f32 %v3101_v44, %v3563_v38 }
  0xba   :  { %v1039_v10 = vadd.f32 %v983_v27, %v923_v32  ;;  %v1223_v29 = vmul.f32 %v3142_v9, %v3534_v20  ;;  %v1962_v34 = vadd.f32 1.0, %v2748_v19  ;;  %v740_v12 = vadd.f32 %v3603_v63, %v670_v51 }
  0xbb   :  { %v1802_v55 = vmul.f32 0.7978846, %v1738_v30  ;;  %v741_v2 = vadd.f32 %v3603_v63, %v671_v31  ;;  %v1224_v8 = vmul.f32 %v3142_v9, %v3540_v21  ;;  %v1339_v45 = vmul.f32 %v3613_v46, %v3574_v14 }
  0xbc   :  { %v1279_v11 = vadd.f32 %v1223_v29, %v1163_v17  ;;  %v1340_v57 = vmul.f32 %v3613_v46, %v3578_v7  ;;  %v2026_v36 = vmul.f32 %v1962_v34, %v3547_v58  ;;  %v170_v52 = vrot.slane %v103_v33, 7 }
  0xbd   :  { %2751 = vtanh.f32 %v1802_v55  ;;  %v1097_v16 = vadd.f32 %v1039_v10, %v741_v2  ;;  %v1280_v47 = vadd.f32 %v1224_v8, %v1164_v0  ;;  %v171_v40 = vrot.slane %v3607_v13, 7 }
  0xbe   :  { %v1395_v18 = vadd.f32 %v1339_v45, %v1279_v11  ;;  %v172_v5 = vrot.slane %v3609_v60, 7  ;;  %v2087_v50 = vpack.c.bf16 %v2027_v22, %v2026_v36  ;;  %v236_v53 = vsel %vm129_vm0, %v170_v52, 0.0 }
  0xbf   :  { %v301_v26 = vrot.slane %v103_v33, 1  ;;  %v302_v4 = vrot.slane %v3607_v13, 1  ;;  %v1867_v54 = vmul.f32 0.5, %v3544_v56  ;;  %v1396_v62 = vadd.f32 %v1340_v57, %v1280_v47 }
  0xc0   :  { %v1452_v58 = vadd.f32 %v1395_v18, %v740_v12  ;;  %v3628_v6 = vsel %vm129_vm0, %v171_v40, 0.0  ;;  %2630 = vmatmul.mubr.bf16.gmra.mrb[4].mxu0 %v2087_v50  ;;  %v303_v1 = vrot.slane %v3609_v60, 1  ;;  %v438_v15 = vmul.f32 %v3059_v24, %v236_v53 }
  0xc1   :  { %v367_v28 = vsel %vm260_vm1, %v301_v26, 0.0  ;;  %v3635_v48 = vsel %vm260_vm1, %v302_v4, 0.0  ;;  %v1866_v56 = vmul.f32 0.5, %v3554_v59  ;;  %v1453_v61 = vadd.f32 %v1396_v62, %v1097_v16  ;;  %v3666_v62 = vld [vmem:[#allocation2 + $0x58] sm:$0xff] }
  0xc2   :  { %v1516_v23 = vmul.f32 %v1452_v58, %v1452_v58  ;;  %v439_v49 = vmul.f32 %v3059_v24, %v3628_v6  ;;  %v3643_v35 = vsel %vm129_vm0, %v172_v5, 0.0  ;;  %v506_v32 = vmul.f32 %v3062_v25, %v103_v33 }
  0xc3   :  { %v507_v27 = vmul.f32 %v3062_v25, %v3607_v13  ;;  %v638_v17 = vmul.f32 %v3087_v39, %v367_v28  ;;  %v2750_v22 = vpop.eup %2749  ;;  %v1517_v30 = vmul.f32 %v1453_v61, %v1453_v61  ;;  %v3651_v59 = vsel %vm260_vm1, %v303_v1, 0.0  ;;  %v3668_v1 = vld [vmem:[#allocation2 + $0x60] sm:$0xff] }
  0xc4   :  { %v1580_v51 = vmul.f32 %v1516_v23, %v1452_v58  ;;  %v639_v31 = vmul.f32 %v3087_v39, %v3635_v48  ;;  %v1995_v19 = vadd.f32 1.0, %v2750_v22  ;;  %v570_v10 = vadd.f32 %v506_v32, %v438_v15 }
  0xc5   :  { %v571_v0 = vadd.f32 %v507_v27, %v439_v49  ;;  %v835_v29 = vmul.f32 %v3092_v41, %v236_v53  ;;  %v1581_v34 = vmul.f32 %v1517_v30, %v1453_v61  ;;  %v895_v12 = vmul.f32 %v3095_v42, %v103_v33 }
  0xc6   :  { %v1644_v55 = vmul.f32 0.044715, %v1580_v51  ;;  %v1011_v2 = vmul.f32 %v3098_v43, %v367_v28  ;;  %v2059_v11 = vmul.f32 %v1995_v19, %v1867_v54  ;;  %v702_v45 = vadd.f32 %v638_v17, %v570_v10 }
  0xc7   :  { %v2752_v8 = vpop.eup %2751  ;;  %v703_v57 = vadd.f32 %v639_v31, %v571_v0  ;;  %v1191_v36 = vmul.f32 %v3101_v44, %v3628_v6  ;;  %v1645_v52 = vmul.f32 0.044715, %v1581_v34  ;;  %v951_v18 = vadd.f32 %v895_v12, %v835_v29 }
  0xc8   :  { %v1994_v16 = vadd.f32 1.0, %v2752_v8  ;;  %v1708_v47 = vadd.f32 %v1644_v55, %v1452_v58  ;;  %v772_v40 = vadd.f32 %v3603_v63, %v702_v45  ;;  %v1192_v33 = vmul.f32 %v3101_v44, %v3643_v35 }
  0xc9   :  { %v773_v5 = vadd.f32 %v3603_v63, %v703_v57  ;;  %v1251_v50 = vmul.f32 %v3142_v9, %v3607_v13  ;;  %v1709_v26 = vadd.f32 %v1645_v52, %v1453_v61  ;;  %v1067_v54 = vadd.f32 %v1011_v2, %v951_v18 }
  0xca   :  { %v2058_v53 = vmul.f32 %v1994_v16, %v1866_v56  ;;  %v1772_v4 = vmul.f32 0.7978846, %v1708_v47  ;;  %v1252_v28 = vmul.f32 %v3142_v9, %v3609_v60  ;;  %v1367_v23 = vmul.f32 %v3613_v46, %v3635_v48 }
  0xcb   :  { %v1307_v15 = vadd.f32 %v1251_v50, %v1191_v36  ;;  %v1368_v49 = vmul.f32 %v3613_v46, %v3651_v59  ;;  %v1773_v27 = vmul.f32 0.7978846, %v1709_v26  ;;  %v1129_v56 = vadd.f32 %v1067_v54, %v773_v5 }
  0xcc   :  { %v2103_v32 = vpack.c.bf16 %v2059_v11, %v2058_v53  ;;  %2753 = vtanh.f32 %v1772_v4  ;;  %v1308_v17 = vadd.f32 %v1252_v28, %v1192_v33  ;;  %v141_v30 = vrot.slane %v3666_v62, 7 }
  0xcd   :  { %v1423_v22 = vadd.f32 %v1367_v23, %v1307_v15  ;;  %v142_v51 = vrot.slane %v3668_v1, 7  ;;  %v1836_v31 = vmul.f32 0.5, %v1452_v58  ;;  %2755 = vtanh.f32 %v1773_v27 }
  0xce   :  { %2662 = vmatmul.mubr.bf16.gmra.mrb[4].mxu1 %v2103_v32  ;;  %v272_v19 = vrot.slane %v3666_v62, 1  ;;  %v408_v10 = vmul.f32 %v3059_v24, %v3563_v38  ;;  %v1424_v0 = vadd.f32 %v1368_v49, %v1308_v17  ;;  %v3685_v34 = vsel %vm129_vm0, %v141_v30, 0.0 }
  0xcf   :  { %v3681_v29 = vadd.f32 %v1423_v22, %v772_v40  ;;  %v273_v55 = vrot.slane %v3668_v1, 1  ;;  %v1837_v12 = vmul.f32 0.5, %v1453_v61  ;;  %v409_v58 = vmul.f32 %v3059_v24, %v3685_v34 }
  0xd0   :  { %v3690_v2 = vsel %vm260_vm1, %v272_v19, 0.0  ;;  %v476_v8 = vmul.f32 %v3062_v25, %v3540_v21  ;;  %v3696_v11 = vadd.f32 %v1424_v0, %v1129_v56  ;;  %v3702_v57 = vsel %vm129_vm0, %v142_v51, 0.0 }
  0xd1   :  { %v1548_v45 = vmul.f32 %v3681_v29, %v3681_v29  ;;  %v477_v61 = vmul.f32 %v3062_v25, %v3666_v62  ;;  %v608_v16 = vmul.f32 %v3087_v39, %v3578_v7  ;;  %v609_v52 = vmul.f32 %v3087_v39, %v3690_v2 }
  0xd2   :  { %v540_v36 = vadd.f32 %v476_v8, %v408_v10  ;;  %v808_v47 = vmul.f32 %v3092_v41, %v3558_v37  ;;  %v1549_v18 = vmul.f32 %v3696_v11, %v3696_v11  ;;  %v3717_v5 = vsel %vm260_vm1, %v273_v55, 0.0 }
  0xd3   :  { %v1612_v40 = vmul.f32 %v1548_v45, %v3681_v29  ;;  %v541_v33 = vadd.f32 %v477_v61, %v409_v58  ;;  %v809_v53 = vmul.f32 %v3092_v41, %v3563_v38  ;;  %v868_v26 = vmul.f32 %v3095_v42, %v3534_v20  ;;  %v3738_v58 = vld [vmem:[#allocation2 + $0x158] sm:$0xff] }
  0xd4   :  { %v672_v50 = vadd.f32 %v608_v16, %v540_v36  ;;  %v869_v37 = vmul.f32 %v3095_v42, %v3540_v21  ;;  %v1613_v4 = vmul.f32 %v1549_v18, %v3696_v11  ;;  %v984_v15 = vmul.f32 %v3098_v43, %v3574_v14  ;;  %v3744_v16 = vld [vmem:[#allocation2 + $0x160] sm:$0xff] }
  0xd5   :  { %v1676_v54 = vmul.f32 0.044715, %v1612_v40  ;;  %v673_v28 = vadd.f32 %v609_v52, %v541_v33  ;;  %v924_v32 = vadd.f32 %v868_v26, %v808_v47  ;;  %v985_v38 = vmul.f32 %v3098_v43, %v3578_v7 }
  0xd6   :  { %v2754_v23 = vpop.eup %2753  ;;  %v742_v49 = vadd.f32 %v3603_v63, %v672_v50  ;;  %v925_v27 = vadd.f32 %v869_v37, %v809_v53  ;;  %v1677_v20 = vmul.f32 0.044715, %v1613_v4  ;;  %v1165_v14 = vmul.f32 %v3101_v44, %v3685_v34 }
  0xd7   :  { %v1964_v56 = vadd.f32 1.0, %v2754_v23  ;;  %v1740_v17 = vadd.f32 %v1676_v54, %v3681_v29  ;;  %v743_v21 = vadd.f32 %v3603_v63, %v673_v28  ;;  %v2756_v22 = vpop.eup %2755  ;;  %v1040_v30 = vadd.f32 %v984_v15, %v924_v32 }
  0xd8   :  { %v1041_v51 = vadd.f32 %v985_v38, %v925_v27  ;;  %v1166_v19 = vmul.f32 %v3101_v44, %v3702_v57  ;;  %v1965_v10 = vadd.f32 1.0, %v2756_v22  ;;  %v1741_v55 = vadd.f32 %v1677_v20, %v3696_v11 }
  0xd9   :  { %v2028_v0 = vmul.f32 %v1964_v56, %v1836_v31  ;;  %v1804_v7 = vmul.f32 0.7978846, %v1740_v17  ;;  %v1098_v8 = vadd.f32 %v1040_v30, %v742_v49  ;;  %v1225_v61 = vmul.f32 %v3142_v9, %v3666_v62 }
  0xda   :  { %v1099_v45 = vadd.f32 %v1041_v51, %v743_v21  ;;  %v1226_v36 = vmul.f32 %v3142_v9, %v3668_v1  ;;  %v2029_v52 = vmul.f32 %v1965_v10, %v1837_v12  ;;  %v1805_v47 = vmul.f32 0.7978846, %v1741_v55 }
  0xdb   :  { %2757 = vtanh.f32 %v1804_v7  ;;  %v1341_v31 = vmul.f32 %v3613_v46, %v3690_v2  ;;  %v1281_v18 = vadd.f32 %v1225_v61, %v1165_v14  ;;  %v1342_v33 = vmul.f32 %v3613_v46, %v3717_v5 }
  0xdc   :  { %v1282_v40 = vadd.f32 %v1226_v36, %v1166_v19  ;;  %v173_v50 = vrot.slane %v3738_v58, 7  ;;  %v2088_v53 = vpack.c.bf16 %v2029_v52, %v2028_v0  ;;  %2759 = vtanh.f32 %v1805_v47 }
  0xdd   :  { %v174_v26 = vrot.slane %v3744_v16, 7  ;;  %v304_v37 = vrot.slane %v3738_v58, 1  ;;  %v1397_v4 = vadd.f32 %v1341_v31, %v1281_v18  ;;  %v305_v28 = vrot.slane %v3744_v16, 1 }
  0xde   :  { %v1398_v12 = vadd.f32 %v1342_v33, %v1282_v40  ;;  %v3755_v54 = vsel %vm129_vm0, %v173_v50, 0.0  ;;  %2633 = vmatprep.mubr.bf16.mxu0 %v2088_v53  ;;  %v1868_v15 = vmul.f32 0.5, %v3681_v29  ;;  %v440_v49 = vmul.f32 %v3059_v24, %v3643_v35 }
  0xdf   :  { %v3761_v23 = vsel %vm260_vm1, %v304_v37, 0.0  ;;  %v441_v32 = vmul.f32 %v3059_v24, %v3755_v54  ;;  %v1869_v27 = vmul.f32 0.5, %v3696_v11  ;;  %v3768_v38 = vadd.f32 %v1397_v4, %v1098_v8 }
  0xe0   :  { %v3770_v56 = vadd.f32 %v1398_v12, %v1099_v45  ;;  %v508_v20 = vmul.f32 %v3062_v25, %v3609_v60  ;;  %v509_v29 = vmul.f32 %v3062_v25, %v3738_v58  ;;  %v640_v17 = vmul.f32 %v3087_v39, %v3651_v59 }
  0xe1   :  { %v641_v21 = vmul.f32 %v3087_v39, %v3761_v23  ;;  %v836_v22 = vmul.f32 %v3092_v41, %v3628_v6  ;;  %v1518_v11 = vmul.f32 %v3768_v38, %v3768_v38  ;;  %v3788_v51 = vsel %vm129_vm0, %v174_v26, 0.0 }
  0xe2   :  { %v1519_v30 = vmul.f32 %v3770_v56, %v3770_v56  ;;  %v3792_v14 = vsel %vm260_vm1, %v305_v28, 0.0  ;;  %v572_v19 = vadd.f32 %v508_v20, %v440_v49  ;;  %v573_v10 = vadd.f32 %v509_v29, %v441_v32  ;;  %v3816_v20 = vld [vmem:[#allocation2 + $0x68] sm:$0xff] }
  0xe3   :  { %v837_v0 = vmul.f32 %v3092_v41, %v3643_v35  ;;  %v896_v6 = vmul.f32 %v3095_v42, %v3607_v13  ;;  %v1582_v55 = vmul.f32 %v1518_v11, %v3768_v38  ;;  %v897_v8 = vmul.f32 %v3095_v42, %v3609_v60 }
  0xe4   :  { %v1583_v7 = vmul.f32 %v1519_v30, %v3770_v56  ;;  %v1012_v45 = vmul.f32 %v3098_v43, %v3635_v48  ;;  %v704_v36 = vadd.f32 %v640_v17, %v572_v19  ;;  %v705_v52 = vadd.f32 %v641_v21, %v573_v10 }
  0xe5   :  { %v2758_v61 = vpop.eup %2757  ;;  %v952_v47 = vadd.f32 %v896_v6, %v836_v22  ;;  %v1013_v35 = vmul.f32 %v3098_v43, %v3651_v59  ;;  %v1646_v18 = vmul.f32 0.044715, %v1582_v55  ;;  %v953_v40 = vadd.f32 %v897_v8, %v837_v0  ;;  %v3820_v22 = vld [vmem:[#allocation2 + $0x70] sm:$0xff] }
  0xe6   :  { %v1996_v31 = vadd.f32 1.0, %v2758_v61  ;;  %v1647_v13 = vmul.f32 0.044715, %v1583_v7  ;;  %v2760_v33 = vpop.eup %2759  ;;  %v774_v50 = vadd.f32 %v3603_v63, %v704_v36  ;;  %v775_v53 = vadd.f32 %v3603_v63, %v705_v52 }
  0xe7   :  { %v1068_v60 = vadd.f32 %v1012_v45, %v952_v47  ;;  %v1193_v48 = vmul.f32 %v3101_v44, %v3755_v54  ;;  %v1997_v26 = vadd.f32 1.0, %v2760_v33  ;;  %v1710_v4 = vadd.f32 %v1646_v18, %v3768_v38 }
  0xe8   :  { %v2060_v37 = vmul.f32 %v1996_v31, %v1868_v15  ;;  %v1711_v12 = vadd.f32 %v1647_v13, %v3770_v56  ;;  %v1069_v59 = vadd.f32 %v1013_v35, %v953_v40  ;;  %v1194_v49 = vmul.f32 %v3101_v44, %v3788_v51 }
  0xe9   :  { %v1130_v28 = vadd.f32 %v1068_v60, %v774_v50  ;;  %v1253_v32 = vmul.f32 %v3142_v9, %v3738_v58  ;;  %v2061_v29 = vmul.f32 %v1997_v26, %v1869_v27  ;;  %v1774_v17 = vmul.f32 0.7978846, %v1710_v4 }
  0xea   :  { %v1775_v21 = vmul.f32 0.7978846, %v1711_v12  ;;  %v1254_v15 = vmul.f32 %v3142_v9, %v3744_v16  ;;  %v1131_v11 = vadd.f32 %v1069_v59, %v775_v53  ;;  %v1369_v19 = vmul.f32 %v3613_v46, %v3761_v23 }
  0xeb   :  { %v1309_v30 = vadd.f32 %v1253_v32, %v1193_v48  ;;  %v1370_v10 = vmul.f32 %v3613_v46, %v3792_v14  ;;  %v2104_v0 = vpack.c.bf16 %v2061_v29, %v2060_v37  ;;  %2761 = vtanh.f32 %v1774_v17 }
  0xec   :  { %v1310_v6 = vadd.f32 %v1254_v15, %v1194_v49  ;;  %v143_v27 = vrot.slane %v3816_v20, 7  ;;  %2763 = vtanh.f32 %v1775_v21  ;;  %v144_v7 = vrot.slane %v3820_v22, 7 }
  0xed   :  { %v1425_v55 = vadd.f32 %v1369_v19, %v1309_v30  ;;  %v274_v8 = vrot.slane %v3816_v20, 1  ;;  %2665 = vmatprep.mubr.bf16.mxu1 %v2104_v0  ;;  %v275_v36 = vrot.slane %v3820_v22, 1  ;;  %v410_v52 = vmul.f32 %v3059_v24, %v3702_v57 }
  0xee   :  { %v1426_v45 = vadd.f32 %v1370_v10, %v1310_v6  ;;  %v3831_v61 = vsel %vm129_vm0, %v143_v27, 0.0  ;;  %v1838_v47 = vmul.f32 0.5, %v3768_v38  ;;  %v1839_v13 = vmul.f32 0.5, %v3770_v56 }
  0xef   :  { %v3837_v35 = vadd.f32 %v1425_v55, %v1130_v28  ;;  %v3841_v31 = vsel %vm260_vm1, %v274_v8, 0.0  ;;  %v411_v18 = vmul.f32 %v3059_v24, %v3831_v61  ;;  %v478_v33 = vmul.f32 %v3062_v25, %v3668_v1 }
  0xf0   :  { %v3846_v40 = vadd.f32 %v1426_v45, %v1131_v11  ;;  %v479_v50 = vmul.f32 %v3062_v25, %v3816_v20  ;;  %v3856_v53 = vsel %vm129_vm0, %v144_v7, 0.0  ;;  %v610_v60 = vmul.f32 %v3087_v39, %v3717_v5 }
  0xf1   :  { %v1550_v38 = vmul.f32 %v3837_v35, %v3837_v35  ;;  %v611_v56 = vmul.f32 %v3087_v39, %v3841_v31  ;;  %v3866_v26 = vsel %vm260_vm1, %v275_v36, 0.0  ;;  %v542_v37 = vadd.f32 %v478_v33, %v410_v52 }
  0xf2   :  { %v1551_v48 = vmul.f32 %v3846_v40, %v3846_v40  ;;  %v543_v4 = vadd.f32 %v479_v50, %v411_v18  ;;  %v810_v59 = vmul.f32 %v3092_v41, %v3685_v34  ;;  %v811_v28 = vmul.f32 %v3092_v41, %v3702_v57  ;;  %v3892_v50 = vld [vmem:[#allocation2 + $0x168] sm:$0xff] }
  0xf3   :  { %v1614_v12 = vmul.f32 %v1550_v38, %v3837_v35  ;;  %v870_v49 = vmul.f32 %v3095_v42, %v3666_v62  ;;  %v674_v29 = vadd.f32 %v610_v60, %v542_v37  ;;  %v871_v21 = vmul.f32 %v3095_v42, %v3668_v1  ;;  %v3896_v37 = vld [vmem:[#allocation2 + $0x170] sm:$0xff] }
  0xf4   :  { %v1615_v32 = vmul.f32 %v1551_v48, %v3846_v40  ;;  %v675_v17 = vadd.f32 %v611_v56, %v543_v4  ;;  %v986_v30 = vmul.f32 %v3098_v43, %v3690_v2  ;;  %v987_v34 = vmul.f32 %v3098_v43, %v3717_v5 }
  0xf5   :  { %v1678_v15 = vmul.f32 0.044715, %v1614_v12  ;;  %v926_v11 = vadd.f32 %v870_v49, %v810_v59  ;;  %v2762_v19 = vpop.eup %2761  ;;  %v744_v10 = vadd.f32 %v3603_v63, %v674_v29  ;;  %v927_v0 = vadd.f32 %v871_v21, %v811_v28 }
  0xf6   :  { %v1679_v57 = vmul.f32 0.044715, %v1615_v32  ;;  %v745_v62 = vadd.f32 %v3603_v63, %v675_v17  ;;  %v2764_v6 = vpop.eup %2763  ;;  %v1966_v27 = vadd.f32 1.0, %v2762_v19  ;;  %v1167_v7 = vmul.f32 %v3101_v44, %v3831_v61 }
  0xf7   :  { %v1742_v55 = vadd.f32 %v1678_v15, %v3837_v35  ;;  %v1042_v1 = vadd.f32 %v986_v30, %v926_v11  ;;  %v1967_v8 = vadd.f32 1.0, %v2764_v6  ;;  %v1043_v45 = vadd.f32 %v987_v34, %v927_v0 }
  0xf8   :  { %v1743_v2 = vadd.f32 %v1679_v57, %v3846_v40  ;;  %v1168_v5 = vmul.f32 %v3101_v44, %v3856_v53  ;;  %v2030_v36 = vmul.f32 %v1966_v27, %v1838_v47  ;;  %v1227_v33 = vmul.f32 %v3142_v9, %v3816_v20 }
  0xf9   :  { %v1806_v52 = vmul.f32 0.7978846, %v1742_v55  ;;  %v1100_v18 = vadd.f32 %v1042_v1, %v744_v10  ;;  %v2031_v38 = vmul.f32 %v1967_v8, %v1839_v13  ;;  %v1101_v56 = vadd.f32 %v1043_v45, %v745_v62 }
  0xfa   :  { %v1807_v60 = vmul.f32 0.7978846, %v1743_v2  ;;  %v1228_v48 = vmul.f32 %v3142_v9, %v3820_v22  ;;  %v1283_v4 = vadd.f32 %v1227_v33, %v1167_v7  ;;  %v1343_v47 = vmul.f32 %v3613_v46, %v3841_v31 }
  0xfb   :  { %2765 = vtanh.f32 %v1806_v52  ;;  %v1344_v12 = vmul.f32 %v3613_v46, %v3866_v26  ;;  %v2089_v59 = vpack.c.bf16 %v2031_v38, %v2030_v36  ;;  %v175_v13 = vrot.slane %v3892_v50, 7 }
  0xfc   :  { %2767 = vtanh.f32 %v1807_v60  ;;  %v1284_v28 = vadd.f32 %v1228_v48, %v1168_v5  ;;  %v1399_v49 = vadd.f32 %v1343_v47, %v1283_v4  ;;  %v176_v32 = vrot.slane %v3896_v37, 7 }
  0xfd   :  { %v306_v29 = vrot.slane %v3892_v50, 1  ;;  %v307_v17 = vrot.slane %v3896_v37, 1  ;;  %2634 = vmatmul.mubr.bf16.gmra.mrb[8].mxu0 %v2089_v59  ;;  %v3908_v15 = vsel %vm129_vm0, %v175_v13, 0.0  ;;  %v442_v11 = vmul.f32 %v3059_v24, %v3788_v51 }
  0xfe   :  { %v1400_v21 = vadd.f32 %v1344_v12, %v1284_v28  ;;  %v510_v30 = vmul.f32 %v3062_v25, %v3744_v16  ;;  %v1870_v34 = vmul.f32 0.5, %v3837_v35  ;;  %v1871_v19 = vmul.f32 0.5, %v3846_v40 }
  0xff   :  { %v3916_v57 = vadd.f32 %v1399_v49, %v1100_v18  ;;  %v3920_v10 = vsel %vm260_vm1, %v306_v29, 0.0  ;;  %v443_v0 = vmul.f32 %v3059_v24, %v3908_v15  ;;  %v511_v6 = vmul.f32 %v3062_v25, %v3892_v50 }
 0x100   :  { %v3922_v62 = vadd.f32 %v1400_v21, %v1101_v56  ;;  %v574_v27 = vadd.f32 %v510_v30, %v442_v11  ;;  %v3932_v40 = vsel %vm129_vm0, %v176_v32, 0.0  ;;  %v642_v55 = vmul.f32 %v3087_v39, %v3792_v14 }
 0x101   :  { %v1520_v35 = vmul.f32 %v3916_v57, %v3916_v57  ;;  %v643_v1 = vmul.f32 %v3087_v39, %v3920_v10  ;;  %v3942_v8 = vsel %vm260_vm1, %v307_v17, 0.0  ;;  %v575_v2 = vadd.f32 %v511_v6, %v443_v0 }
 0x102   :  { %v1521_v7 = vmul.f32 %v3922_v62, %v3922_v62  ;;  %v838_v45 = vmul.f32 %v3092_v41, %v3755_v54  ;;  %v706_v36 = vadd.f32 %v642_v55, %v574_v27  ;;  %v839_v52 = vmul.f32 %v3092_v41, %v3788_v51  ;;  %v78_v27 = vld [vmem:[#allocation2 + $0x78] sm:$0xff] }
 0x103   :  { %v1584_v5 = vmul.f32 %v1520_v35, %v3916_v57  ;;  %v898_v18 = vmul.f32 %v3095_v42, %v3738_v58  ;;  %v707_v38 = vadd.f32 %v643_v1, %v575_v2  ;;  %v899_v60 = vmul.f32 %v3095_v42, %v3744_v16 }
 0x104   :  { %v1585_v33 = vmul.f32 %v1521_v7, %v3922_v62  ;;  %v1014_v56 = vmul.f32 %v3098_v43, %v3761_v23  ;;  %v776_v4 = vadd.f32 %v3603_v63, %v706_v36  ;;  %v1015_v51 = vmul.f32 %v3098_v43, %v3792_v14 }
 0x105   :  { %v2766_v48 = vpop.eup %2765  ;;  %v1648_v54 = vmul.f32 0.044715, %v1584_v5  ;;  %v954_v47 = vadd.f32 %v898_v18, %v838_v45  ;;  %v777_v28 = vadd.f32 %v3603_v63, %v707_v38  ;;  %v955_v13 = vadd.f32 %v899_v60, %v839_v52 }
 0x106   :  { %v2768_v12 = vpop.eup %2767  ;;  %v1998_v59 = vadd.f32 1.0, %v2766_v48  ;;  %v1649_v58 = vmul.f32 0.044715, %v1585_v33  ;;  %v1195_v23 = vmul.f32 %v3101_v44, %v3908_v15  ;;  %v1196_v14 = vmul.f32 %v3101_v44, %v3932_v40 }
 0x107   :  { %v1999_v49 = vadd.f32 1.0, %v2768_v12  ;;  %v1712_v16 = vadd.f32 %v1648_v54, %v3916_v57  ;;  %v1070_v32 = vadd.f32 %v1014_v56, %v954_v47  ;;  %v1071_v21 = vadd.f32 %v1015_v51, %v955_v13 }
 0x108   :  { %v2062_v29 = vmul.f32 %v1998_v59, %v1870_v34  ;;  %v1713_v17 = vadd.f32 %v1649_v58, %v3922_v62  ;;  %v1255_v6 = vmul.f32 %v3142_v9, %v3892_v50  ;;  %v1256_v1 = vmul.f32 %v3142_v9, %v3896_v37 }
 0x109   :  { %v2063_v11 = vmul.f32 %v1999_v49, %v1871_v19  ;;  %v1776_v30 = vmul.f32 0.7978846, %v1712_v16  ;;  %v1132_v0 = vadd.f32 %v1070_v32, %v776_v4  ;;  %v1133_v55 = vadd.f32 %v1071_v21, %v777_v28 }
 0x10a   :  { %v1777_v35 = vmul.f32 0.7978846, %v1713_v17  ;;  %v1371_v34 = vmul.f32 %v3613_v46, %v3920_v10  ;;  %v1311_v2 = vadd.f32 %v1255_v6, %v1195_v23  ;;  %v1372_v19 = vmul.f32 %v3613_v46, %v3942_v8 }
 0x10b   :  { %v2105_v7 = vpack.c.bf16 %v2063_v11, %v2062_v29  ;;  %2769 = vtanh.f32 %v1776_v30  ;;  %v1312_v45 = vadd.f32 %v1256_v1, %v1196_v14  ;;  %v145_v5 = vrot.slane %v78_v27, 7 }
 0x10c   :  { %2771 = vtanh.f32 %v1777_v35  ;;  %v276_v36 = vrot.slane %v78_v27, 1  ;;  %v1427_v52 = vadd.f32 %v1371_v34, %v1311_v2  ;;  %v412_v18 = vmul.f32 %v3059_v24, %v3856_v53  ;;  %v110_v34 = vld [vmem:[#allocation2 + $0x178] sm:$0xff] }
 0x10d   :  { %2666 = vmatmul.mubr.bf16.gmra.mrb[8].mxu1 %v2105_v7  ;;  %v480_v33 = vmul.f32 %v3062_v25, %v3820_v22  ;;  %v481_v38 = vmul.f32 %v3062_v25, %v78_v27  ;;  %v1428_v60 = vadd.f32 %v1372_v19, %v1312_v45  ;;  %v211_v56 = vsel %vm129_vm0, %v145_v5, 0.0 }
 0x10e   :  { %v342_v48 = vsel %vm260_vm1, %v276_v36, 0.0  ;;  %v612_v54 = vmul.f32 %v3087_v39, %v3866_v26  ;;  %v1488_v4 = vadd.f32 %v1427_v52, %v1132_v0  ;;  %v413_v47 = vmul.f32 %v3059_v24, %v211_v56 }
 0x10f   :  { %v544_v51 = vadd.f32 %v480_v33, %v412_v18  ;;  %v613_v12 = vmul.f32 %v3087_v39, %v342_v48  ;;  %v1489_v59 = vadd.f32 %v1428_v60, %v1133_v55  ;;  %v812_v58 = vmul.f32 %v3092_v41, %v3831_v61 }
 0x110   :  { %v813_v28 = vmul.f32 %v3092_v41, %v3856_v53  ;;  %v872_v13 = vmul.f32 %v3095_v42, %v3816_v20  ;;  %v1840_v49 = vmul.f32 0.5, %v3916_v57  ;;  %v1552_v16 = vmul.f32 %v1488_v4, %v1488_v4 }
 0x111   :  { %v545_v32 = vadd.f32 %v481_v38, %v413_v47  ;;  %v676_v23 = vadd.f32 %v612_v54, %v544_v51  ;;  %v1841_v29 = vmul.f32 0.5, %v3922_v62  ;;  %v1553_v17 = vmul.f32 %v1489_v59, %v1489_v59 }
 0x112   :  { %v873_v21 = vmul.f32 %v3095_v42, %v3820_v22  ;;  %v928_v14 = vadd.f32 %v872_v13, %v812_v58  ;;  %v1616_v11 = vmul.f32 %v1552_v16, %v1488_v4  ;;  %v988_v53 = vmul.f32 %v3098_v43, %v3841_v31 }
 0x113   :  { %v677_v61 = vadd.f32 %v613_v12, %v545_v32  ;;  %v746_v30 = vadd.f32 %v3603_v63, %v676_v23  ;;  %v1617_v20 = vmul.f32 %v1553_v17, %v1489_v59  ;;  %v989_v57 = vmul.f32 %v3098_v43, %v3866_v26 }
 0x114   :  { %v929_v0 = vadd.f32 %v873_v21, %v813_v28  ;;  %v1169_v6 = vmul.f32 %v3101_v44, %v211_v56  ;;  %v1680_v35 = vmul.f32 0.044715, %v1616_v11  ;;  %v1044_v22 = vadd.f32 %v988_v53, %v928_v14 }
 0x115   :  { %v2770_v62 = vpop.eup %2769  ;;  %v747_v55 = vadd.f32 %v3603_v63, %v677_v61  ;;  %v1229_v1 = vmul.f32 %v3142_v9, %v78_v27  ;;  %v1681_v19 = vmul.f32 0.044715, %v1617_v20  ;;  %v1345_v31 = vmul.f32 %v3613_v46, %v342_v48 }
 0x116   :  { %v2772_v7 = vpop.eup %2771  ;;  %v1968_v2 = vadd.f32 1.0, %v2770_v62  ;;  %v1045_v45 = vadd.f32 %v989_v57, %v929_v0  ;;  %v1744_v36 = vadd.f32 %v1680_v35, %v1488_v4  ;;  %v1102_v52 = vadd.f32 %v1044_v22, %v746_v30 }
 0x117   :  { %v1969_v5 = vadd.f32 1.0, %v2772_v7  ;;  %v1285_v26 = vadd.f32 %v1229_v1, %v1169_v6  ;;  %v1745_v33 = vadd.f32 %v1681_v19, %v1489_v59  ;;  %v177_v60 = vrot.slane %v110_v34, 7 }
 0x118   :  { %v2032_v18 = vmul.f32 %v1968_v2, %v1840_v49  ;;  %v4006_v38 = vadd.f32 %v1045_v45, %v747_v55  ;;  %v1808_v54 = vmul.f32 0.7978846, %v1744_v36  ;;  %v308_v27 = vrot.slane %v110_v34, 1  ;;  %v79_v45 = vld [vmem:[#allocation2 + $0x80] sm:$0xff]  ;;  %v4043_v36 = vld [vmem:[#allocation2 + $0x90] sm:$0xff] }
 0x119   :  { %v2033_v56 = vmul.f32 %v1969_v5, %v1841_v29  ;;  %v1401_v47 = vadd.f32 %v1345_v31, %v1285_v26  ;;  %v1809_v51 = vmul.f32 0.7978846, %v1745_v33  ;;  %v1872_v12 = vmul.f32 0.5, %v1488_v4  ;;  %v4038_v31 = vld [vmem:[#allocation2 + $0x88] sm:$0xff] }
 0x11a   :  { %v1523_v58 = vmul.f32 %v4006_v38, %v4006_v38  ;;  %v243_v48 = vsel %vm129_vm0, %v177_v60, 0.0  ;;  %2773 = vtanh.f32 %v1808_v54  ;;  %v374_v49 = vsel %vm260_vm1, %v308_v27, 0.0 }
 0x11b   :  { %v2090_v28 = vpack.c.bf16 %v2033_v56, %v2032_v18  ;;  %v1458_v13 = vadd.f32 %v1401_v47, %v1102_v52  ;;  %2775 = vtanh.f32 %v1809_v51  ;;  %v444_v32 = vmul.f32 %v3059_v24, %v3932_v40 }
 0x11c   :  { %v1587_v16 = vmul.f32 %v1523_v58, %v4006_v38  ;;  %v445_v4 = vmul.f32 %v3059_v24, %v243_v48  ;;  %v1873_v23 = vmul.f32 0.5, %v1489_v59  ;;  %v512_v17 = vmul.f32 %v3062_v25, %v3896_v37 }
 0x11d   :  { %2637 = vmatprep.mubr.bf16.mxu0 %v2090_v28  ;;  %v1522_v29 = vmul.f32 %v1458_v13, %v1458_v13  ;;  %v513_v21 = vmul.f32 %v3062_v25, %v110_v34  ;;  %v644_v11 = vmul.f32 %v3087_v39, %v3942_v8  ;;  %v645_v61 = vmul.f32 %v3087_v39, %v374_v49 }
 0x11e   :  { %v1651_v14 = vmul.f32 0.044715, %v1587_v16  ;;  %v840_v30 = vmul.f32 %v3092_v41, %v3908_v15  ;;  %v576_v20 = vadd.f32 %v512_v17, %v444_v32  ;;  %v841_v59 = vmul.f32 %v3092_v41, %v3932_v40 }
 0x11f   :  { %v1586_v53 = vmul.f32 %v1522_v29, %v1458_v13  ;;  %v577_v0 = vadd.f32 %v513_v21, %v445_v4  ;;  %v900_v6 = vmul.f32 %v3095_v42, %v3892_v50  ;;  %v901_v62 = vmul.f32 %v3095_v42, %v3896_v37 }
 0x120   :  { %v1715_v57 = vadd.f32 %v1651_v14, %v4006_v38  ;;  %v1016_v35 = vmul.f32 %v3098_v43, %v3920_v10  ;;  %v708_v22 = vadd.f32 %v644_v11, %v576_v20  ;;  %v1017_v1 = vmul.f32 %v3098_v43, %v3942_v8 }
 0x121   :  { %v1650_v55 = vmul.f32 0.044715, %v1586_v53  ;;  %v709_v15 = vadd.f32 %v645_v61, %v577_v0  ;;  %v956_v2 = vadd.f32 %v900_v6, %v840_v30  ;;  %v957_v40 = vadd.f32 %v901_v62, %v841_v59 }
 0x122   :  { %v1779_v7 = vmul.f32 0.7978846, %v1715_v57  ;;  %v1197_v19 = vmul.f32 %v3101_v44, %v243_v48  ;;  %v778_v37 = vadd.f32 %v3603_v63, %v708_v22  ;;  %v1257_v10 = vmul.f32 %v3142_v9, %v110_v34 }
 0x123   :  { %v1714_v50 = vadd.f32 %v1650_v55, %v1458_v13  ;;  %v779_v5 = vadd.f32 %v3603_v63, %v709_v15  ;;  %v1072_v52 = vadd.f32 %v1016_v35, %v956_v2  ;;  %v1073_v8 = vadd.f32 %v1017_v1, %v957_v40 }
 0x124   :  { %2777 = vtanh.f32 %v1779_v7  ;;  %v1373_v26 = vmul.f32 %v3613_v46, %v374_v49  ;;  %v2774_v18 = vpop.eup %2773  ;;  %v1313_v60 = vadd.f32 %v1257_v10, %v1197_v19  ;;  %v146_v56 = vrot.slane %v79_v45, 7 }
 0x125   :  { %v1778_v33 = vmul.f32 0.7978846, %v1714_v50  ;;  %v147_v54 = vrot.slane %v4038_v31, 7  ;;  %v2776_v47 = vpop.eup %2775  ;;  %v2000_v27 = vadd.f32 1.0, %v2774_v18  ;;  %v1134_v51 = vadd.f32 %v1072_v52, %v778_v37 }
 0x126   :  { %v4047_v58 = vadd.f32 %v1073_v8, %v779_v5  ;;  %v148_v63 = vrot.slane %v4043_v36, 7  ;;  %v2001_v34 = vadd.f32 1.0, %v2776_v47  ;;  %v1843_v48 = vmul.f32 0.5, %v4006_v38  ;;  %v111_v47 = vld [vmem:[#allocation2 + $0x180] sm:$0xff] }
 0x127   :  { %2779 = vtanh.f32 %v1778_v33  ;;  %v1429_v28 = vadd.f32 %v1373_v26, %v1313_v60  ;;  %v2064_v16 = vmul.f32 %v2000_v27, %v1872_v12  ;;  %v1842_v46 = vmul.f32 0.5, %v1458_v13 }
 0x128   :  { %v1555_v49 = vmul.f32 %v4047_v58, %v4047_v58  ;;  %v212_v32 = vsel %vm129_vm0, %v146_v56, 0.0  ;;  %v2065_v4 = vmul.f32 %v2001_v34, %v1873_v23  ;;  %v4059_v17 = vsel %vm129_vm0, %v147_v54, 0.0 }
 0x129   :  { %v4055_v29 = vadd.f32 %v1429_v28, %v1134_v51  ;;  %v277_v21 = vrot.slane %v79_v45, 1  ;;  %v4064_v12 = vsel %vm129_vm0, %v148_v63, 0.0  ;;  %v278_v13 = vrot.slane %v4038_v31, 1  ;;  %v4102_v51 = vld [vmem:[%s5215_s2] ss:$0 sm:$0xff]  ;;  %v4108_v28 = vld [vmem:[#allocation2 + $0x188] sm:$0xff] }
 0x12a   :  { %v1619_v38 = vmul.f32 %v1555_v49, %v4047_v58  ;;  %v279_v14 = vrot.slane %v4043_v36, 1  ;;  %v2106_v11 = vpack.c.bf16 %v2065_v4, %v2064_v16  ;;  %v414_v30 = vmul.f32 %v3059_v24, %v212_v32  ;;  %v4110_v16 = vld [vmem:[#allocation2 + $0x190] sm:$0xff]  ;;  %v4114_v4 = vld [vmem:[#allocation5 + $0x8] ss:$0 sm:$0xff] }
 0x12b   :  { %v1554_v23 = vmul.f32 %v4055_v29, %v4055_v29  ;;  %v343_v61 = vsel %vm260_vm1, %v277_v21, 0.0  ;;  %v4075_v20 = vsel %vm260_vm1, %v278_v13, 0.0  ;;  %v415_v59 = vmul.f32 %v3059_v24, %v4059_v17 }
 0x12c   :  { %v1683_v53 = vmul.f32 0.044715, %v1619_v38  ;;  %v4079_v0 = vsel %vm260_vm1, %v279_v14, 0.0  ;;  %2669 = vmatprep.mubr.bf16.mxu1 %v2106_v11  ;;  %v482_v6 = vmul.f32 %v3062_v25, %v79_v45  ;;  %v483_v62 = vmul.f32 %v3062_v25, %v4038_v31 }
 0x12d   :  { %v1618_v57 = vmul.f32 %v1554_v23, %v4055_v29  ;;  %v614_v35 = vmul.f32 %v3087_v39, %v343_v61  ;;  %v615_v15 = vmul.f32 %v3087_v39, %v4075_v20  ;;  %v814_v1 = vmul.f32 %v3092_v41, %v212_v32 }
 0x12e   :  { %v2778_v55 = vpop.eup %2777  ;;  %v1747_v22 = vadd.f32 %v1683_v53, %v4047_v58  ;;  %v874_v7 = vmul.f32 %v3095_v42, %v79_v45  ;;  %v546_v19 = vadd.f32 %v482_v6, %v414_v30  ;;  %v547_v50 = vadd.f32 %v483_v62, %v415_v59 }
 0x12f   :  { %v1971_v2 = vadd.f32 1.0, %v2778_v55  ;;  %v1682_v40 = vmul.f32 0.044715, %v1618_v57  ;;  %v990_v10 = vmul.f32 %v3098_v43, %v343_v61  ;;  %v1170_v52 = vmul.f32 %v3101_v44, %v4059_v17 }
 0x130   :  { %v1811_v37 = vmul.f32 0.7978846, %v1747_v22  ;;  %v930_v5 = vadd.f32 %v874_v7, %v814_v1  ;;  %v678_v33 = vadd.f32 %v614_v35, %v546_v19  ;;  %v679_v60 = vadd.f32 %v615_v15, %v547_v50 }
 0x131   :  { %v2780_v8 = vpop.eup %2779  ;;  %v2035_v26 = vmul.f32 %v1971_v2, %v1843_v48  ;;  %v1746_v18 = vadd.f32 %v1682_v40, %v4055_v29  ;;  %v1171_v54 = vmul.f32 %v3101_v44, %v4064_v12  ;;  %v1230_v48 = vmul.f32 %v3142_v9, %v4038_v31 }
 0x132   :  { %v1970_v56 = vadd.f32 1.0, %v2780_v8  ;;  %2781 = vtanh.f32 %v1811_v37  ;;  %v1046_v45 = vadd.f32 %v990_v10, %v930_v5  ;;  %v748_v63 = vadd.f32 %v4102_v51, %v678_v33 }
 0x133   :  { %v1810_v27 = vmul.f32 0.7978846, %v1746_v18  ;;  %v749_v34 = vadd.f32 %v4102_v51, %v679_v60  ;;  %v1231_v32 = vmul.f32 %v3142_v9, %v4043_v36  ;;  %v1346_v21 = vmul.f32 %v4114_v4, %v4075_v20 }
 0x134   :  { %v2034_v49 = vmul.f32 %v1970_v56, %v1842_v46  ;;  %v1347_v38 = vmul.f32 %v4114_v4, %v4079_v0  ;;  %v1286_v14 = vadd.f32 %v1230_v48, %v1170_v52  ;;  %v178_v11 = vrot.slane %v111_v47, 7 }
 0x135   :  { %2783 = vtanh.f32 %v1810_v27  ;;  %v1105_v13 = vadd.f32 %v1046_v45, %v749_v34  ;;  %v1287_v61 = vadd.f32 %v1231_v32, %v1171_v54  ;;  %v179_v30 = vrot.slane %v4108_v28, 7 }
 0x136   :  { %v2091_v23 = vpack.c.bf16 %v2035_v26, %v2034_v49  ;;  %v180_v46 = vrot.slane %v4110_v16, 7  ;;  %v1402_v53 = vadd.f32 %v1346_v21, %v1286_v14  ;;  %v244_v59 = vsel %vm129_vm0, %v178_v11, 0.0 }
 0x137   :  { %v309_v57 = vrot.slane %v111_v47, 1  ;;  %v310_v6 = vrot.slane %v4108_v28, 1  ;;  %v1875_v62 = vmul.f32 0.5, %v4047_v58  ;;  %v1403_v35 = vadd.f32 %v1347_v38, %v1287_v61 }
 0x138   :  { %2638 = vmatmul.mubr.bf16.gmra.mrb[12].mxu0 %v2091_v23  ;;  %v4128_v55 = vsel %vm129_vm0, %v179_v30, 0.0  ;;  %v311_v22 = vrot.slane %v4110_v16, 1  ;;  %v1460_v15 = vadd.f32 %v1402_v53, %v748_v63  ;;  %v446_v2 = vmul.f32 %v3059_v24, %v244_v59 }
 0x139   :  { %v375_v1 = vsel %vm260_vm1, %v309_v57, 0.0  ;;  %v4135_v7 = vsel %vm260_vm1, %v310_v6, 0.0  ;;  %v1874_v40 = vmul.f32 0.5, %v4055_v29  ;;  %v1461_v58 = vadd.f32 %v1403_v35, %v1105_v13  ;;  %v4168_v35 = vld [vmem:[#allocation2 + $0x98] sm:$0xff] }
 0x13a   :  { %v447_v19 = vmul.f32 %v3059_v24, %v4128_v55  ;;  %v514_v50 = vmul.f32 %v3062_v25, %v111_v47  ;;  %v1524_v37 = vmul.f32 %v1460_v15, %v1460_v15  ;;  %v4144_v5 = vsel %vm129_vm0, %v180_v46, 0.0 }
 0x13b   :  { %v515_v10 = vmul.f32 %v3062_v25, %v4108_v28  ;;  %v646_v52 = vmul.f32 %v3087_v39, %v375_v1  ;;  %v1525_v26 = vmul.f32 %v1461_v58, %v1461_v58  ;;  %v4151_v29 = vsel %vm260_vm1, %v311_v22, 0.0  ;;  %v4170_v22 = vld [vmem:[#allocation2 + $0xa0] sm:$0xff] }
 0x13c   :  { %v2782_v8 = vpop.eup %2781  ;;  %v578_v18 = vadd.f32 %v514_v50, %v446_v2  ;;  %v647_v33 = vmul.f32 %v3087_v39, %v4135_v7  ;;  %v1588_v56 = vmul.f32 %v1524_v37, %v1460_v15  ;;  %v842_v54 = vmul.f32 %v3092_v41, %v244_v59 }
 0x13d   :  { %v2003_v60 = vadd.f32 1.0, %v2782_v8  ;;  %v579_v45 = vadd.f32 %v515_v10, %v447_v19  ;;  %v1589_v27 = vmul.f32 %v1525_v26, %v1461_v58  ;;  %v902_v34 = vmul.f32 %v3095_v42, %v111_v47 }
 0x13e   :  { %v710_v63 = vadd.f32 %v646_v52, %v578_v18  ;;  %v1018_v48 = vmul.f32 %v3098_v43, %v375_v1  ;;  %v1652_v21 = vmul.f32 0.044715, %v1588_v56  ;;  %v1198_v13 = vmul.f32 %v3101_v44, %v4128_v55 }
 0x13f   :  { %v2784_v49 = vpop.eup %2783  ;;  %v2067_v32 = vmul.f32 %v2003_v60, %v1875_v62  ;;  %v711_v38 = vadd.f32 %v647_v33, %v579_v45  ;;  %v1653_v11 = vmul.f32 0.044715, %v1589_v27  ;;  %v958_v61 = vadd.f32 %v902_v34, %v842_v54 }
 0x140   :  { %v2002_v14 = vadd.f32 1.0, %v2784_v49  ;;  %v780_v23 = vadd.f32 %v4102_v51, %v710_v63  ;;  %v1716_v30 = vadd.f32 %v1652_v21, %v1460_v15  ;;  %v1199_v47 = vmul.f32 %v3101_v44, %v4144_v5 }
 0x141   :  { %v781_v46 = vadd.f32 %v4102_v51, %v711_v38  ;;  %v1258_v53 = vmul.f32 %v3142_v9, %v4108_v28  ;;  %v1717_v57 = vadd.f32 %v1653_v11, %v1461_v58  ;;  %v1074_v6 = vadd.f32 %v1018_v48, %v958_v61 }
 0x142   :  { %v2066_v59 = vmul.f32 %v2002_v14, %v1874_v40  ;;  %v1259_v62 = vmul.f32 %v3142_v9, %v4110_v16  ;;  %v1780_v1 = vmul.f32 0.7978846, %v1716_v30  ;;  %v1374_v19 = vmul.f32 %v4114_v4, %v4135_v7 }
 0x143   :  { %v1314_v2 = vadd.f32 %v1258_v53, %v1198_v13  ;;  %v1375_v50 = vmul.f32 %v4114_v4, %v4151_v29  ;;  %v1781_v10 = vmul.f32 0.7978846, %v1717_v57  ;;  %v1137_v40 = vadd.f32 %v1074_v6, %v781_v46 }
 0x144   :  { %v2107_v37 = vpack.c.bf16 %v2067_v32, %v2066_v59  ;;  %v1315_v52 = vadd.f32 %v1259_v62, %v1199_v47  ;;  %2785 = vtanh.f32 %v1780_v1  ;;  %v149_v26 = vrot.slane %v4168_v35, 7 }
 0x145   :  { %v1430_v8 = vadd.f32 %v1374_v19, %v1314_v2  ;;  %v150_v18 = vrot.slane %v4170_v22, 7  ;;  %2787 = vtanh.f32 %v1781_v10  ;;  %v280_v60 = vrot.slane %v4168_v35, 1 }
 0x146   :  { %2670 = vmatmul.mubr.bf16.gmra.mrb[12].mxu1 %v2107_v37  ;;  %v1431_v33 = vadd.f32 %v1375_v50, %v1315_v52  ;;  %v281_v56 = vrot.slane %v4170_v22, 1  ;;  %v1844_v45 = vmul.f32 0.5, %v1460_v15  ;;  %v4182_v27 = vsel %vm129_vm0, %v149_v26, 0.0 }
 0x147   :  { %v1492_v54 = vadd.f32 %v1430_v8, %v780_v23  ;;  %v416_v63 = vmul.f32 %v3059_v24, %v4064_v12  ;;  %v1845_v34 = vmul.f32 0.5, %v1461_v58  ;;  %v4190_v49 = vsel %vm260_vm1, %v280_v60, 0.0 }
 0x148   :  { %v4186_v48 = vadd.f32 %v1431_v33, %v1137_v40  ;;  %v417_v32 = vmul.f32 %v3059_v24, %v4182_v27  ;;  %v4196_v15 = vsel %vm129_vm0, %v150_v18, 0.0  ;;  %v484_v38 = vmul.f32 %v3062_v25, %v4043_v36 }
 0x149   :  { %v1556_v21 = vmul.f32 %v1492_v54, %v1492_v54  ;;  %v485_v58 = vmul.f32 %v3062_v25, %v4168_v35  ;;  %v4206_v14 = vsel %vm260_vm1, %v281_v56, 0.0  ;;  %v616_v11 = vmul.f32 %v3087_v39, %v4079_v0 }
 0x14a   :  { %v1557_v13 = vmul.f32 %v4186_v48, %v4186_v48  ;;  %v617_v23 = vmul.f32 %v3087_v39, %v4190_v49  ;;  %v548_v30 = vadd.f32 %v484_v38, %v416_v63  ;;  %v815_v47 = vmul.f32 %v3092_v41, %v4059_v17 }
 0x14b   :  { %v1620_v61 = vmul.f32 %v1556_v21, %v1492_v54  ;;  %v549_v46 = vadd.f32 %v485_v58, %v417_v32  ;;  %v816_v59 = vmul.f32 %v3092_v41, %v4064_v12  ;;  %v875_v57 = vmul.f32 %v3095_v42, %v4038_v31  ;;  %v4234_v32 = vld [vmem:[#allocation2 + $0x198] sm:$0xff] }
 0x14c   :  { %v1621_v53 = vmul.f32 %v1557_v13, %v4186_v48  ;;  %v876_v6 = vmul.f32 %v3095_v42, %v4043_v36  ;;  %v680_v1 = vadd.f32 %v616_v11, %v548_v30  ;;  %v991_v19 = vmul.f32 %v3098_v43, %v4075_v20  ;;  %v4238_v30 = vld [vmem:[#allocation2 + $0x1a0] sm:$0xff] }
 0x14d   :  { %v1684_v62 = vmul.f32 0.044715, %v1620_v61  ;;  %v681_v2 = vadd.f32 %v617_v23, %v549_v46  ;;  %v931_v37 = vadd.f32 %v875_v57, %v815_v47  ;;  %v992_v10 = vmul.f32 %v3098_v43, %v4079_v0 }
 0x14e   :  { %v1685_v50 = vmul.f32 0.044715, %v1621_v53  ;;  %v932_v17 = vadd.f32 %v876_v6, %v816_v59  ;;  %v2786_v40 = vpop.eup %2785  ;;  %v750_v52 = vadd.f32 %v4102_v51, %v680_v1  ;;  %v1172_v36 = vmul.f32 %v3101_v44, %v4182_v27 }
 0x14f   :  { %v1748_v12 = vadd.f32 %v1684_v62, %v1492_v54  ;;  %v751_v31 = vadd.f32 %v4102_v51, %v681_v2  ;;  %v2788_v8 = vpop.eup %2787  ;;  %v1972_v26 = vadd.f32 1.0, %v2786_v40  ;;  %v1047_v20 = vadd.f32 %v991_v19, %v931_v37 }
 0x150   :  { %v1749_v18 = vadd.f32 %v1685_v50, %v4186_v48  ;;  %v1048_v33 = vadd.f32 %v992_v10, %v932_v17  ;;  %v1973_v60 = vadd.f32 1.0, %v2788_v8  ;;  %v1173_v0 = vmul.f32 %v3101_v44, %v4196_v15 }
 0x151   :  { %v1812_v56 = vmul.f32 0.7978846, %v1748_v12  ;;  %v1232_v63 = vmul.f32 %v3142_v9, %v4168_v35  ;;  %v2036_v21 = vmul.f32 %v1972_v26, %v1844_v45  ;;  %v1876_v58 = vmul.f32 0.5, %v1492_v54 }
 0x152   :  { %v1813_v38 = vmul.f32 0.7978846, %v1749_v18  ;;  %v1106_v13 = vadd.f32 %v1047_v20, %v750_v52  ;;  %v2037_v11 = vmul.f32 %v1973_v60, %v1845_v34  ;;  %v1233_v23 = vmul.f32 %v3142_v9, %v4170_v22 }
 0x153   :  { %2789 = vtanh.f32 %v1812_v56  ;;  %v1288_v61 = vadd.f32 %v1232_v63, %v1172_v36  ;;  %v1348_v46 = vmul.f32 %v4114_v4, %v4190_v49  ;;  %v1349_v47 = vmul.f32 %v4114_v4, %v4206_v14 }
 0x154   :  { %2791 = vtanh.f32 %v1813_v38  ;;  %v181_v45 = vrot.slane %v4234_v32, 7  ;;  %v2092_v53 = vpack.c.bf16 %v2037_v11, %v2036_v21  ;;  %v1107_v54 = vadd.f32 %v1048_v33, %v751_v31 }
 0x155   :  { %v1289_v59 = vadd.f32 %v1233_v23, %v1173_v0  ;;  %v312_v34 = vrot.slane %v4234_v32, 1  ;;  %v1404_v57 = vadd.f32 %v1348_v46, %v1288_v61  ;;  %v182_v6 = vrot.slane %v4238_v30, 7 }
 0x156   :  { %v4249_v62 = vsel %vm129_vm0, %v181_v45, 0.0  ;;  %v448_v1 = vmul.f32 %v3059_v24, %v4144_v5  ;;  %2641 = vmatprep.mubr.bf16.mxu0 %v2092_v53  ;;  %v313_v19 = vrot.slane %v4238_v30, 1  ;;  %v1877_v17 = vmul.f32 0.5, %v4186_v48 }
 0x157   :  { %v1405_v2 = vadd.f32 %v1349_v47, %v1289_v59  ;;  %v4256_v50 = vsel %vm260_vm1, %v312_v34, 0.0  ;;  %v449_v37 = vmul.f32 %v3059_v24, %v4249_v62  ;;  %v1462_v10 = vadd.f32 %v1404_v57, %v1106_v13 }
 0x158   :  { %v516_v40 = vmul.f32 %v3062_v25, %v4110_v16  ;;  %v517_v12 = vmul.f32 %v3062_v25, %v4234_v32  ;;  %v648_v31 = vmul.f32 %v3087_v39, %v4151_v29  ;;  %v649_v36 = vmul.f32 %v3087_v39, %v4256_v50 }
 0x159   :  { %v1463_v52 = vadd.f32 %v1405_v2, %v1107_v54  ;;  %v843_v8 = vmul.f32 %v3092_v41, %v4128_v55  ;;  %v1526_v26 = vmul.f32 %v1462_v10, %v1462_v10  ;;  %v4273_v48 = vsel %vm129_vm0, %v182_v6, 0.0 }
 0x15a   :  { %v580_v18 = vadd.f32 %v516_v40, %v448_v1  ;;  %v581_v20 = vadd.f32 %v517_v12, %v449_v37  ;;  %v4277_v60 = vsel %vm260_vm1, %v313_v19, 0.0  ;;  %v844_v56 = vmul.f32 %v3092_v41, %v4144_v5  ;;  %v4295_v40 = vld [vmem:[#allocation2 + $0xa8] sm:$0xff] }
 0x15b   :  { %v1527_v33 = vmul.f32 %v1463_v52, %v1463_v52  ;;  %v903_v0 = vmul.f32 %v3095_v42, %v4108_v28  ;;  %v1590_v63 = vmul.f32 %v1526_v26, %v1462_v10  ;;  %v904_v38 = vmul.f32 %v3095_v42, %v4110_v16 }
 0x15c   :  { %v712_v55 = vadd.f32 %v648_v31, %v580_v18  ;;  %v713_v21 = vadd.f32 %v649_v36, %v581_v20  ;;  %v1019_v61 = vmul.f32 %v3098_v43, %v4135_v7  ;;  %v1020_v46 = vmul.f32 %v3098_v43, %v4151_v29 }
 0x15d   :  { %v2790_v13 = vpop.eup %2789  ;;  %v1591_v11 = vmul.f32 %v1527_v33, %v1463_v52  ;;  %v959_v23 = vadd.f32 %v903_v0, %v843_v8  ;;  %v1654_v45 = vmul.f32 0.044715, %v1590_v63  ;;  %v960_v34 = vadd.f32 %v904_v38, %v844_v56  ;;  %v4303_v8 = vld [vmem:[#allocation2 + $0xb0] sm:$0xff] }
 0x15e   :  { %v2792_v47 = vpop.eup %2791  ;;  %v2004_v5 = vadd.f32 1.0, %v2790_v13  ;;  %v782_v28 = vadd.f32 %v4102_v51, %v712_v55  ;;  %v783_v53 = vadd.f32 %v4102_v51, %v713_v21  ;;  %v1200_v1 = vmul.f32 %v3101_v44, %v4249_v62 }
 0x15f   :  { %v2005_v54 = vadd.f32 1.0, %v2792_v47  ;;  %v1655_v59 = vmul.f32 0.044715, %v1591_v11  ;;  %v1075_v16 = vadd.f32 %v1019_v61, %v959_v23  ;;  %v1718_v6 = vadd.f32 %v1654_v45, %v1462_v10 }
 0x160   :  { %v2068_v57 = vmul.f32 %v2004_v5, %v1876_v58  ;;  %v1201_v7 = vmul.f32 %v3101_v44, %v4273_v48  ;;  %v1076_v19 = vadd.f32 %v1020_v46, %v960_v34  ;;  %v1260_v31 = vmul.f32 %v3142_v9, %v4234_v32 }
 0x161   :  { %v2069_v29 = vmul.f32 %v2005_v54, %v1877_v17  ;;  %v1719_v2 = vadd.f32 %v1655_v59, %v1463_v52  ;;  %v1138_v37 = vadd.f32 %v1075_v16, %v782_v28  ;;  %v1782_v12 = vmul.f32 0.7978846, %v1718_v6 }
 0x162   :  { %v1261_v58 = vmul.f32 %v3142_v9, %v4238_v30  ;;  %v1376_v36 = vmul.f32 %v4114_v4, %v4256_v50  ;;  %v1139_v17 = vadd.f32 %v1076_v19, %v783_v53  ;;  %v1377_v20 = vmul.f32 %v4114_v4, %v4277_v60 }
 0x163   :  { %v2108_v26 = vpack.c.bf16 %v2069_v29, %v2068_v57  ;;  %v1783_v18 = vmul.f32 0.7978846, %v1719_v2  ;;  %2793 = vtanh.f32 %v1782_v12  ;;  %v1316_v33 = vadd.f32 %v1260_v31, %v1200_v1 }
 0x164   :  { %v1317_v56 = vadd.f32 %v1261_v58, %v1201_v7  ;;  %v151_v0 = vrot.slane %v4295_v40, 7  ;;  %v1846_v63 = vmul.f32 0.5, %v1462_v10  ;;  %v152_v55 = vrot.slane %v4303_v8, 7 }
 0x165   :  { %2673 = vmatprep.mubr.bf16.mxu1 %v2108_v26  ;;  %2795 = vtanh.f32 %v1783_v18  ;;  %v282_v21 = vrot.slane %v4295_v40, 1  ;;  %v1432_v38 = vadd.f32 %v1376_v36, %v1316_v33  ;;  %v283_v23 = vrot.slane %v4303_v8, 1 }
 0x166   :  { %v1433_v13 = vadd.f32 %v1377_v20, %v1317_v56  ;;  %v4312_v11 = vsel %vm129_vm0, %v151_v0, 0.0  ;;  %v1847_v61 = vmul.f32 0.5, %v1463_v52  ;;  %v418_v10 = vmul.f32 %v3059_v24, %v4196_v15 }
 0x167   :  { %v4317_v46 = vsel %vm260_vm1, %v282_v21, 0.0  ;;  %v419_v47 = vmul.f32 %v3059_v24, %v4312_v11  ;;  %v1494_v5 = vadd.f32 %v1432_v38, %v1138_v37  ;;  %v486_v28 = vmul.f32 %v3062_v25, %v4170_v22 }
 0x168   :  { %v4323_v45 = vadd.f32 %v1433_v13, %v1139_v17  ;;  %v487_v53 = vmul.f32 %v3062_v25, %v4295_v40  ;;  %v618_v52 = vmul.f32 %v3087_v39, %v4206_v14  ;;  %v619_v54 = vmul.f32 %v3087_v39, %v4317_v46 }
 0x169   :  { %v817_v59 = vmul.f32 %v3092_v41, %v4182_v27  ;;  %v818_v34 = vmul.f32 %v3092_v41, %v4196_v15  ;;  %v1558_v16 = vmul.f32 %v1494_v5, %v1494_v5  ;;  %v4341_v6 = vsel %vm129_vm0, %v152_v55, 0.0 }
 0x16a   :  { %v1559_v57 = vmul.f32 %v4323_v45, %v4323_v45  ;;  %v4345_v1 = vsel %vm260_vm1, %v283_v23, 0.0  ;;  %v550_v7 = vadd.f32 %v486_v28, %v418_v10  ;;  %v551_v29 = vadd.f32 %v487_v53, %v419_v47  ;;  %v4367_v53 = vld [vmem:[#allocation2 + $0x1a8] sm:$0xff] }
 0x16b   :  { %v877_v27 = vmul.f32 %v3095_v42, %v4168_v35  ;;  %v878_v15 = vmul.f32 %v3095_v42, %v4170_v22  ;;  %v1622_v2 = vmul.f32 %v1558_v16, %v1494_v5  ;;  %v993_v37 = vmul.f32 %v3098_v43, %v4190_v49 }
 0x16c   :  { %v1623_v19 = vmul.f32 %v1559_v57, %v4323_v45  ;;  %v994_v12 = vmul.f32 %v3098_v43, %v4206_v14  ;;  %v682_v31 = vadd.f32 %v618_v52, %v550_v7  ;;  %v683_v58 = vadd.f32 %v619_v54, %v551_v29  ;;  %v4369_v52 = vld [vmem:[#allocation2 + $0x1b0] sm:$0xff] }
 0x16d   :  { %v933_v36 = vadd.f32 %v877_v27, %v817_v59  ;;  %v934_v26 = vadd.f32 %v878_v15, %v818_v34  ;;  %v2794_v18 = vpop.eup %2793  ;;  %v1686_v17 = vmul.f32 0.044715, %v1622_v2  ;;  %v1174_v35 = vmul.f32 %v3101_v44, %v4312_v11 }
 0x16e   :  { %v1687_v20 = vmul.f32 0.044715, %v1623_v19  ;;  %v1175_v22 = vmul.f32 %v3101_v44, %v4341_v6  ;;  %v1974_v56 = vadd.f32 1.0, %v2794_v18  ;;  %v752_v49 = vadd.f32 %v4102_v51, %v682_v31 }
 0x16f   :  { %v2796_v33 = vpop.eup %2795  ;;  %v753_v0 = vadd.f32 %v4102_v51, %v683_v58  ;;  %v1049_v14 = vadd.f32 %v993_v37, %v933_v36  ;;  %v1750_v21 = vadd.f32 %v1686_v17, %v1494_v5  ;;  %v1050_v13 = vadd.f32 %v994_v12, %v934_v26 }
 0x170   :  { %v1975_v55 = vadd.f32 1.0, %v2796_v33  ;;  %v1751_v38 = vadd.f32 %v1687_v20, %v4323_v45  ;;  %v2038_v23 = vmul.f32 %v1974_v56, %v1846_v63  ;;  %v1234_v47 = vmul.f32 %v3142_v9, %v4295_v40 }
 0x171   :  { %v1108_v10 = vadd.f32 %v1049_v14, %v752_v49  ;;  %v1235_v28 = vmul.f32 %v3142_v9, %v4303_v8  ;;  %v1814_v59 = vmul.f32 0.7978846, %v1750_v21  ;;  %v1109_v16 = vadd.f32 %v1050_v13, %v753_v0 }
 0x172   :  { %v2039_v54 = vmul.f32 %v1975_v55, %v1847_v61  ;;  %v1815_v34 = vmul.f32 0.7978846, %v1751_v38  ;;  %v1290_v57 = vadd.f32 %v1234_v47, %v1174_v35  ;;  %v1350_v63 = vmul.f32 %v4114_v4, %v4317_v46 }
 0x173   :  { %v1291_v7 = vadd.f32 %v1235_v28, %v1175_v22  ;;  %v1351_v29 = vmul.f32 %v4114_v4, %v4345_v1  ;;  %2797 = vtanh.f32 %v1814_v59  ;;  %v183_v15 = vrot.slane %v4367_v53, 7 }
 0x174   :  { %v2093_v27 = vpack.c.bf16 %v2039_v54, %v2038_v23  ;;  %v184_v2 = vrot.slane %v4369_v52, 7  ;;  %2799 = vtanh.f32 %v1815_v34  ;;  %v1406_v19 = vadd.f32 %v1350_v63, %v1290_v57 }
 0x175   :  { %v1407_v61 = vadd.f32 %v1351_v29, %v1291_v7  ;;  %v314_v37 = vrot.slane %v4367_v53, 1  ;;  %v1878_v12 = vmul.f32 0.5, %v1494_v5  ;;  %v4380_v31 = vsel %vm129_vm0, %v183_v15, 0.0 }
 0x176   :  { %2642 = vmatmul.mubr.bf16.gmra.mrb[16].mxu0 %v2093_v27  ;;  %v315_v58 = vrot.slane %v4369_v52, 1  ;;  %v450_v36 = vmul.f32 %v3059_v24, %v4273_v48  ;;  %v4385_v26 = vadd.f32 %v1406_v19, %v1108_v10  ;;  %v451_v5 = vmul.f32 %v3059_v24, %v4380_v31 }
 0x177   :  { %v4387_v18 = vadd.f32 %v1407_v61, %v1109_v16  ;;  %v4391_v17 = vsel %vm260_vm1, %v314_v37, 0.0  ;;  %v1879_v20 = vmul.f32 0.5, %v4323_v45  ;;  %v518_v35 = vmul.f32 %v3062_v25, %v4238_v30 }
 0x178   :  { %v519_v22 = vmul.f32 %v3062_v25, %v4367_v53  ;;  %v650_v33 = vmul.f32 %v3087_v39, %v4277_v60  ;;  %v1528_v56 = vmul.f32 %v4385_v26, %v4385_v26  ;;  %v4408_v0 = vsel %vm129_vm0, %v184_v2, 0.0 }
 0x179   :  { %v1529_v49 = vmul.f32 %v4387_v18, %v4387_v18  ;;  %v4412_v45 = vsel %vm260_vm1, %v315_v58, 0.0  ;;  %v582_v14 = vadd.f32 %v518_v35, %v450_v36  ;;  %v651_v21 = vmul.f32 %v3087_v39, %v4391_v17  ;;  %v86_v36 = vld [vmem:[#allocation2 + $0xb8] sm:$0xff] }
 0x17a   :  { %v583_v55 = vadd.f32 %v519_v22, %v451_v5  ;;  %v845_v38 = vmul.f32 %v3092_v41, %v4249_v62  ;;  %v1592_v13 = vmul.f32 %v1528_v56, %v4385_v26  ;;  %v846_v10 = vmul.f32 %v3092_v41, %v4273_v48 }
 0x17b   :  { %v1593_v23 = vmul.f32 %v1529_v49, %v4387_v18  ;;  %v905_v47 = vmul.f32 %v3095_v42, %v4234_v32  ;;  %v714_v28 = vadd.f32 %v650_v33, %v582_v14  ;;  %v906_v59 = vmul.f32 %v3095_v42, %v4238_v30 }
 0x17c   :  { %v715_v54 = vadd.f32 %v651_v21, %v583_v55  ;;  %v1021_v34 = vmul.f32 %v3098_v43, %v4256_v50  ;;  %v1656_v16 = vmul.f32 0.044715, %v1592_v13  ;;  %v1022_v7 = vmul.f32 %v3098_v43, %v4277_v60 }
 0x17d   :  { %v1657_v62 = vmul.f32 0.044715, %v1593_v23  ;;  %v961_v57 = vadd.f32 %v905_v47, %v845_v38  ;;  %v2798_v63 = vpop.eup %2797  ;;  %v784_v48 = vadd.f32 %v4102_v51, %v714_v28  ;;  %v962_v32 = vadd.f32 %v906_v59, %v846_v10 }
 0x17e   :  { %v785_v29 = vadd.f32 %v4102_v51, %v715_v54  ;;  %v1202_v27 = vmul.f32 %v3101_v44, %v4380_v31  ;;  %v2800_v15 = vpop.eup %2799  ;;  %v2006_v30 = vadd.f32 1.0, %v2798_v63  ;;  %v1720_v2 = vadd.f32 %v1656_v16, %v4385_v26 }
 0x17f   :  { %v1721_v50 = vadd.f32 %v1657_v62, %v4387_v18  ;;  %v1077_v19 = vadd.f32 %v1021_v34, %v961_v57  ;;  %v2007_v61 = vadd.f32 1.0, %v2800_v15  ;;  %v1078_v37 = vadd.f32 %v1022_v7, %v962_v32 }
 0x180   :  { %v1203_v60 = vmul.f32 %v3101_v44, %v4408_v0  ;;  %v1262_v58 = vmul.f32 %v3142_v9, %v4367_v53  ;;  %v2070_v5 = vmul.f32 %v2006_v30, %v1878_v12  ;;  %v1784_v35 = vmul.f32 0.7978846, %v1720_v2 }
 0x181   :  { %v1785_v22 = vmul.f32 0.7978846, %v1721_v50  ;;  %v1140_v33 = vadd.f32 %v1077_v19, %v784_v48  ;;  %v2071_v56 = vmul.f32 %v2007_v61, %v1879_v20  ;;  %v1141_v49 = vadd.f32 %v1078_v37, %v785_v29 }
 0x182   :  { %v1263_v14 = vmul.f32 %v3142_v9, %v4369_v52  ;;  %v1318_v55 = vadd.f32 %v1262_v58, %v1202_v27  ;;  %2801 = vtanh.f32 %v1784_v35  ;;  %v1378_v21 = vmul.f32 %v4114_v4, %v4391_v17 }
 0x183   :  { %v1379_v38 = vmul.f32 %v4114_v4, %v4412_v45  ;;  %v153_v13 = vrot.slane %v86_v36, 7  ;;  %v2109_v23 = vpack.c.bf16 %v2071_v56, %v2070_v5  ;;  %2803 = vtanh.f32 %v1785_v22 }
 0x184   :  { %v1319_v12 = vadd.f32 %v1263_v14, %v1203_v60  ;;  %v284_v10 = vrot.slane %v86_v36, 1  ;;  %v1434_v47 = vadd.f32 %v1378_v21, %v1318_v55  ;;  %v420_v28 = vmul.f32 %v3059_v24, %v4341_v6  ;;  %v118_v55 = vld [vmem:[#allocation2 + $0x1b8] sm:$0xff] }
 0x185   :  { %v219_v20 = vsel %vm129_vm0, %v153_v13, 0.0  ;;  %v488_v54 = vmul.f32 %v3062_v25, %v4303_v8  ;;  %2674 = vmatmul.mubr.bf16.gmra.mrb[16].mxu1 %v2109_v23  ;;  %v489_v62 = vmul.f32 %v3062_v25, %v86_v36  ;;  %v620_v63 = vmul.f32 %v3087_v39, %v4345_v1 }
 0x186   :  { %v1435_v59 = vadd.f32 %v1379_v38, %v1319_v12  ;;  %v350_v34 = vsel %vm260_vm1, %v284_v10, 0.0  ;;  %v421_v16 = vmul.f32 %v3059_v24, %v219_v20  ;;  %v1496_v57 = vadd.f32 %v1434_v47, %v1140_v33 }
 0x187   :  { %v552_v7 = vadd.f32 %v488_v54, %v420_v28  ;;  %v621_v48 = vmul.f32 %v3087_v39, %v350_v34  ;;  %v819_v27 = vmul.f32 %v3092_v41, %v4312_v11  ;;  %v820_v15 = vmul.f32 %v3092_v41, %v4341_v6 }
 0x188   :  { %v1497_v29 = vadd.f32 %v1435_v59, %v1141_v49  ;;  %v553_v32 = vadd.f32 %v489_v62, %v421_v16  ;;  %v1848_v30 = vmul.f32 0.5, %v4385_v26  ;;  %v1560_v2 = vmul.f32 %v1496_v57, %v1496_v57 }
 0x189   :  { %v684_v50 = vadd.f32 %v620_v63, %v552_v7  ;;  %v879_v19 = vmul.f32 %v3095_v42, %v4295_v40  ;;  %v1849_v61 = vmul.f32 0.5, %v4387_v18  ;;  %v880_v58 = vmul.f32 %v3095_v42, %v4303_v8 }
 0x18a   :  { %v1561_v37 = vmul.f32 %v1497_v29, %v1497_v29  ;;  %v685_v60 = vadd.f32 %v621_v48, %v553_v32  ;;  %v1624_v5 = vmul.f32 %v1560_v2, %v1496_v57  ;;  %v995_v6 = vmul.f32 %v3098_v43, %v4317_v46 }
 0x18b   :  { %v754_v11 = vadd.f32 %v4102_v51, %v684_v50  ;;  %v935_v35 = vadd.f32 %v879_v19, %v819_v27  ;;  %v936_v33 = vadd.f32 %v880_v58, %v820_v15  ;;  %v996_v40 = vmul.f32 %v3098_v43, %v4345_v1 }
 0x18c   :  { %v1625_v26 = vmul.f32 %v1561_v37, %v1497_v29  ;;  %v755_v22 = vadd.f32 %v4102_v51, %v685_v60  ;;  %v2802_v18 = vpop.eup %2801  ;;  %v1688_v56 = vmul.f32 0.044715, %v1624_v5  ;;  %v1176_v14 = vmul.f32 %v3101_v44, %v219_v20 }
 0x18d   :  { %v1051_v49 = vadd.f32 %v995_v6, %v935_v35  ;;  %v1236_v8 = vmul.f32 %v3142_v9, %v86_v36  ;;  %v2804_v21 = vpop.eup %2803  ;;  %v1976_v38 = vadd.f32 1.0, %v2802_v18  ;;  %v1052_v23 = vadd.f32 %v996_v40, %v936_v33 }
 0x18e   :  { %v1689_v13 = vmul.f32 0.044715, %v1625_v26  ;;  %v1352_v46 = vmul.f32 %v4114_v4, %v350_v34  ;;  %v1977_v12 = vadd.f32 1.0, %v2804_v21  ;;  %v1752_v10 = vadd.f32 %v1688_v56, %v1496_v57 }
 0x18f   :  { %v1110_v47 = vadd.f32 %v1051_v49, %v754_v11  ;;  %v1292_v28 = vadd.f32 %v1236_v8, %v1176_v14  ;;  %v2040_v54 = vmul.f32 %v1976_v38, %v1848_v30  ;;  %v4478_v59 = vadd.f32 %v1052_v23, %v755_v22  ;;  %v87_v23 = vld [vmem:[#allocation2 + $0xc0] sm:$0xff] }
 0x190   :  { %v1753_v1 = vadd.f32 %v1689_v13, %v1497_v29  ;;  %v185_v16 = vrot.slane %v118_v55, 7  ;;  %v2041_v62 = vmul.f32 %v1977_v12, %v1849_v61  ;;  %v1816_v20 = vmul.f32 0.7978846, %v1752_v10  ;;  %v4515_v10 = vld [vmem:[#allocation2 + $0xd0] sm:$0xff] }
 0x191   :  { %v1408_v7 = vadd.f32 %v1352_v46, %v1292_v28  ;;  %v316_v36 = vrot.slane %v118_v55, 1  ;;  %v1880_v48 = vmul.f32 0.5, %v1496_v57  ;;  %v1531_v32 = vmul.f32 %v4478_v59, %v4478_v59  ;;  %v4510_v46 = vld [vmem:[#allocation2 + $0xc8] sm:$0xff] }
 0x192   :  { %v1817_v63 = vmul.f32 0.7978846, %v1753_v1  ;;  %v251_v34 = vsel %vm129_vm0, %v185_v16, 0.0  ;;  %v2094_v27 = vpack.c.bf16 %v2041_v62, %v2040_v54  ;;  %2805 = vtanh.f32 %v1816_v20 }
 0x193   :  { %v1466_v15 = vadd.f32 %v1408_v7, %v1110_v47  ;;  %v382_v30 = vsel %vm260_vm1, %v316_v36, 0.0  ;;  %v1595_v2 = vmul.f32 %v1531_v32, %v4478_v59  ;;  %v452_v50 = vmul.f32 %v3059_v24, %v4408_v0 }
 0x194   :  { %2807 = vtanh.f32 %v1817_v63  ;;  %v453_v57 = vmul.f32 %v3059_v24, %v251_v34  ;;  %2645 = vmatprep.mubr.bf16.mxu0 %v2094_v27  ;;  %v1881_v19 = vmul.f32 0.5, %v1497_v29  ;;  %v520_v37 = vmul.f32 %v3062_v25, %v4369_v52 }
 0x195   :  { %v1530_v61 = vmul.f32 %v1466_v15, %v1466_v15  ;;  %v521_v60 = vmul.f32 %v3062_v25, %v118_v55  ;;  %v1659_v58 = vmul.f32 0.044715, %v1595_v2  ;;  %v652_v5 = vmul.f32 %v3087_v39, %v4412_v45 }
 0x196   :  { %v653_v11 = vmul.f32 %v3087_v39, %v382_v30  ;;  %v847_v35 = vmul.f32 %v3092_v41, %v4380_v31  ;;  %v584_v26 = vadd.f32 %v520_v37, %v452_v50  ;;  %v848_v29 = vmul.f32 %v3092_v41, %v4408_v0 }
 0x197   :  { %v1594_v6 = vmul.f32 %v1530_v61, %v1466_v15  ;;  %v585_v22 = vadd.f32 %v521_v60, %v453_v57  ;;  %v1723_v33 = vadd.f32 %v1659_v58, %v4478_v59  ;;  %v907_v40 = vmul.f32 %v3095_v42, %v4367_v53 }
 0x198   :  { %v908_v18 = vmul.f32 %v3095_v42, %v4369_v52  ;;  %v1023_v56 = vmul.f32 %v3098_v43, %v4391_v17  ;;  %v716_v14 = vadd.f32 %v652_v5, %v584_v26  ;;  %v1024_v8 = vmul.f32 %v3098_v43, %v4412_v45 }
 0x199   :  { %v1658_v49 = vmul.f32 0.044715, %v1594_v6  ;;  %v717_v31 = vadd.f32 %v653_v11, %v585_v22  ;;  %v1787_v21 = vmul.f32 0.7978846, %v1723_v33  ;;  %v963_v38 = vadd.f32 %v907_v40, %v847_v35 }
 0x19a   :  { %v964_v0 = vadd.f32 %v908_v18, %v848_v29  ;;  %v1204_v13 = vmul.f32 %v3101_v44, %v251_v34  ;;  %v786_v52 = vadd.f32 %v4102_v51, %v716_v14  ;;  %v1264_v17 = vmul.f32 %v3142_v9, %v118_v55 }
 0x19b   :  { %v1722_v53 = vadd.f32 %v1658_v49, %v1466_v15  ;;  %v787_v12 = vadd.f32 %v4102_v51, %v717_v31  ;;  %2809 = vtanh.f32 %v1787_v21  ;;  %v1079_v47 = vadd.f32 %v1023_v56, %v963_v38 }
 0x19c   :  { %v1080_v45 = vadd.f32 %v1024_v8, %v964_v0  ;;  %v1380_v28 = vmul.f32 %v4114_v4, %v382_v30  ;;  %v2806_v54 = vpop.eup %2805  ;;  %v1320_v16 = vadd.f32 %v1264_v17, %v1204_v13  ;;  %v154_v62 = vrot.slane %v87_v23, 7 }
 0x19d   :  { %v1786_v1 = vmul.f32 0.7978846, %v1722_v53  ;;  %v155_v20 = vrot.slane %v4510_v46, 7  ;;  %v2008_v36 = vadd.f32 1.0, %v2806_v54  ;;  %v1142_v63 = vadd.f32 %v1079_v47, %v786_v52 }
 0x19e   :  { %v2808_v7 = vpop.eup %2807  ;;  %v4519_v32 = vadd.f32 %v1080_v45, %v787_v12  ;;  %v156_v51 = vrot.slane %v4515_v10, 7  ;;  %v1851_v34 = vmul.f32 0.5, %v4478_v59  ;;  %v1436_v27 = vadd.f32 %v1380_v28, %v1320_v16 }
 0x19f   :  { %v2009_v55 = vadd.f32 1.0, %v2808_v7  ;;  %2811 = vtanh.f32 %v1786_v1  ;;  %v2072_v2 = vmul.f32 %v2008_v36, %v1880_v48  ;;  %v1850_v4 = vmul.f32 0.5, %v1466_v15  ;;  %v119_v7 = vld [vmem:[#allocation2 + $0x1c0] sm:$0xff] }
 0x1a0   :  { %v1563_v30 = vmul.f32 %v4519_v32, %v4519_v32  ;;  %v220_v50 = vsel %vm129_vm0, %v154_v62, 0.0  ;;  %v4527_v61 = vadd.f32 %v1436_v27, %v1142_v63  ;;  %v4531_v37 = vsel %vm129_vm0, %v155_v20, 0.0  ;;  %v4574_v63 = vld [vmem:[%s5215_s2] ss:$0 sm:$0xff]  ;;  %v4580_v27 = vld [vmem:[#allocation2 + $0x1c8] sm:$0xff] }
 0x1a1   :  { %v2073_v57 = vmul.f32 %v2009_v55, %v1881_v19  ;;  %v285_v60 = vrot.slane %v87_v23, 1  ;;  %v4536_v48 = vsel %vm129_vm0, %v156_v51, 0.0  ;;  %v286_v15 = vrot.slane %v4510_v46, 1 }
 0x1a2   :  { %v1627_v59 = vmul.f32 %v1563_v30, %v4519_v32  ;;  %v287_v58 = vrot.slane %v4515_v10, 1  ;;  %v1562_v19 = vmul.f32 %v4527_v61, %v4527_v61  ;;  %v422_v35 = vmul.f32 %v3059_v24, %v220_v50 }
 0x1a3   :  { %v2110_v5 = vpack.c.bf16 %v2073_v57, %v2072_v2  ;;  %v351_v11 = vsel %vm260_vm1, %v285_v60, 0.0  ;;  %v4547_v26 = vsel %vm260_vm1, %v286_v15, 0.0  ;;  %v423_v29 = vmul.f32 %v3059_v24, %v4531_v37  ;;  %v4582_v2 = vld [vmem:[#allocation2 + $0x1d0] sm:$0xff]  ;;  %v4586_v57 = vld [vmem:[#allocation5 + $0x8] ss:$0 sm:$0xff] }
 0x1a4   :  { %v1691_v6 = vmul.f32 0.044715, %v1627_v59  ;;  %v4551_v22 = vsel %vm260_vm1, %v287_v58, 0.0  ;;  %v1626_v33 = vmul.f32 %v1562_v19, %v4527_v61  ;;  %v490_v40 = vmul.f32 %v3062_v25, %v87_v23 }
 0x1a5   :  { %2677 = vmatprep.mubr.bf16.mxu1 %v2110_v5  ;;  %v491_v18 = vmul.f32 %v3062_v25, %v4510_v46  ;;  %v622_v56 = vmul.f32 %v3087_v39, %v351_v11  ;;  %v2810_v49 = vpop.eup %2809  ;;  %v623_v31 = vmul.f32 %v3087_v39, %v4547_v26  ;;  %v821_v8 = vmul.f32 %v3092_v41, %v220_v50 }
 0x1a6   :  { %v1755_v14 = vadd.f32 %v1691_v6, %v4519_v32  ;;  %v881_v21 = vmul.f32 %v3095_v42, %v87_v23  ;;  %v1979_v38 = vadd.f32 1.0, %v2810_v49  ;;  %v1690_v0 = vmul.f32 0.044715, %v1626_v33 }
 0x1a7   :  { %v554_v13 = vadd.f32 %v490_v40, %v422_v35  ;;  %v555_v53 = vadd.f32 %v491_v18, %v423_v29  ;;  %v997_v17 = vmul.f32 %v3098_v43, %v351_v11  ;;  %v1177_v47 = vmul.f32 %v3101_v44, %v4531_v37 }
 0x1a8   :  { %v1819_v52 = vmul.f32 0.7978846, %v1755_v14  ;;  %v937_v12 = vadd.f32 %v881_v21, %v821_v8  ;;  %v2043_v28 = vmul.f32 %v1979_v38, %v1851_v34  ;;  %v1754_v54 = vadd.f32 %v1690_v0, %v4527_v61 }
 0x1a9   :  { %v2812_v45 = vpop.eup %2811  ;;  %v686_v1 = vadd.f32 %v622_v56, %v554_v13  ;;  %v687_v16 = vadd.f32 %v623_v31, %v555_v53  ;;  %v1178_v20 = vmul.f32 %v3101_v44, %v4536_v48  ;;  %v1237_v34 = vmul.f32 %v3142_v9, %v4510_v46 }
 0x1aa   :  { %v1978_v62 = vadd.f32 1.0, %v2812_v45  ;;  %2813 = vtanh.f32 %v1819_v52  ;;  %v1053_v23 = vadd.f32 %v997_v17, %v937_v12  ;;  %v1818_v36 = vmul.f32 0.7978846, %v1754_v54 }
 0x1ab   :  { %v756_v51 = vadd.f32 %v4574_v63, %v686_v1  ;;  %v757_v55 = vadd.f32 %v4574_v63, %v687_v16  ;;  %v1238_v50 = vmul.f32 %v3142_v9, %v4515_v10  ;;  %v1353_v60 = vmul.f32 %v4586_v57, %v4547_v26 }
 0x1ac   :  { %v2042_v30 = vmul.f32 %v1978_v62, %v1850_v4  ;;  %v1354_v59 = vmul.f32 %v4586_v57, %v4551_v22  ;;  %2815 = vtanh.f32 %v1818_v36  ;;  %v1293_v58 = vadd.f32 %v1237_v34, %v1177_v47 }
 0x1ad   :  { %v1113_v15 = vadd.f32 %v1053_v23, %v757_v55  ;;  %v186_v5 = vrot.slane %v119_v7, 7  ;;  %v1294_v11 = vadd.f32 %v1238_v50, %v1178_v20  ;;  %v187_v35 = vrot.slane %v4580_v27, 7  ;;  %v4642_v50 = vpop.f32.mrb[0].mxu1 }
 0x1ae   :  { %v2095_v19 = vpack.c.bf16 %v2043_v28, %v2042_v30  ;;  %v188_v4 = vrot.slane %v4582_v2, 7  ;;  %v1409_v6 = vadd.f32 %v1353_v60, %v1293_v58  ;;  %v317_v33 = vrot.slane %v119_v7, 1  ;;  %v4640_v30 = vpop.f32.mrb[0].mxu0 }
 0x1af   :  { %v252_v29 = vsel %vm129_vm0, %v186_v5, 0.0  ;;  %v318_v40 = vrot.slane %v4580_v27, 1  ;;  %v1883_v18 = vmul.f32 0.5, %v4519_v32  ;;  %v1410_v56 = vadd.f32 %v1354_v59, %v1294_v11  ;;  %v4648_v11 = vpop.f32.mrb[1].mxu1 }
 0x1b0   :  { %2646 = vmatmul.mubr.bf16.gmra.mrb[20].mxu0 %v2095_v19  ;;  %v4600_v49 = vsel %vm129_vm0, %v187_v35, 0.0  ;;  %v319_v14 = vrot.slane %v4582_v2, 1  ;;  %v4603_v31 = vadd.f32 %v1409_v6, %v756_v51  ;;  %v383_v8 = vsel %vm260_vm1, %v317_v33, 0.0  ;;  %v4646_v19 = vpop.f32.mrb[1].mxu0  ;;  %v4653_v33 = vpop.f32.mrb[2].mxu1 }
 0x1b1   :  { %v4609_v21 = vsel %vm260_vm1, %v318_v40, 0.0  ;;  %v454_v38 = vmul.f32 %v3059_v24, %v252_v29  ;;  %v1882_v32 = vmul.f32 0.5, %v4527_v61  ;;  %v4613_v0 = vadd.f32 %v1410_v56, %v1113_v15 }
 0x1b2   :  { %v455_v13 = vmul.f32 %v3059_v24, %v4600_v49  ;;  %v522_v53 = vmul.f32 %v3062_v25, %v119_v7  ;;  %v1532_v52 = vmul.f32 %v4603_v31, %v4603_v31  ;;  %v4622_v12 = vsel %vm129_vm0, %v188_v4, 0.0 }
 0x1b3   :  { %v523_v17 = vmul.f32 %v3062_v25, %v4580_v27  ;;  %v654_v47 = vmul.f32 %v3087_v39, %v383_v8  ;;  %v1533_v45 = vmul.f32 %v4613_v0, %v4613_v0  ;;  %v4631_v28 = vsel %vm260_vm1, %v319_v14, 0.0 }
 0x1b4   :  { %v2814_v61 = vpop.eup %2813  ;;  %v586_v54 = vadd.f32 %v522_v53, %v454_v38  ;;  %v655_v1 = vmul.f32 %v3087_v39, %v4609_v21  ;;  %v1596_v62 = vmul.f32 %v1532_v52, %v4603_v31  ;;  %v849_v20 = vmul.f32 %v3092_v41, %v252_v29  ;;  %v4651_v29 = vpop.f32.mrb[2].mxu0 }
 0x1b5   :  { %v2011_v16 = vadd.f32 1.0, %v2814_v61  ;;  %v587_v23 = vadd.f32 %v523_v17, %v455_v13  ;;  %v1597_v36 = vmul.f32 %v1533_v45, %v4613_v0  ;;  %v909_v55 = vmul.f32 %v3095_v42, %v119_v7  ;;  %v4663_v38 = vpop.f32.mrb[3].mxu1  ;;  %v4670_v61 = vld [vmem:[#allocation2 + $0xe0] sm:$0xff] }
 0x1b6   :  { %v718_v51 = vadd.f32 %v654_v47, %v586_v54  ;;  %v1025_v34 = vmul.f32 %v3098_v43, %v383_v8  ;;  %v2816_v60 = vpop.eup %2815  ;;  %v1660_v15 = vmul.f32 0.044715, %v1596_v62  ;;  %v1205_v5 = vmul.f32 %v3101_v44, %v4600_v49  ;;  %v4661_v8 = vpop.f32.mrb[3].mxu0  ;;  %v4668_v47 = vld [vmem:[#allocation2 + $0xd8] sm:$0xff] }
 0x1b7   :  { %v2075_v59 = vmul.f32 %v2011_v16, %v1883_v18  ;;  %v719_v58 = vadd.f32 %v655_v1, %v587_v23  ;;  %v2010_v35 = vadd.f32 1.0, %v2816_v60  ;;  %v1661_v4 = vmul.f32 0.044715, %v1597_v36  ;;  %v4672_v45 = vpop.f32.mrb[4].mxu0  ;;  %v4674_v54 = vpop.f32.mrb[4].mxu1 }
 0x1b8   :  { %v788_v7 = vadd.f32 %v4574_v63, %v718_v51  ;;  %v965_v6 = vadd.f32 %v909_v55, %v849_v20  ;;  %v1724_v40 = vadd.f32 %v1660_v15, %v4603_v31  ;;  %v1206_v56 = vmul.f32 %v3101_v44, %v4622_v12  ;;  %v4680_v23 = vpop.f32.mrb[5].mxu0  ;;  %v4682_v20 = vpop.f32.mrb[5].mxu1 }
 0x1b9   :  { %v789_v18 = vadd.f32 %v4574_v63, %v719_v58  ;;  %v1265_v14 = vmul.f32 %v3142_v9, %v4580_v27  ;;  %v2074_v13 = vmul.f32 %v2010_v35, %v1882_v32  ;;  %v1725_v53 = vadd.f32 %v1661_v4, %v4613_v0  ;;  %5219 = vst [vmem:[#allocation12_spill] sm:$0xff] %v4682_v20  ;;  %v4684_v60 = vpop.f32.mrb[6].mxu0  ;;  %v4686_v15 = vpop.f32.mrb[6].mxu1 }
 0x1ba   :  { %v1081_v52 = vadd.f32 %v1025_v34, %v965_v6  ;;  %v1266_v17 = vmul.f32 %v3142_v9, %v4582_v2  ;;  %v1788_v1 = vmul.f32 0.7978846, %v1724_v40  ;;  %v1381_v62 = vmul.f32 %v4586_v57, %v4609_v21  ;;  %5220 = vst [vmem:[#allocation13_spill] sm:$0xff] %v4684_v60  ;;  %5221 = vst [vmem:[#allocation14_spill] sm:$0xff] %v4686_v15  ;;  %v4690_v4 = vpop.f32.mrb[7].mxu0  ;;  %v4692_v6 = vpop.f32.mrb[7].mxu1 }
 0x1bb   :  { %v1321_v16 = vadd.f32 %v1265_v14, %v1205_v5  ;;  %v1382_v32 = vmul.f32 %v4586_v57, %v4631_v28  ;;  %v2111_v36 = vpack.c.bf16 %v2075_v59, %v2074_v13  ;;  %v1789_v51 = vmul.f32 0.7978846, %v1725_v53  ;;  %5222 = vst [vmem:[#allocation15_spill] sm:$0xff] %v4690_v4  ;;  %5223 = vst [vmem:[#allocation16_spill] sm:$0xff] %v4692_v6 }
 0x1bc   :  { %v1145_v55 = vadd.f32 %v1081_v52, %v789_v18  ;;  %v1322_v34 = vadd.f32 %v1266_v17, %v1206_v56  ;;  %2817 = vtanh.f32 %v1788_v1  ;;  %v157_v5 = vrot.slane %v4668_v47, 7 }
 0x1bd   :  { %v1437_v58 = vadd.f32 %v1381_v62, %v1321_v16  ;;  %v158_v35 = vrot.slane %v4670_v61, 7  ;;  %2678 = vmatmul.mubr.bf16.gmra.mrb[20].mxu1 %v2111_v36  ;;  %2819 = vtanh.f32 %v1789_v51  ;;  %v288_v40 = vrot.slane %v4668_v47, 1 }
 0x1be   :  { %v1438_v59 = vadd.f32 %v1382_v32, %v1322_v34  ;;  %v289_v18 = vrot.slane %v4670_v61, 1  ;;  %v1852_v56 = vmul.f32 0.5, %v4603_v31  ;;  %v4699_v13 = vsel %vm129_vm0, %v157_v5, 0.0 }
 0x1bf   :  { %v1500_v14 = vadd.f32 %v1437_v58, %v788_v7  ;;  %v424_v53 = vmul.f32 %v3059_v24, %v4536_v48  ;;  %v1853_v52 = vmul.f32 0.5, %v4613_v0  ;;  %v4708_v1 = vsel %vm260_vm1, %v288_v40, 0.0 }
 0x1c0   :  { %v4704_v17 = vadd.f32 %v1438_v59, %v1145_v55  ;;  %v425_v16 = vmul.f32 %v3059_v24, %v4699_v13  ;;  %v4714_v7 = vsel %vm129_vm0, %v158_v35, 0.0  ;;  %v492_v62 = vmul.f32 %v3062_v25, %v4515_v10 }
 0x1c1   :  { %v1564_v31 = vmul.f32 %v1500_v14, %v1500_v14  ;;  %v493_v0 = vmul.f32 %v3062_v25, %v4668_v47  ;;  %v4724_v36 = vsel %vm260_vm1, %v289_v18, 0.0  ;;  %v624_v51 = vmul.f32 %v3087_v39, %v4551_v22 }
 0x1c2   :  { %v1565_v32 = vmul.f32 %v4704_v17, %v4704_v17  ;;  %v625_v55 = vmul.f32 %v3087_v39, %v4708_v1  ;;  %v556_v58 = vadd.f32 %v492_v62, %v424_v53  ;;  %v822_v35 = vmul.f32 %v3092_v41, %v4531_v37 }
 0x1c3   :  { %v1628_v34 = vmul.f32 %v1564_v31, %v1500_v14  ;;  %v557_v5 = vadd.f32 %v493_v0, %v425_v16  ;;  %v823_v40 = vmul.f32 %v3092_v41, %v4536_v48  ;;  %v882_v18 = vmul.f32 %v3095_v42, %v4510_v46 }
 0x1c4   :  { %v1629_v59 = vmul.f32 %v1565_v32, %v4704_v17  ;;  %v883_v6 = vmul.f32 %v3095_v42, %v4515_v10  ;;  %v688_v15 = vadd.f32 %v624_v51, %v556_v58  ;;  %v998_v53 = vmul.f32 %v3098_v43, %v4547_v26 }
 0x1c5   :  { %v1692_v4 = vmul.f32 0.044715, %v1628_v34  ;;  %v689_v60 = vadd.f32 %v625_v55, %v557_v5  ;;  %v938_v31 = vadd.f32 %v882_v18, %v822_v35  ;;  %v999_v62 = vmul.f32 %v3098_v43, %v4551_v22 }
 0x1c6   :  { %v1693_v16 = vmul.f32 0.044715, %v1629_v59  ;;  %v939_v37 = vadd.f32 %v883_v6, %v823_v40  ;;  %v2818_v0 = vpop.eup %2817  ;;  %v758_v32 = vadd.f32 %v4574_v63, %v688_v15  ;;  %v1179_v10 = vmul.f32 %v3101_v44, %v4699_v13  ;;  %v4752_v15 = vld [vmem:[#allocation2 + $0x1d8] sm:$0xff] }
 0x1c7   :  { %v1756_v48 = vadd.f32 %v1692_v4, %v1500_v14  ;;  %v759_v46 = vadd.f32 %v4574_v63, %v689_v60  ;;  %v2820_v51 = vpop.eup %2819  ;;  %v1980_v55 = vadd.f32 1.0, %v2818_v0  ;;  %v1054_v26 = vadd.f32 %v998_v53, %v938_v31  ;;  %v4756_v31 = vld [vmem:[#allocation2 + $0x1e0] sm:$0xff] }
 0x1c8   :  { %v1757_v34 = vadd.f32 %v1693_v16, %v4704_v17  ;;  %v1055_v58 = vadd.f32 %v999_v62, %v939_v37  ;;  %v1981_v5 = vadd.f32 1.0, %v2820_v51  ;;  %v1180_v22 = vmul.f32 %v3101_v44, %v4714_v7 }
 0x1c9   :  { %v1820_v6 = vmul.f32 0.7978846, %v1756_v48  ;;  %v1239_v4 = vmul.f32 %v3142_v9, %v4668_v47  ;;  %v2044_v60 = vmul.f32 %v1980_v55, %v1852_v56  ;;  %v1884_v59 = vmul.f32 0.5, %v1500_v14 }
 0x1ca   :  { %v1821_v35 = vmul.f32 0.7978846, %v1757_v34  ;;  %v1114_v40 = vadd.f32 %v1054_v26, %v758_v32  ;;  %v2045_v18 = vmul.f32 %v1981_v5, %v1853_v52  ;;  %v1240_v53 = vmul.f32 %v3142_v9, %v4670_v61 }
 0x1cb   :  { %2821 = vtanh.f32 %v1820_v6  ;;  %v1295_v16 = vadd.f32 %v1239_v4, %v1179_v10  ;;  %v1355_v37 = vmul.f32 %v4586_v57, %v4708_v1  ;;  %v1356_v62 = vmul.f32 %v4586_v57, %v4724_v36 }
 0x1cc   :  { %2823 = vtanh.f32 %v1821_v35  ;;  %v189_v56 = vrot.slane %v4752_v15, 7  ;;  %v2096_v0 = vpack.c.bf16 %v2045_v18, %v2044_v60  ;;  %v1115_v14 = vadd.f32 %v1055_v58, %v759_v46 }
 0x1cd   :  { %v1296_v48 = vadd.f32 %v1240_v53, %v1180_v22  ;;  %v320_v52 = vrot.slane %v4752_v15, 1  ;;  %v1411_v32 = vadd.f32 %v1355_v37, %v1295_v16  ;;  %v190_v51 = vrot.slane %v4756_v31, 7 }
 0x1ce   :  { %v4767_v10 = vsel %vm129_vm0, %v189_v56, 0.0  ;;  %v456_v55 = vmul.f32 %v3059_v24, %v4622_v12  ;;  %2649 = vmatprep.mubr.bf16.mxu0 %v2096_v0  ;;  %v321_v26 = vrot.slane %v4756_v31, 1  ;;  %v1885_v5 = vmul.f32 0.5, %v4704_v17 }
 0x1cf   :  { %v1412_v34 = vadd.f32 %v1356_v62, %v1296_v48  ;;  %v4774_v46 = vsel %vm260_vm1, %v320_v52, 0.0  ;;  %v457_v58 = vmul.f32 %v3059_v24, %v4767_v10  ;;  %v1470_v6 = vadd.f32 %v1411_v32, %v1114_v40 }
 0x1d0   :  { %v524_v22 = vmul.f32 %v3062_v25, %v4582_v2  ;;  %v525_v4 = vmul.f32 %v3062_v25, %v4752_v15  ;;  %v656_v35 = vmul.f32 %v3087_v39, %v4631_v28  ;;  %v657_v18 = vmul.f32 %v3087_v39, %v4774_v46  ;;  %v4791_v16 = vpop.f32.mrb[8].mxu0 }
 0x1d1   :  { %v4783_v60 = vadd.f32 %v1412_v34, %v1115_v14  ;;  %v850_v53 = vmul.f32 %v3092_v41, %v4600_v49  ;;  %5224 = vst [vmem:[#allocation17_spill] sm:$0xff] %v4791_v16  ;;  %v1534_v17 = vmul.f32 %v1470_v6, %v1470_v6  ;;  %v4795_v40 = vsel %vm129_vm0, %v190_v51, 0.0  ;;  %v4797_v56 = vpop.f32.mrb[9].mxu0 }
 0x1d2   :  { %v588_v37 = vadd.f32 %v524_v22, %v456_v55  ;;  %v589_v62 = vadd.f32 %v525_v4, %v457_v58  ;;  %5225 = vst [vmem:[#allocation18_spill] sm:$0xff] %v4797_v56  ;;  %v4803_v14 = vsel %vm260_vm1, %v321_v26, 0.0  ;;  %v851_v49 = vmul.f32 %v3092_v41, %v4622_v12  ;;  %v4809_v52 = vpop.f32.mrb[10].mxu0 }
 0x1d3   :  { %v1535_v0 = vmul.f32 %v4783_v60, %v4783_v60  ;;  %v910_v48 = vmul.f32 %v3095_v42, %v4580_v27  ;;  %5226 = vst [vmem:[#allocation19_spill] sm:$0xff] %v4809_v52  ;;  %v1598_v32 = vmul.f32 %v1534_v17, %v1470_v6  ;;  %v911_v34 = vmul.f32 %v3095_v42, %v4582_v2  ;;  %v4813_v58 = vpop.f32.mrb[11].mxu0 }
 0x1d4   :  { %v720_v51 = vadd.f32 %v656_v35, %v588_v37  ;;  %v721_v55 = vadd.f32 %v657_v18, %v589_v62  ;;  %5227 = vst [vmem:[#allocation20_spill] sm:$0xff] %v4813_v58  ;;  %v1026_v12 = vmul.f32 %v3098_v43, %v4609_v21  ;;  %v1027_v27 = vmul.f32 %v3098_v43, %v4631_v28 }
 0x1d5   :  { %v2822_v22 = vpop.eup %2821  ;;  %v1599_v26 = vmul.f32 %v1535_v0, %v4783_v60  ;;  %v966_v4 = vadd.f32 %v910_v48, %v850_v53  ;;  %v1662_v17 = vmul.f32 0.044715, %v1598_v32  ;;  %v967_v62 = vadd.f32 %v911_v34, %v851_v49 }
 0x1d6   :  { %v2824_v56 = vpop.eup %2823  ;;  %v2012_v52 = vadd.f32 1.0, %v2822_v22  ;;  %v790_v35 = vadd.f32 %v4574_v63, %v720_v51  ;;  %v791_v18 = vadd.f32 %v4574_v63, %v721_v55  ;;  %v1207_v53 = vmul.f32 %v3101_v44, %v4767_v10  ;;  %v4827_v51 = vld [vmem:[#allocation2 + $0xe8] sm:$0xff] }
 0x1d7   :  { %v2013_v2 = vadd.f32 1.0, %v2824_v56  ;;  %v1663_v37 = vmul.f32 0.044715, %v1599_v26  ;;  %v1082_v58 = vadd.f32 %v1026_v12, %v966_v4  ;;  %v1726_v0 = vadd.f32 %v1662_v17, %v1470_v6 }
 0x1d8   :  { %v2076_v16 = vmul.f32 %v2012_v52, %v1884_v59  ;;  %v1208_v21 = vmul.f32 %v3101_v44, %v4795_v40  ;;  %v1083_v32 = vadd.f32 %v1027_v27, %v967_v62  ;;  %v1267_v56 = vmul.f32 %v3142_v9, %v4752_v15  ;;  %v4835_v52 = vld [vmem:[#allocation2 + $0xf0] sm:$0xff] }
 0x1d9   :  { %v2077_v28 = vmul.f32 %v2013_v2, %v1885_v5  ;;  %v1727_v48 = vadd.f32 %v1663_v37, %v4783_v60  ;;  %v1146_v22 = vadd.f32 %v1082_v58, %v790_v35  ;;  %v1790_v55 = vmul.f32 0.7978846, %v1726_v0 }
 0x1da   :  { %v1268_v59 = vmul.f32 %v3142_v9, %v4756_v31  ;;  %v1383_v49 = vmul.f32 %v4586_v57, %v4774_v46  ;;  %v1147_v26 = vadd.f32 %v1083_v32, %v791_v18  ;;  %v1384_v58 = vmul.f32 %v4586_v57, %v4803_v14 }
 0x1db   :  { %v2112_v34 = vpack.c.bf16 %v2077_v28, %v2076_v16  ;;  %v1791_v5 = vmul.f32 0.7978846, %v1727_v48  ;;  %2825 = vtanh.f32 %v1790_v55  ;;  %v1323_v4 = vadd.f32 %v1267_v56, %v1207_v53 }
 0x1dc   :  { %v1324_v12 = vadd.f32 %v1268_v59, %v1208_v21  ;;  %v159_v27 = vrot.slane %v4827_v51, 7  ;;  %v1854_v17 = vmul.f32 0.5, %v1470_v6  ;;  %v160_v35 = vrot.slane %v4835_v52, 7 }
 0x1dd   :  { %2681 = vmatprep.mubr.bf16.mxu1 %v2112_v34  ;;  %2827 = vtanh.f32 %v1791_v5  ;;  %v290_v2 = vrot.slane %v4827_v51, 1  ;;  %v1439_v37 = vadd.f32 %v1383_v49, %v1323_v4  ;;  %v291_v18 = vrot.slane %v4835_v52, 1 }
 0x1de   :  { %v1440_v62 = vadd.f32 %v1384_v58, %v1324_v12  ;;  %v4844_v16 = vsel %vm129_vm0, %v159_v27, 0.0  ;;  %v1855_v0 = vmul.f32 0.5, %v4783_v60  ;;  %v426_v6 = vmul.f32 %v3059_v24, %v4714_v7 }
 0x1df   :  { %v4850_v53 = vsel %vm260_vm1, %v290_v2, 0.0  ;;  %v427_v21 = vmul.f32 %v3059_v24, %v4844_v16  ;;  %v4856_v28 = vadd.f32 %v1439_v37, %v1146_v22  ;;  %v494_v32 = vmul.f32 %v3062_v25, %v4670_v61 }
 0x1e0   :  { %v4858_v48 = vadd.f32 %v1440_v62, %v1147_v26  ;;  %v495_v60 = vmul.f32 %v3062_v25, %v4827_v51  ;;  %v4864_v55 = vpop.f32.mrb[8].mxu1  ;;  %v626_v56 = vmul.f32 %v3087_v39, %v4724_v36  ;;  %v627_v59 = vmul.f32 %v3087_v39, %v4850_v53 }
 0x1e1   :  { %5228 = vst [vmem:[#allocation21_spill] sm:$0xff] %v4864_v55  ;;  %v824_v22 = vmul.f32 %v3092_v41, %v4699_v13  ;;  %v825_v49 = vmul.f32 %v3092_v41, %v4714_v7  ;;  %v4874_v34 = vpop.f32.mrb[9].mxu1  ;;  %v1566_v5 = vmul.f32 %v4856_v28, %v4856_v28  ;;  %v4882_v58 = vsel %vm129_vm0, %v160_v35, 0.0 }
 0x1e2   :  { %5229 = vst [vmem:[#allocation22_spill] sm:$0xff] %v4874_v34  ;;  %v1567_v26 = vmul.f32 %v4858_v48, %v4858_v48  ;;  %v4886_v4 = vsel %vm260_vm1, %v291_v18, 0.0  ;;  %v4888_v13 = vpop.f32.mrb[10].mxu1  ;;  %v558_v12 = vadd.f32 %v494_v32, %v426_v6  ;;  %v559_v7 = vadd.f32 %v495_v60, %v427_v21 }
 0x1e3   :  { %5230 = vst [vmem:[#allocation23_spill] sm:$0xff] %v4888_v13  ;;  %v884_v27 = vmul.f32 %v3095_v42, %v4668_v47  ;;  %v885_v2 = vmul.f32 %v3095_v42, %v4670_v61  ;;  %v4894_v37 = vpop.f32.mrb[11].mxu1  ;;  %v1630_v62 = vmul.f32 %v1566_v5, %v4856_v28  ;;  %v1000_v18 = vmul.f32 %v3098_v43, %v4708_v1 }
 0x1e4   :  { %5231 = vst [vmem:[#allocation24_spill] sm:$0xff] %v4894_v37  ;;  %v1631_v35 = vmul.f32 %v1567_v26, %v4858_v48  ;;  %v1001_v13 = vmul.f32 %v3098_v43, %v4724_v36  ;;  %v690_v6 = vadd.f32 %v626_v56, %v558_v12  ;;  %v691_v21 = vadd.f32 %v627_v59, %v559_v7 }
 0x1e5   :  { %v940_v32 = vadd.f32 %v884_v27, %v824_v22  ;;  %v941_v60 = vadd.f32 %v885_v2, %v825_v49  ;;  %v2826_v47 = vpop.eup %2825  ;;  %v1694_v34 = vmul.f32 0.044715, %v1630_v62  ;;  %v1181_v61 = vmul.f32 %v3101_v44, %v4844_v16  ;;  %v4914_v62 = vld [vmem:[#allocation2 + $0x1e8] sm:$0xff] }
 0x1e6   :  { %v1695_v55 = vmul.f32 0.044715, %v1631_v35  ;;  %v1182_v5 = vmul.f32 %v3101_v44, %v4882_v58  ;;  %v1982_v37 = vadd.f32 1.0, %v2826_v47  ;;  %v760_v1 = vadd.f32 %v4574_v63, %v690_v6  ;;  %v4916_v35 = vld [vmem:[#allocation2 + $0x1f0] sm:$0xff] }
 0x1e7   :  { %v2828_v26 = vpop.eup %2827  ;;  %v761_v20 = vadd.f32 %v4574_v63, %v691_v21  ;;  %v1056_v36 = vadd.f32 %v1000_v18, %v940_v32  ;;  %v1758_v59 = vadd.f32 %v1694_v34, %v4856_v28  ;;  %v1057_v49 = vadd.f32 %v1001_v13, %v941_v60 }
 0x1e8   :  { %v1983_v56 = vadd.f32 1.0, %v2828_v26  ;;  %v1759_v22 = vadd.f32 %v1695_v55, %v4858_v48  ;;  %v2046_v12 = vmul.f32 %v1982_v37, %v1854_v17  ;;  %v1241_v27 = vmul.f32 %v3142_v9, %v4827_v51 }
 0x1e9   :  { %v1116_v7 = vadd.f32 %v1056_v36, %v760_v1  ;;  %v1242_v2 = vmul.f32 %v3142_v9, %v4835_v52  ;;  %v1822_v18 = vmul.f32 0.7978846, %v1758_v59  ;;  %v1117_v32 = vadd.f32 %v1057_v49, %v761_v20 }
 0x1ea   :  { %v2047_v6 = vmul.f32 %v1983_v56, %v1855_v0  ;;  %v1823_v21 = vmul.f32 0.7978846, %v1759_v22  ;;  %v1297_v34 = vadd.f32 %v1241_v27, %v1181_v61  ;;  %v1357_v17 = vmul.f32 %v4586_v57, %v4850_v53 }
 0x1eb   :  { %v1298_v47 = vadd.f32 %v1242_v2, %v1182_v5  ;;  %v1358_v55 = vmul.f32 %v4586_v57, %v4886_v4  ;;  %2829 = vtanh.f32 %v1822_v18  ;;  %v191_v37 = vrot.slane %v4914_v62, 7 }
 0x1ec   :  { %v2097_v13 = vpack.c.bf16 %v2047_v6, %v2046_v12  ;;  %v192_v60 = vrot.slane %v4916_v35, 7  ;;  %2831 = vtanh.f32 %v1823_v21  ;;  %v1413_v26 = vadd.f32 %v1357_v17, %v1297_v34 }
 0x1ed   :  { %v1414_v0 = vadd.f32 %v1358_v55, %v1298_v47  ;;  %v322_v1 = vrot.slane %v4914_v62, 1  ;;  %v1886_v20 = vmul.f32 0.5, %v4856_v28  ;;  %v4928_v61 = vsel %vm129_vm0, %v191_v37, 0.0 }
 0x1ee   :  { %2650 = vmatmul.mubr.bf16.gmra.mrb[24].mxu0 %v2097_v13  ;;  %v323_v5 = vrot.slane %v4916_v35, 1  ;;  %v458_v36 = vmul.f32 %v3059_v24, %v4795_v40  ;;  %v4933_v56 = vadd.f32 %v1413_v26, %v1116_v7  ;;  %v459_v28 = vmul.f32 %v3059_v24, %v4928_v61 }
 0x1ef   :  { %v4935_v59 = vadd.f32 %v1414_v0, %v1117_v32  ;;  %v4939_v22 = vsel %vm260_vm1, %v322_v1, 0.0  ;;  %v1887_v49 = vmul.f32 0.5, %v4858_v48  ;;  %v526_v12 = vmul.f32 %v3062_v25, %v4756_v31 }
 0x1f0   :  { %v527_v27 = vmul.f32 %v3062_v25, %v4914_v62  ;;  %v658_v7 = vmul.f32 %v3087_v39, %v4803_v14  ;;  %v1536_v2 = vmul.f32 %v4933_v56, %v4933_v56  ;;  %v4956_v18 = vsel %vm129_vm0, %v192_v60, 0.0 }
 0x1f1   :  { %v1537_v6 = vmul.f32 %v4935_v59, %v4935_v59  ;;  %v4960_v48 = vsel %vm260_vm1, %v323_v5, 0.0  ;;  %v590_v21 = vadd.f32 %v526_v12, %v458_v36  ;;  %v659_v34 = vmul.f32 %v3087_v39, %v4939_v22 }
 0x1f2   :  { %v591_v32 = vadd.f32 %v527_v27, %v459_v28  ;;  %v852_v47 = vmul.f32 %v3092_v41, %v4767_v10  ;;  %v1600_v17 = vmul.f32 %v1536_v2, %v4933_v56  ;;  %v853_v13 = vmul.f32 %v3092_v41, %v4795_v40 }
 0x1f3   :  { %v1601_v55 = vmul.f32 %v1537_v6, %v4935_v59  ;;  %v912_v37 = vmul.f32 %v3095_v42, %v4752_v15  ;;  %v722_v60 = vadd.f32 %v658_v7, %v590_v21  ;;  %v913_v0 = vmul.f32 %v3095_v42, %v4756_v31 }
 0x1f4   :  { %v723_v26 = vadd.f32 %v659_v34, %v591_v32  ;;  %v1028_v1 = vmul.f32 %v3098_v43, %v4774_v46  ;;  %v1664_v5 = vmul.f32 0.044715, %v1600_v17  ;;  %v1029_v28 = vmul.f32 %v3098_v43, %v4803_v14  ;;  %v94_v17 = vld [vmem:[#allocation2 + $0xf8] sm:$0xff] }
 0x1f5   :  { %v1665_v10 = vmul.f32 0.044715, %v1601_v55  ;;  %v968_v36 = vadd.f32 %v912_v37, %v852_v47  ;;  %v2830_v12 = vpop.eup %2829  ;;  %v792_v40 = vadd.f32 %v4574_v63, %v722_v60  ;;  %v969_v15 = vadd.f32 %v913_v0, %v853_v13 }
 0x1f6   :  { %v793_v27 = vadd.f32 %v4574_v63, %v723_v26  ;;  %v1209_v7 = vmul.f32 %v3101_v44, %v4928_v61  ;;  %v2832_v2 = vpop.eup %2831  ;;  %v2014_v31 = vadd.f32 1.0, %v2830_v12  ;;  %v1728_v6 = vadd.f32 %v1664_v5, %v4933_v56 }
 0x1f7   :  { %v1729_v46 = vadd.f32 %v1665_v10, %v4935_v59  ;;  %v1084_v21 = vadd.f32 %v1028_v1, %v968_v36  ;;  %v2015_v32 = vadd.f32 1.0, %v2832_v2  ;;  %v1085_v34 = vadd.f32 %v1029_v28, %v969_v15 }
 0x1f8   :  { %v1210_v14 = vmul.f32 %v3101_v44, %v4956_v18  ;;  %v1269_v47 = vmul.f32 %v3142_v9, %v4914_v62  ;;  %v2078_v55 = vmul.f32 %v2014_v31, %v1886_v20  ;;  %v1792_v13 = vmul.f32 0.7978846, %v1728_v6 }
 0x1f9   :  { %v1793_v37 = vmul.f32 0.7978846, %v1729_v46  ;;  %v1148_v60 = vadd.f32 %v1084_v21, %v792_v40  ;;  %v2079_v26 = vmul.f32 %v2015_v32, %v1887_v49  ;;  %v1149_v0 = vadd.f32 %v1085_v34, %v793_v27 }
 0x1fa   :  { %v1270_v5 = vmul.f32 %v3142_v9, %v4916_v35  ;;  %v1325_v10 = vadd.f32 %v1269_v47, %v1209_v7  ;;  %2833 = vtanh.f32 %v1792_v13  ;;  %v1385_v1 = vmul.f32 %v4586_v57, %v4939_v22 }
 0x1fb   :  { %v1386_v36 = vmul.f32 %v4586_v57, %v4960_v48  ;;  %v161_v28 = vrot.slane %v94_v17, 7  ;;  %v2113_v12 = vpack.c.bf16 %v2079_v26, %v2078_v55  ;;  %2835 = vtanh.f32 %v1793_v37 }
 0x1fc   :  { %v1326_v20 = vadd.f32 %v1270_v5, %v1210_v14  ;;  %v292_v15 = vrot.slane %v94_v17, 1  ;;  %v1441_v2 = vadd.f32 %v1385_v1, %v1325_v10  ;;  %v428_v40 = vmul.f32 %v3059_v24, %v4882_v58 }
 0x1fd   :  { %v227_v49 = vsel %vm129_vm0, %v161_v28, 0.0  ;;  %v496_v27 = vmul.f32 %v3062_v25, %v4835_v52  ;;  %2682 = vmatmul.mubr.bf16.gmra.mrb[24].mxu1 %v2113_v12  ;;  %v497_v46 = vmul.f32 %v3062_v25, %v94_v17  ;;  %v628_v34 = vmul.f32 %v3087_v39, %v4886_v4 }
 0x1fe   :  { %v1442_v7 = vadd.f32 %v1386_v36, %v1326_v20  ;;  %v358_v31 = vsel %vm260_vm1, %v292_v15, 0.0  ;;  %v429_v6 = vmul.f32 %v3059_v24, %v227_v49  ;;  %v1504_v21 = vadd.f32 %v1441_v2, %v1148_v60 }
 0x1ff   :  { %v560_v32 = vadd.f32 %v496_v27, %v428_v40  ;;  %v629_v14 = vmul.f32 %v3087_v39, %v358_v31  ;;  %v826_v13 = vmul.f32 %v3092_v41, %v4844_v16  ;;  %v827_v37 = vmul.f32 %v3092_v41, %v4882_v58 }
 0x200   :  { %v1505_v47 = vadd.f32 %v1442_v7, %v1149_v0  ;;  %v561_v55 = vadd.f32 %v497_v46, %v429_v6  ;;  %v1856_v26 = vmul.f32 0.5, %v4933_v56  ;;  %v1568_v5 = vmul.f32 %v1504_v21, %v1504_v21  ;;  %v5025_v6 = vld [vmem:[#allocation2 + $0x1f8] sm:$0xff] }
 0x201   :  { %v692_v10 = vadd.f32 %v628_v34, %v560_v32  ;;  %v886_v60 = vmul.f32 %v3095_v42, %v4827_v51  ;;  %v1857_v1 = vmul.f32 0.5, %v4935_v59  ;;  %v887_v0 = vmul.f32 %v3095_v42, %v4835_v52 }
 0x202   :  { %v1569_v36 = vmul.f32 %v1505_v47, %v1505_v47  ;;  %v693_v28 = vadd.f32 %v629_v14, %v561_v55  ;;  %v1632_v12 = vmul.f32 %v1568_v5, %v1504_v21  ;;  %v1002_v58 = vmul.f32 %v3098_v43, %v4850_v53 }
 0x203   :  { %v762_v16 = vadd.f32 %v4574_v63, %v692_v10  ;;  %v942_v20 = vadd.f32 %v886_v60, %v826_v13  ;;  %v943_v2 = vadd.f32 %v887_v0, %v827_v37  ;;  %v1003_v51 = vmul.f32 %v3098_v43, %v4886_v4 }
 0x204   :  { %v1633_v56 = vmul.f32 %v1569_v36, %v1505_v47  ;;  %v763_v15 = vadd.f32 %v4574_v63, %v693_v28  ;;  %v2834_v59 = vpop.eup %2833  ;;  %v1696_v40 = vmul.f32 0.044715, %v1632_v12  ;;  %v1183_v7 = vmul.f32 %v3101_v44, %v227_v49 }
 0x205   :  { %v1058_v27 = vadd.f32 %v1002_v58, %v942_v20  ;;  %v1243_v52 = vmul.f32 %v3142_v9, %v94_v17  ;;  %v2836_v46 = vpop.eup %2835  ;;  %v1984_v32 = vadd.f32 1.0, %v2834_v59  ;;  %v1059_v53 = vadd.f32 %v1003_v51, %v943_v2 }
 0x206   :  { %v1697_v34 = vmul.f32 0.044715, %v1633_v56  ;;  %v1359_v14 = vmul.f32 %v4586_v57, %v358_v31  ;;  %v1985_v55 = vadd.f32 1.0, %v2836_v46  ;;  %v1760_v13 = vadd.f32 %v1696_v40, %v1504_v21 }
 0x207   :  { %v1118_v37 = vadd.f32 %v1058_v27, %v762_v16  ;;  %v1299_v5 = vadd.f32 %v1243_v52, %v1183_v7  ;;  %v2048_v4 = vmul.f32 %v1984_v32, %v1856_v26  ;;  %v5028_v60 = vadd.f32 %v1059_v53, %v763_v15 }
 0x208   :  { %v1761_v10 = vadd.f32 %v1697_v34, %v1505_v47  ;;  %v193_v49 = vrot.slane %v5025_v6, 7  ;;  %v2049_v36 = vmul.f32 %v1985_v55, %v1857_v1  ;;  %v1824_v17 = vmul.f32 0.7978846, %v1760_v13 }
 0x209   :  { %v1415_v28 = vadd.f32 %v1359_v14, %v1299_v5  ;;  %v324_v0 = vrot.slane %v5025_v6, 1  ;;  %v5032_v20 = vmul.f32 0.5, %v1504_v21  ;;  %v1539_v31 = vmul.f32 %v5028_v60, %v5028_v60 }
 0x20a   :  { %v1825_v12 = vmul.f32 0.7978846, %v1761_v10  ;;  %v259_v16 = vsel %vm129_vm0, %v193_v49, 0.0  ;;  %v2098_v26 = vpack.c.bf16 %v2049_v36, %v2048_v4  ;;  %2837 = vtanh.f32 %v1824_v17 }
 0x20b   :  { %v5038_v58 = vadd.f32 %v1415_v28, %v1118_v37  ;;  %v390_v1 = vsel %vm260_vm1, %v324_v0, 0.0  ;;  %v5042_v56 = vpop.f32.mrb[12].mxu0  ;;  %v1603_v15 = vmul.f32 %v1539_v31, %v5028_v60  ;;  %v460_v21 = vmul.f32 %v3059_v24, %v4956_v18 }
 0x20c   :  { %2839 = vtanh.f32 %v1825_v12  ;;  %v461_v2 = vmul.f32 %v3059_v24, %v259_v16  ;;  %v5048_v51 = vpop.f32.mrb[13].mxu0  ;;  %2653 = vmatprep.mubr.bf16.mxu0 %v2098_v26  ;;  %v1889_v59 = vmul.f32 0.5, %v1505_v47  ;;  %v528_v3 = vmul.f32 %v3062_v25, %v4916_v35 }
 0x20d   :  { %v1538_v40 = vmul.f32 %v5038_v58, %v5038_v58  ;;  %v529_v27 = vmul.f32 %v3062_v25, %v5025_v6  ;;  %v5056_v7 = vpop.f32.mrb[14].mxu0  ;;  %v1667_v52 = vmul.f32 0.044715, %v1603_v15  ;;  %v660_v46 = vmul.f32 %v3087_v39, %v4960_v48 }
 0x20e   :  { %v661_v24 = vmul.f32 %v3087_v39, %v390_v1  ;;  %v854_v47 = vmul.f32 %v3092_v41, %v4928_v61  ;;  %v5063_v32 = vpop.f32.mrb[15].mxu0  ;;  %v592_v53 = vadd.f32 %v528_v3, %v460_v21  ;;  %v855_v25 = vmul.f32 %v3092_v41, %v4956_v18 }
 0x20f   :  { %v1602_v34 = vmul.f32 %v1538_v40, %v5038_v58  ;;  %v593_v14 = vadd.f32 %v529_v27, %v461_v2  ;;  %v1731_v55 = vadd.f32 %v1667_v52, %v5028_v60  ;;  %v914_v13 = vmul.f32 %v3095_v42, %v4914_v62  ;;  %v5081_v62 = vld [vmem:[%s5217_s4] ss:$0 sm:$0xff]  ;;  %s2956_s4 = smov [#allocation8]  }
 0x210   :  { %v915_v39 = vmul.f32 %v3095_v42, %v4916_v35  ;;  %v1030_v61 = vmul.f32 %v3098_v43, %v4939_v22  ;;  %v724_v5 = vadd.f32 %v660_v46, %v592_v53  ;;  %v1031_v10 = vmul.f32 %v3098_v43, %v4960_v48  ;;  %v5233_v53 = vld [vmem:[#allocation13_spill] sm:$0xff]  ;;  %s2545_s16 = sshll.u32 %s2956_s4, 4  ;;  %s2546_s16 = int_to_ptr.vmem [resolvable:$true] %s2545_s16 }
 0x211   :  { %v1666_v37 = vmul.f32 0.044715, %v1602_v34  ;;  %v725_v4 = vadd.f32 %v661_v24, %v593_v14  ;;  %v1795_v49 = vmul.f32 0.7978846, %v1731_v55  ;;  %v970_v36 = vadd.f32 %v914_v13, %v854_v47  ;;  %s2921_s1 = scalar_lea.vmem %s2546_s16, 8192  ;;  %p2926_p11 = scmp.lt.s32.totalorder %s2546_s16, %s2546_s16 }
 0x212   :  { %v971_v41 = vadd.f32 %v915_v39, %v855_v25  ;;  %v1211_v18 = vmul.f32 %v3101_v44, %v259_v16  ;;  %v794_v35 = vadd.f32 %v4574_v63, %v724_v5  ;;  %v1271_v17 = vmul.f32 %v3142_v9, %v5025_v6  ;;  %v5237_v5 = vld [vmem:[#allocation17_spill] sm:$0xff]  ;;  %p2922_p10 = scmp.ne.s32.totalorder %s2546_s16, %s2921_s1  ;;  %p2927_p12 = scmp.lt.s32.totalorder %s2921_s1, %s2921_s1 }
 0x213   :  { %v1730_v42 = vadd.f32 %v1666_v37, %v5038_v58  ;;  %v795_v22 = vadd.f32 %v4574_v63, %v725_v4  ;;  %2841 = vtanh.f32 %v1795_v49  ;;  %v1086_v43 = vadd.f32 %v1030_v61, %v970_v36  ;;  %v5236_v61 = vld [vmem:[#allocation16_spill] sm:$0xff]  ;;  %v5238_v36 = vld [vmem:[#allocation21_spill] sm:$0xff] }
 0x214   :  { %v1087_v48 = vadd.f32 %v1031_v10, %v971_v41  ;;  %v1387_v28 = vmul.f32 %v4586_v57, %v390_v1  ;;  %v2838_v44 = vpop.eup %2837  ;;  %v1327_v12 = vadd.f32 %v1271_v17, %v1211_v18  ;;  %v2230_v31 = vadd.f32 %v4640_v30, %v5081_v62  ;;  %v5239_v18 = vld [vmem:[#allocation18_spill] sm:$0xff]  ;;  %p2928_p13 = por %p2927_p12, %p2926_p11 }
 0x215   :  { %v1794_v0 = vmul.f32 0.7978846, %v1730_v42  ;;  %v2358_v16 = vadd.f32 %v4642_v50, %v5081_v62  ;;  %v2016_v15 = vadd.f32 1.0, %v2838_v44  ;;  %v1150_v63 = vadd.f32 %v1086_v43, %v794_v35  ;;  %v5240_v35 = vld [vmem:[#allocation22_spill] sm:$0xff]  ;;  %v5242_v44 = vld [vmem:[#allocation23_spill] sm:$0xff] }
 0x216   :  { %v2840_v26 = vpop.eup %2839  ;;  %v5093_v21 = vadd.f32 %v1087_v48, %v795_v22  ;;  %v2222_v9 = vadd.f32 %v5081_v62, %v4646_v19  ;;  %v1443_v57 = vadd.f32 %v1387_v28, %v1327_v12  ;;  %2478 = vst [vmem:[#allocation8 + $0x10] sm:$0xff] %v2230_v31  ;;  %v2350_v1 = vadd.f32 %v5081_v62, %v4648_v11  ;;  %v5241_v48 = vld [vmem:[#allocation19_spill] sm:$0xff]  ;;  %v5243_v31 = vld [vmem:[#allocation20_spill] sm:$0xff]  ;;  %p2929_p0 = pnand %p2928_p13, %p2922_p10 }
 0x217   :  { %v2017_v6 = vadd.f32 1.0, %v2840_v26  ;;  %2843 = vtanh.f32 %v1794_v0  ;;  %2510 = vst [vmem:[#allocation8 + $0x110] sm:$0xff] %v2358_v16  ;;  %v2080_v30 = vmul.f32 %v2016_v15, %v5032_v20  ;;  %v1859_v50 = vmul.f32 0.5, %v5028_v60  ;;  %v5244_v26 = vld [vmem:[#allocation24_spill] sm:$0xff] }
 0x218   :  { %v1571_v2 = vmul.f32 %v5093_v21, %v5093_v21  ;;  %2476 = vst [vmem:[#allocation8] sm:$0xff] %v2222_v9  ;;  %v2233_v40 = vadd.f32 %v4651_v29, %v5081_v62  ;;  %v5105_v3 = vadd.f32 %v1443_v57, %v1150_v63  ;;  %2508 = vst [vmem:[#allocation8 + $0x100] sm:$0xff] %v2350_v1 }
 0x219   :  { %v2081_v19 = vmul.f32 %v2017_v6, %v1889_v59  ;;  %v2361_v27 = vadd.f32 %v4653_v33, %v5081_v62  ;;  %v2225_v11 = vadd.f32 %v5081_v62, %v4661_v8  ;;  %v2671_v20 = vpop.f32.mrb[12].mxu1  ;;  %v2353_v52 = vadd.f32 %v5081_v62, %v4663_v38 }
 0x21a   :  { %v1635_v60 = vmul.f32 %v1571_v2, %v5093_v21  ;;  %2479 = vst [vmem:[#allocation8 + $0x18] sm:$0xff] %v2233_v40  ;;  %v2246_v29 = vadd.f32 %v4672_v45, %v5081_v62  ;;  %v2374_v59 = vadd.f32 %v4674_v54, %v5081_v62  ;;  %v2397_v46 = vpop.f32.mrb[13].mxu1  ;;  %v1858_v33 = vmul.f32 0.5, %v5038_v58  ;;  %v5232_v45 = vld [vmem:[#allocation12_spill] sm:$0xff]  ;;  %v5234_v58 = vld [vmem:[#allocation14_spill] sm:$0xff] }
 0x21b   :  { %v2114_v24 = vpack.c.bf16 %v2081_v19, %v2080_v30  ;;  %v1570_v8 = vmul.f32 %v5105_v3, %v5105_v3  ;;  %2511 = vst [vmem:[#allocation8 + $0x118] sm:$0xff] %v2361_v27  ;;  %2477 = vst [vmem:[#allocation8 + $0x8] sm:$0xff] %v2225_v11  ;;  %v2238_v47 = vadd.f32 %v5081_v62, %v4680_v23  ;;  %v2672_v34 = vpop.f32.mrb[14].mxu1  ;;  %v5235_v23 = vld [vmem:[#allocation15_spill] sm:$0xff] }
 0x21c   :  { %v1699_v38 = vmul.f32 0.044715, %v1635_v60  ;;  %2509 = vst [vmem:[#allocation8 + $0x108] sm:$0xff] %v2353_v52  ;;  %2482 = vst [vmem:[#allocation8 + $0x30] sm:$0xff] %v2246_v29  ;;  %v2366_v54 = vadd.f32 %v5081_v62, %v5232_v45  ;;  %v2249_v14 = vadd.f32 %v5233_v53, %v5081_v62  ;;  %v2377_v25 = vadd.f32 %v5234_v58, %v5081_v62  ;;  %v2400_v55 = vpop.f32.mrb[15].mxu1 }
 0x21d   :  { %2514 = vst [vmem:[#allocation8 + $0x130] sm:$0xff] %v2374_v59  ;;  %2685 = vmatprep.mubr.bf16.mxu1 %v2114_v24  ;;  %v1634_v13 = vmul.f32 %v1570_v8, %v5105_v3  ;;  %2480 = vst [vmem:[#allocation8 + $0x20] sm:$0xff] %v2238_v47  ;;  %v2241_v39 = vadd.f32 %v5081_v62, %v5235_v23  ;;  %v2369_v37 = vadd.f32 %v5081_v62, %v5236_v61  ;;  %v2842_v10 = vpop.eup %2841 }
 0x21e   :  { %v2262_v4 = vadd.f32 %v5237_v5, %v5081_v62  ;;  %v1763_v49 = vadd.f32 %v1699_v38, %v5093_v21  ;;  %2512 = vst [vmem:[#allocation8 + $0x120] sm:$0xff] %v2366_v54  ;;  %2483 = vst [vmem:[#allocation8 + $0x38] sm:$0xff] %v2249_v14  ;;  %v2390_v41 = vadd.f32 %v5238_v36, %v5081_v62  ;;  %v1987_v17 = vadd.f32 1.0, %v2842_v10 }
 0x21f   :  { %2515 = vst [vmem:[#allocation8 + $0x138] sm:$0xff] %v2377_v25  ;;  %v2254_v42 = vadd.f32 %v5081_v62, %v5239_v18  ;;  %v2382_v22 = vadd.f32 %v5081_v62, %v5240_v35  ;;  %v1698_v43 = vmul.f32 0.044715, %v1634_v13  ;;  %2481 = vst [vmem:[#allocation8 + $0x28] sm:$0xff] %v2241_v39  ;;  %v2265_v28 = vadd.f32 %v5241_v48, %v5081_v62 }
 0x220   :  { %2513 = vst [vmem:[#allocation8 + $0x128] sm:$0xff] %v2369_v37  ;;  %2486 = vst [vmem:[#allocation8 + $0x50] sm:$0xff] %v2262_v4  ;;  %v2393_v0 = vadd.f32 %v5242_v44, %v5081_v62  ;;  %v1827_v12 = vmul.f32 0.7978846, %v1763_v49  ;;  %v2257_v16 = vadd.f32 %v5081_v62, %v5243_v31  ;;  %v2385_v15 = vadd.f32 %v5081_v62, %v5244_v26 }
 0x221   :  { %2518 = vst [vmem:[#allocation8 + $0x150] sm:$0xff] %v2390_v41  ;;  %2484 = vst [vmem:[#allocation8 + $0x40] sm:$0xff] %v2254_v42  ;;  %v2278_v63 = vadd.f32 %v5042_v56, %v5081_v62  ;;  %v2844_v9 = vpop.eup %2843  ;;  %v2051_v6 = vmul.f32 %v1987_v17, %v1859_v50  ;;  %v1762_v57 = vadd.f32 %v1698_v43, %v5105_v3  ;;  %v1891_v60 = vmul.f32 0.5, %v5093_v21 }
 0x222   :  { %2516 = vst [vmem:[#allocation8 + $0x140] sm:$0xff] %v2382_v22  ;;  %2487 = vst [vmem:[#allocation8 + $0x58] sm:$0xff] %v2265_v28  ;;  %v2406_v1 = vadd.f32 %v2671_v20, %v5081_v62  ;;  %v2270_v30 = vadd.f32 %v5081_v62, %v5048_v51  ;;  %v1986_v2 = vadd.f32 1.0, %v2844_v9  ;;  %2845 = vtanh.f32 %v1827_v12 }
 0x223   :  { %2519 = vst [vmem:[#allocation8 + $0x158] sm:$0xff] %v2393_v0  ;;  %2485 = vst [vmem:[#allocation8 + $0x48] sm:$0xff] %v2257_v16  ;;  %v2398_v40 = vadd.f32 %v5081_v62, %v2397_v46  ;;  %v2281_v56 = vadd.f32 %v5056_v7, %v5081_v62  ;;  %v1826_v50 = vmul.f32 0.7978846, %v1762_v57  ;;  %v2409_v19 = vadd.f32 %v2672_v34, %v5081_v62 }
 0x224   :  { %2517 = vst [vmem:[#allocation8 + $0x148] sm:$0xff] %v2385_v15  ;;  %2490 = vst [vmem:[#allocation8 + $0x70] sm:$0xff] %v2278_v63  ;;  %v2273_v27 = vadd.f32 %v5081_v62, %v5063_v32  ;;  %v2401_v51 = vadd.f32 %v5081_v62, %v2400_v55  ;;  %v2050_v11 = vmul.f32 %v1986_v2, %v1858_v33  ;;  %v1890_v29 = vmul.f32 0.5, %v5105_v3 }
 0x225   :  { %2522 = vst [vmem:[#allocation8 + $0x170] sm:$0xff] %v2406_v1  ;;  %2488 = vst [vmem:[#allocation8 + $0x60] sm:$0xff] %v2270_v30  ;;  %2847 = vtanh.f32 %v1826_v50 }
 0x226   :  { %2520 = vst [vmem:[#allocation8 + $0x160] sm:$0xff] %v2398_v40  ;;  %2491 = vst [vmem:[#allocation8 + $0x78] sm:$0xff] %v2281_v56  ;;  %v2099_v20 = vpack.c.bf16 %v2051_v6, %v2050_v11 }
 0x227   :  { %2523 = vst [vmem:[#allocation8 + $0x178] sm:$0xff] %v2409_v19  ;;  %2489 = vst [vmem:[#allocation8 + $0x68] sm:$0xff] %v2273_v27 }
 0x228   :  { %2521 = vst [vmem:[#allocation8 + $0x168] sm:$0xff] %v2401_v51  ;;  %2654 = vmatmul.mubr.bf16.gmra.mrb[28].mxu0 %v2099_v20 }
 0x22c   :  { %v2846_v7 = vpop.eup %2845 }
 0x22d   :  { %v2019_v52 = vadd.f32 1.0, %v2846_v7 }
 0x22f   :  { %v2848_v59 = vpop.eup %2847  ;;  %v2083_v32 = vmul.f32 %v2019_v52, %v1891_v60 }
 0x230   :  { %v2018_v46 = vadd.f32 1.0, %v2848_v59 }
 0x232   :  { %v2082_v24 = vmul.f32 %v2018_v46, %v1890_v29 }
 0x234   :  { %v2115_v8 = vpack.c.bf16 %v2083_v32, %v2082_v24 }
 0x236   :  { %2686 = vmatmul.mubr.bf16.gmra.mrb[28].mxu1 %v2115_v8 }
 0x249   :  { %v2643_v33 = vpop.f32.mrb[16].mxu0 }
 0x24a   :  { %v2294_v47 = vadd.f32 %v2643_v33, %v5081_v62  ;;  %v2285_v34 = vpop.f32.mrb[17].mxu0 }
 0x24b   :  { %v2286_v38 = vadd.f32 %v5081_v62, %v2285_v34  ;;  %v2644_v45 = vpop.f32.mrb[18].mxu0 }
 0x24c   :  { %2494 = vst [vmem:[#allocation8 + $0x90] sm:$0xff] %v2294_v47  ;;  %v2297_v54 = vadd.f32 %v2644_v45, %v5081_v62  ;;  %v2288_v21 = vpop.f32.mrb[19].mxu0 }
 0x24d   :  { %2492 = vst [vmem:[#allocation8 + $0x80] sm:$0xff] %v2286_v38  ;;  %v2289_v3 = vadd.f32 %v5081_v62, %v2288_v21 }
 0x24e   :  { %2495 = vst [vmem:[#allocation8 + $0x98] sm:$0xff] %v2297_v54 }
 0x24f   :  { %2493 = vst [vmem:[#allocation8 + $0x88] sm:$0xff] %v2289_v3 }
 0x258   :  { %v2675_v53 = vpop.f32.mrb[16].mxu1 }
 0x259   :  { %v2422_v14 = vadd.f32 %v2675_v53, %v5081_v62  ;;  %v2413_v58 = vpop.f32.mrb[17].mxu1 }
 0x25a   :  { %v2414_v25 = vadd.f32 %v5081_v62, %v2413_v58  ;;  %v2676_v55 = vpop.f32.mrb[18].mxu1 }
 0x25b   :  { %2526 = vst [vmem:[#allocation8 + $0x190] sm:$0xff] %v2422_v14  ;;  %v2425_v13 = vadd.f32 %v2676_v55, %v5081_v62  ;;  %v2416_v23 = vpop.f32.mrb[19].mxu1 }
 0x25c   :  { %2524 = vst [vmem:[#allocation8 + $0x180] sm:$0xff] %v2414_v25  ;;  %v2417_v39 = vadd.f32 %v5081_v62, %v2416_v23 }
 0x25d   :  { %2527 = vst [vmem:[#allocation8 + $0x198] sm:$0xff] %v2425_v13 }
 0x25e   :  { %2525 = vst [vmem:[#allocation8 + $0x188] sm:$0xff] %v2417_v39 }
 0x283   :  { %v2647_v61 = vpop.f32.mrb[20].mxu0 }
 0x284   :  { %v2310_v37 = vadd.f32 %v2647_v61, %v5081_v62  ;;  %v2301_v5 = vpop.f32.mrb[21].mxu0 }
 0x285   :  { %v2302_v4 = vadd.f32 %v5081_v62, %v2301_v5  ;;  %v2648_v10 = vpop.f32.mrb[22].mxu0 }
 0x286   :  { %2498 = vst [vmem:[#allocation8 + $0xb0] sm:$0xff] %v2310_v37  ;;  %v2313_v49 = vadd.f32 %v2648_v10, %v5081_v62  ;;  %v2304_v36 = vpop.f32.mrb[23].mxu0 }
 0x287   :  { %2496 = vst [vmem:[#allocation8 + $0xa0] sm:$0xff] %v2302_v4  ;;  %v2305_v41 = vadd.f32 %v5081_v62, %v2304_v36 }
 0x288   :  { %2499 = vst [vmem:[#allocation8 + $0xb8] sm:$0xff] %v2313_v49 }
 0x289   :  { %2497 = vst [vmem:[#allocation8 + $0xa8] sm:$0xff] %v2305_v41 }
 0x290   :  { %v2679_v18 = vpop.f32.mrb[20].mxu1 }
 0x291   :  { %v2438_v42 = vadd.f32 %v2679_v18, %v5081_v62  ;;  %v2429_v35 = vpop.f32.mrb[21].mxu1 }
 0x292   :  { %v2430_v22 = vadd.f32 %v5081_v62, %v2429_v35  ;;  %v2680_v17 = vpop.f32.mrb[22].mxu1 }
 0x293   :  { %2530 = vst [vmem:[#allocation8 + $0x1b0] sm:$0xff] %v2438_v42  ;;  %v2441_v43 = vadd.f32 %v2680_v17, %v5081_v62  ;;  %v2432_v48 = vpop.f32.mrb[23].mxu1 }
 0x294   :  { %2528 = vst [vmem:[#allocation8 + $0x1a0] sm:$0xff] %v2430_v22  ;;  %v2433_v28 = vadd.f32 %v5081_v62, %v2432_v48 }
 0x295   :  { %2531 = vst [vmem:[#allocation8 + $0x1b8] sm:$0xff] %v2441_v43 }
 0x296   :  { %2529 = vst [vmem:[#allocation8 + $0x1a8] sm:$0xff] %v2433_v28 }
 0x2c1   :  { %v2651_v44 = vpop.f32.mrb[24].mxu0 }
 0x2c2   :  { %v2326_v0 = vadd.f32 %v2651_v44, %v5081_v62  ;;  %v2317_v12 = vpop.f32.mrb[25].mxu0 }
 0x2c3   :  { %v2318_v31 = vadd.f32 %v5081_v62, %v2317_v12  ;;  %v2652_v16 = vpop.f32.mrb[26].mxu0 }
 0x2c4   :  { %2502 = vst [vmem:[#allocation8 + $0xd0] sm:$0xff] %v2326_v0  ;;  %v2329_v26 = vadd.f32 %v2652_v16, %v5081_v62  ;;  %v2320_v15 = vpop.f32.mrb[27].mxu0 }
 0x2c5   :  { %2500 = vst [vmem:[#allocation8 + $0xc0] sm:$0xff] %v2318_v31  ;;  %v2321_v63 = vadd.f32 %v5081_v62, %v2320_v15 }
 0x2c6   :  { %2503 = vst [vmem:[#allocation8 + $0xd8] sm:$0xff] %v2329_v26 }
 0x2c7   :  { %2501 = vst [vmem:[#allocation8 + $0xc8] sm:$0xff] %v2321_v63 }
 0x2d0   :  { %v2683_v9 = vpop.f32.mrb[24].mxu1 }
 0x2d1   :  { %v2454_v6 = vadd.f32 %v2683_v9, %v5081_v62  ;;  %v2445_v57 = vpop.f32.mrb[25].mxu1 }
 0x2d2   :  { %v2446_v1 = vadd.f32 %v5081_v62, %v2445_v57  ;;  %v2684_v30 = vpop.f32.mrb[26].mxu1 }
 0x2d3   :  { %2534 = vst [vmem:[#allocation8 + $0x1d0] sm:$0xff] %v2454_v6  ;;  %v2457_v2 = vadd.f32 %v2684_v30, %v5081_v62  ;;  %v2448_v40 = vpop.f32.mrb[27].mxu1 }
 0x2d4   :  { %2532 = vst [vmem:[#allocation8 + $0x1c0] sm:$0xff] %v2446_v1  ;;  %v2449_v56 = vadd.f32 %v5081_v62, %v2448_v40 }
 0x2d5   :  { %2535 = vst [vmem:[#allocation8 + $0x1d8] sm:$0xff] %v2457_v2 }
 0x2d6   :  { %2533 = vst [vmem:[#allocation8 + $0x1c8] sm:$0xff] %v2449_v56 }
 0x2fb   :  { %v2655_v50 = vpop.f32.mrb[28].mxu0 }
 0x2fc   :  { %v2342_v19 = vadd.f32 %v2655_v50, %v5081_v62  ;;  %v2333_v27 = vpop.f32.mrb[29].mxu0 }
 0x2fd   :  { %v2334_v51 = vadd.f32 %v5081_v62, %v2333_v27  ;;  %v2656_v11 = vpop.f32.mrb[30].mxu0 }
 0x2fe   :  { %2506 = vst [vmem:[#allocation8 + $0xf0] sm:$0xff] %v2342_v19  ;;  %v2345_v20 = vadd.f32 %v2656_v11, %v5081_v62  ;;  %v2336_v7 = vpop.f32.mrb[31].mxu0 }
 0x2ff   :  { %2504 = vst [vmem:[#allocation8 + $0xe0] sm:$0xff] %v2334_v51  ;;  %v2337_v60 = vadd.f32 %v5081_v62, %v2336_v7 }
 0x300   :  { %2507 = vst [vmem:[#allocation8 + $0xf8] sm:$0xff] %v2345_v20 }
 0x301   :  { %2505 = vst [vmem:[#allocation8 + $0xe8] sm:$0xff] %v2337_v60 }
 0x309   :  { %v2687_v52 = vpop.f32.mrb[28].mxu1 }
 0x30a   :  { %v2470_v29 = vadd.f32 %v2687_v52, %v5081_v62  ;;  %v2461_v59 = vpop.f32.mrb[29].mxu1 }
 0x30b   :  { %v2462_v46 = vadd.f32 %v5081_v62, %v2461_v59  ;;  %v2688_v32 = vpop.f32.mrb[30].mxu1 }
 0x30c   :  { %2538 = vst [vmem:[#allocation8 + $0x1f0] sm:$0xff] %v2470_v29  ;;  %v2473_v24 = vadd.f32 %v2688_v32, %v5081_v62  ;;  %v2464_v8 = vpop.f32.mrb[31].mxu1 }
 0x30d   :  { %2536 = vst [vmem:[#allocation8 + $0x1e0] sm:$0xff] %v2462_v46  ;;  %v2465_v33 = vadd.f32 %v5081_v62, %v2464_v8 }
 0x30e   :  { %2539 = vst [vmem:[#allocation8 + $0x1f8] sm:$0xff] %v2473_v24 }
 0x30f   :  { %2537 = vst [vmem:[#allocation8 + $0x1e8] sm:$0xff] %v2465_v33 }
 0x310   :  { %2932 = shalt.err (!%p2929_p0)
}
 0x311   :  { %s2933_s19 = scalar_lea.hbm %s5218_s5, 8192 }
 0x312   :  { %p2934_p1 = scmp.ne.s32.totalorder %s5218_s5, %s2933_s19  ;;  %p2937_p2 = scmp.lt.u32.totalorder %s2933_s19, %s5218_s5 }
 0x314   :  { %p2939_p3 = pnand %p2937_p2, %p2934_p1 }
 0x316   :  { %2942 = shalt.err (!%p2939_p3)
}
 0x317   :  { %2551 = dma.vmem_to_hbm [thread:$0]  %s2546_s16, 8192, %s5218_s5, [#allocation4], %s2951_s30, %s2951_s30, %s2952_s6  }
 0x318   :  { %2947 = dma.done.wait [#allocation4], 8192  }
 0x319   :  { %2948 = vsyncadd [#allocation4], 4294959104 }
 0x31a   :  { %2555 = vsyncpa [#allocation3], 1 }
 0x31b   :  { %2556 = vsyncpa [#allocation6], 1 }
 0x31c   :  { %2557 = vsyncpa [#allocation4], 1 }

</bundles_post_ra>
